<compile_context>
chip_gen: v5e
topology: v5e:2x2
jax: 0.10.0
libtpu: 0.0.40
codegen_flags: <defaults>
</compile_context>

<pallas_src>
import math

import jax
import jax.numpy as jnp
from jax import lax
from jax.experimental import pallas as pl
from jax.experimental.pallas import tpu as pltpu


def _leaky_relu(x, slope=0.2):
    return jnp.where(x > 0, x, slope * x)


def _disc_kernel(x_ref, w1_ref, b1_ref, w2_ref, b2_ref, w3_ref, b3_ref, o_ref):
    # Layer 1: (tile_b, F) bf16 @ (F, 512) bf16 -> f32 accumulate.
    h = jnp.dot(x_ref[...], w1_ref[...], preferred_element_type=jnp.float32)
    h = _leaky_relu(h + b1_ref[...])                       # f32 bias + act
    # Layer 2: re-cast activations to bf16 for the MXU, accumulate in f32.
    h = jnp.dot(h.astype(jnp.bfloat16), w2_ref[...],
                preferred_element_type=jnp.float32)
    h = _leaky_relu(h + b2_ref[...])                       # (tile_b, 256) f32
    # Layer 3: (1, 256) . (tile_b, 256)^T -> (1, tile_b), lane-dense output row.
    out = lax.dot_general(
        w3_ref[...], h,
        dimension_numbers=(((1,), (1,)), ((), ())),
        preferred_element_type=jnp.float32,
    )
    o_ref[...] = (out + b3_ref[...]).astype(o_ref.dtype)


def discriminator_forward(img, params, *, tile_b=256):
    """img: (B, feature_size) float32.  Returns validity: (B, 1) float32."""
    w1, b1, w2, b2, w3, b3 = params
    B, F = img.shape

    n_tiles = pl.cdiv(B, tile_b)
    b_pad = n_tiles * tile_b

    x = img.astype(jnp.bfloat16)
    if b_pad != B:
        x = jnp.pad(x, ((0, b_pad - B), (0, 0)))

    w1b = w1.astype(jnp.bfloat16)
    w2b = w2.astype(jnp.bfloat16)
    w3r = w3.reshape(1, -1).astype(jnp.float32)     # (1, 256) row

    full = lambda arr: pl.BlockSpec(arr.shape, lambda i: (0, 0))

    out = pl.pallas_call(
        _disc_kernel,
        out_shape=jax.ShapeDtypeStruct((1, b_pad), jnp.float32),
        grid=(n_tiles,),
        in_specs=[
            pl.BlockSpec((tile_b, F), lambda i: (i, 0)),   # x batch tile
            full(w1b),        # (F, 512)    bf16
            full(b1),         # (1, 512)    f32
            full(w2b),        # (512, 256)  bf16
            full(b2),         # (1, 256)    f32
            full(w3r),        # (1, 256)    f32
            full(b3),         # (1, 1)      f32
        ],
        out_specs=pl.BlockSpec((1, tile_b), lambda i: (0, i)),
        compiler_params=pltpu.CompilerParams(
            dimension_semantics=("parallel",),
        ),
    )(x, w1b, b1, w2b, b2, w3r, b3)

    return out.reshape(b_pad, 1)[:B]


def init_params(key, feature_size):
    """nn.Linear-style init (uniform +-1/sqrt(fan_in)); W stored as (in, out)."""
    dims = [(feature_size, 512), (512, 256), (256, 1)]
    params = []
    for (fan_in, fan_out) in dims:
        key, kw, kb = jax.random.split(key, 3)
        bound = 1.0 / math.sqrt(fan_in)
        w = jax.random.uniform(kw, (fan_in, fan_out), jnp.float32, -bound, bound)
        b = jax.random.uniform(kb, (1, fan_out), jnp.float32, -bound, bound)
        params += [w, b]
    return tuple(params)


def reference_forward(img, params):
    """Emulates the kernel's precision: bf16 operands, f32 accumulation."""
    w1, b1, w2, b2, w3, b3 = params
    f32 = jnp.float32
    hi = jax.lax.Precision.HIGHEST

    x = img.astype(jnp.bfloat16).astype(f32)
    h = jnp.dot(x, w1.astype(jnp.bfloat16).astype(f32), precision=hi) + b1
    h = jnp.where(h > 0, h, 0.2 * h)
    h = h.astype(jnp.bfloat16).astype(f32)
    h = jnp.dot(h, w2.astype(jnp.bfloat16).astype(f32), precision=hi) + b2
    h = jnp.where(h > 0, h, 0.2 * h)
    return jnp.dot(h, w3, precision=hi) + b3


if __name__ == "__main__":
    key = jax.random.PRNGKey(0)
    k_param, k_img = jax.random.split(key)

    batch = 300          # exercises B % tile_b != 0 padding and 2 grid steps
    feature_size = 128   # opt.feature_size

    params = init_params(k_param, feature_size)
    # img arrives as (B, feature_size); PyTorch's .view(B, -1) is identity here.
    img = jax.random.normal(k_img, (batch, feature_size), jnp.float32)

    validity = discriminator_forward(img, params)
    validity = jax.block_until_ready(validity)

    ref = reference_forward(img, params)
    assert validity.shape == (batch, 1)
    assert jnp.allclose(validity, ref, atol=2e-3, rtol=2e-3), "mismatch vs reference"

    print("KERNEL_OK")
</pallas_src>

<mosaic_0001>
module attributes {stable_mosaic.version = 11 : i64} {
  func.func @_disc_kernel(%arg0: i32, %arg1: memref<256x128xbf16, #tpu.memory_space<vmem>>, %arg2: memref<128x512xbf16, #tpu.memory_space<vmem>>, %arg3: memref<1x512xf32, #tpu.memory_space<vmem>>, %arg4: memref<512x256xbf16, #tpu.memory_space<vmem>>, %arg5: memref<1x256xf32, #tpu.memory_space<vmem>>, %arg6: memref<1x256xf32, #tpu.memory_space<vmem>>, %arg7: memref<1x1xf32, #tpu.memory_space<vmem>>, %arg8: memref<1x256xf32, #tpu.memory_space<vmem>>) attributes {dimension_semantics = [#tpu.dimension_semantics<parallel>], iteration_bounds = array<i64: 2>, scalar_prefetch = 0 : i64, scratch_operands = 0 : i64, tpu.core_type = #tpu.core_type<tc>, window_params = [{transform_indices = @transform_0, window_bounds = array<i64: 256, 128>}, {pipeline_mode = #tpu.pipeline_mode<synchronous>, transform_indices = @transform_1, window_bounds = array<i64: 128, 512>}, {pipeline_mode = #tpu.pipeline_mode<synchronous>, transform_indices = @transform_2, window_bounds = array<i64: 1, 512>}, {pipeline_mode = #tpu.pipeline_mode<synchronous>, transform_indices = @transform_3, window_bounds = array<i64: 512, 256>}, {pipeline_mode = #tpu.pipeline_mode<synchronous>, transform_indices = @transform_4, window_bounds = array<i64: 1, 256>}, {pipeline_mode = #tpu.pipeline_mode<synchronous>, transform_indices = @transform_5, window_bounds = array<i64: 1, 256>}, {pipeline_mode = #tpu.pipeline_mode<synchronous>, transform_indices = @transform_6, window_bounds = array<i64: 1, 1>}, {transform_indices = @transform_7, window_bounds = array<i64: 1, 256>}]} {
    %c0 = arith.constant 0 : index
    %c0_0 = arith.constant 0 : index
    %0 = vector.load %arg1[%c0, %c0_0] : memref<256x128xbf16, #tpu.memory_space<vmem>>, vector<256x128xbf16>
    %c0_1 = arith.constant 0 : index
    %c0_2 = arith.constant 0 : index
    %1 = vector.load %arg2[%c0_1, %c0_2] : memref<128x512xbf16, #tpu.memory_space<vmem>>, vector<128x512xbf16>
    %cst = arith.constant dense<0.000000e+00> : vector<256x512xf32>
    %2 = tpu.matmul %0, %1, %cst {dimension_numbers = #tpu.dot_dimension_numbers<[1], [0], [0], [1], [0, 0, 1, 1], [], []>} : vector<256x128xbf16>, vector<128x512xbf16>, vector<256x512xf32> -> vector<256x512xf32>
    %c0_3 = arith.constant 0 : index
    %c0_4 = arith.constant 0 : index
    %3 = vector.load %arg3[%c0_3, %c0_4] : memref<1x512xf32, #tpu.memory_space<vmem>>, vector<1x512xf32>
    %4 = vector.broadcast %3 : vector<1x512xf32> to vector<256x512xf32>
    %5 = arith.addf %2, %4 : vector<256x512xf32>
    %cst_5 = arith.constant 0.000000e+00 : f32
    %6 = vector.broadcast %cst_5 : f32 to vector<256x512xf32>
    %7 = arith.cmpf ogt, %5, %6 : vector<256x512xf32>
    %cst_6 = arith.constant 2.000000e-01 : f32
    %8 = vector.broadcast %cst_6 : f32 to vector<256x512xf32>
    %9 = arith.mulf %8, %5 : vector<256x512xf32>
    %10 = arith.select %7, %5, %9 : vector<256x512xi1>, vector<256x512xf32>
    %11 = arith.truncf %10 : vector<256x512xf32> to vector<256x512xbf16>
    %c0_7 = arith.constant 0 : index
    %c0_8 = arith.constant 0 : index
    %12 = vector.load %arg4[%c0_7, %c0_8] : memref<512x256xbf16, #tpu.memory_space<vmem>>, vector<512x256xbf16>
    %cst_9 = arith.constant dense<0.000000e+00> : vector<256x256xf32>
    %13 = tpu.matmul %11, %12, %cst_9 {dimension_numbers = #tpu.dot_dimension_numbers<[1], [0], [0], [1], [0, 0, 1, 1], [], []>} : vector<256x512xbf16>, vector<512x256xbf16>, vector<256x256xf32> -> vector<256x256xf32>
    %c0_10 = arith.constant 0 : index
    %c0_11 = arith.constant 0 : index
    %14 = vector.load %arg5[%c0_10, %c0_11] : memref<1x256xf32, #tpu.memory_space<vmem>>, vector<1x256xf32>
    %15 = vector.broadcast %14 : vector<1x256xf32> to vector<256x256xf32>
    %16 = arith.addf %13, %15 : vector<256x256xf32>
    %cst_12 = arith.constant 0.000000e+00 : f32
    %17 = vector.broadcast %cst_12 : f32 to vector<256x256xf32>
    %18 = arith.cmpf ogt, %16, %17 : vector<256x256xf32>
    %cst_13 = arith.constant 2.000000e-01 : f32
    %19 = vector.broadcast %cst_13 : f32 to vector<256x256xf32>
    %20 = arith.mulf %19, %16 : vector<256x256xf32>
    %21 = arith.select %18, %16, %20 : vector<256x256xi1>, vector<256x256xf32>
    %c0_14 = arith.constant 0 : index
    %c0_15 = arith.constant 0 : index
    %22 = vector.load %arg6[%c0_14, %c0_15] : memref<1x256xf32, #tpu.memory_space<vmem>>, vector<1x256xf32>
    %cst_16 = arith.constant dense<0.000000e+00> : vector<1x256xf32>
    %23 = tpu.matmul %22, %21, %cst_16 {dimension_numbers = #tpu.dot_dimension_numbers<[1], [1], [0], [0], [0, 0, 1, 0], [], []>} : vector<1x256xf32>, vector<256x256xf32>, vector<1x256xf32> -> vector<1x256xf32>
    %c0_17 = arith.constant 0 : index
    %c0_18 = arith.constant 0 : index
    %24 = vector.load %arg7[%c0_17, %c0_18] : memref<1x1xf32, #tpu.memory_space<vmem>>, vector<1x1xf32>
    %25 = vector.broadcast %24 : vector<1x1xf32> to vector<1x256xf32>
    %26 = arith.addf %23, %25 : vector<1x256xf32>
    %c0_19 = arith.constant 0 : index
    %c0_20 = arith.constant 0 : index
    %27 = vector.load %arg8[%c0_19, %c0_20] : memref<1x256xf32, #tpu.memory_space<vmem>>, vector<1x256xf32>
    tpu.vector_store %arg8[%c0_19, %c0_20], %26 {strides = array<i32>} : memref<1x256xf32, #tpu.memory_space<vmem>>, vector<1x256xf32>,
    return
  }
  func.func @transform_0(%arg0: i32) -> (i32, i32) {
    %c0_i32 = arith.constant 0 : i32
    %c0_i32_0 = arith.constant 0 : i32
    return %arg0, %c0_i32 : i32, i32
  }
  func.func @transform_1(%arg0: i32) -> (i32, i32) {
    %c0_i32 = arith.constant 0 : i32
    %c0_i32_0 = arith.constant 0 : i32
    %c0_i32_1 = arith.constant 0 : i32
    return %c0_i32, %c0_i32_0 : i32, i32
  }
  func.func @transform_2(%arg0: i32) -> (i32, i32) {
    %c0_i32 = arith.constant 0 : i32
    %c0_i32_0 = arith.constant 0 : i32
    %c0_i32_1 = arith.constant 0 : i32
    return %c0_i32, %c0_i32_0 : i32, i32
  }
  func.func @transform_3(%arg0: i32) -> (i32, i32) {
    %c0_i32 = arith.constant 0 : i32
    %c0_i32_0 = arith.constant 0 : i32
    %c0_i32_1 = arith.constant 0 : i32
    return %c0_i32, %c0_i32_0 : i32, i32
  }
  func.func @transform_4(%arg0: i32) -> (i32, i32) {
    %c0_i32 = arith.constant 0 : i32
    %c0_i32_0 = arith.constant 0 : i32
    %c0_i32_1 = arith.constant 0 : i32
    return %c0_i32, %c0_i32_0 : i32, i32
  }
  func.func @transform_5(%arg0: i32) -> (i32, i32) {
    %c0_i32 = arith.constant 0 : i32
    %c0_i32_0 = arith.constant 0 : i32
    %c0_i32_1 = arith.constant 0 : i32
    return %c0_i32, %c0_i32_0 : i32, i32
  }
  func.func @transform_6(%arg0: i32) -> (i32, i32) {
    %c0_i32 = arith.constant 0 : i32
    %c0_i32_0 = arith.constant 0 : i32
    %c0_i32_1 = arith.constant 0 : i32
    return %c0_i32, %c0_i32_0 : i32, i32
  }
  func.func @transform_7(%arg0: i32) -> (i32, i32) {
    %c0_i32 = arith.constant 0 : i32
    %c0_i32_0 = arith.constant 0 : i32
    return %c0_i32, %arg0 : i32, i32
  }
}

</mosaic_0001>

<bundles_post_ra>
// kernel: tpu_custom_call.1
= control target key start
LH: loop header
LB: loop body
LE: loop exit
PB: predicated region body
PF: predicated region fallthrough
CT: control target
= control target key end

     0   :  { %s4883_s0 = inlined_call_operand.hbm [shape: bf16[512,128], index: 0, kind: input, shape index: {}]   ;;  %s4884_s1 = inlined_call_operand.hbm [shape: bf16[128,512], index: 1, kind: input, shape index: {}]   ;;  %s4885_s2 = inlined_call_operand.hbm [shape: f32[1,512], index: 2, kind: input, shape index: {}]   ;;  %s4886_s3 = inlined_call_operand.hbm [shape: bf16[512,256], index: 3, kind: input, shape index: {}]   ;;  %s4887_s4 = inlined_call_operand.vmem [shape: f32[1,256], index: 4, kind: input, shape index: {}]   ;;  %s4888_s5 = inlined_call_operand.vmem [shape: f32[1,256], index: 5, kind: input, shape index: {}]   ;;  %s4889_s6 = inlined_call_operand.<no memory space> [shape: f32[1,1], index: 6, kind: input, shape index: {}]   ;;  %s4890_s7 = inlined_call_operand.hbm [shape: f32[1,512], index: 7, kind: output, shape index: {}]  }
   0x1   :  { %v12_v0 = vstv %s4889_s6 }
   0x2   :  { %13 = vst [vmem:[#allocation2] sm:$0x1] %v12_v0 }
   0x3   :  { %14 = vsyncpa [#allocation4], 0 }
   0x4   :  { %16 = vsyncpa [#allocation4 + $0x1], 0 }
   0x5   :  { %17 = vsyncpa [#allocation7], 0 }
   0x6   :  { %18 = vsyncpa [#allocation10], 0 }
   0x7   :  { %19 = vsyncpa [#allocation5], 0 }
   0x8   :  { %21 = vsyncpa [#allocation5 + $0x1], 0  ;;  %s3913_s26 = smov 0   ;;  %s3915_s27 = smov 0  }
   0x9   :  { %s3917_s28 = smov 0   ;;  %s3919_s29 = smov 0  }
   0xa LB: > { %s3934_s6 = sadd.s32 4294967295, %s3858_s29   ;;  %s2998_s30 = sadd.s32 4294967294, %s3858_s29   ;;  %s3858_s29 = sphi %s3919_s29, %s5048_s29   ;;  %s3854_s28 = sphi %s3917_s28, %s5047_s28   ;;  %s3850_s27 = sphi %s3915_s27, %s5046_s27   ;;  %s3846_s26 = sphi %s3913_s26, %s5045_s26  }
   0xb   : > { %p47_p0 = scmp.ne.s32.totalorder %s3850_s27, %s3846_s26  ;;  %p48_p1 = scmp.eq.s32.totalorder %s3934_s6, 0 }
   0xc   : > { %p197_p2 = scmp.eq.s32.totalorder %s3934_s6, 1  ;;  %p203_p3 = scmp.eq.s32.totalorder %s2998_s30, 1 }
   0xd   : > { %p3943_p4 = por %p48_p1, %p47_p0  ;;  %p2999_p5 = scmp.ge.s32.totalorder %s3858_s29, 1 }
   0xe   : > { %p3948_p6 = por %p203_p3, %p47_p0  ;;  %p210_p7 = scmp.lt.s32.totalorder %s3858_s29, 3 }
   0xf   : > { %s221_s12 = sshll.u32 %s4884_s1, 4  ;;  %s3860_s14 = smov [#allocation6]   ;;  %s222_s12 = int_to_ptr.hbm [resolvable:$true] %s221_s12 }
  0x10   : > { %p3956_p8 = pnand %p2999_p5, %p210_p7  ;;  %s223_s15 = sshll.u32 %s3860_s14, 4  ;;  %s224_s15 = int_to_ptr.vmem [resolvable:$true] %s223_s15 }
  0x11   : > { %s236_s19 = sshll.u32 %s4885_s2, 4  ;;  %s3861_s20 = smov 256   ;;  %s237_s19 = int_to_ptr.hbm [resolvable:$true] %s236_s19 }
  0x12   : > { %p3594_p9 = pneg %p3956_p8  ;;  %s3862_s21 = smov 16  }
  0x13   : > { %s3863_s22 = smov [#allocation8]   ;;  %s247_s30 = sshll.u32 %s4886_s3, 4  ;;  %s248_s30 = int_to_ptr.hbm [resolvable:$true] %s247_s30 }
  0x14   : > { %p3964_p10 = pnand %p3594_p9, %p48_p1  ;;  %s238_s23 = sshll.u32 %s3863_s22, 4  ;;  %s239_s23 = int_to_ptr.vmem [resolvable:$true] %s238_s23 }
  0x15   : > { %s3864_s10 = smov [#allocation9]   ;;  %s3866_s14 = smov 8  }
  0x16   : > { %3597 = dma.hbm_to_vmem [thread:$0]  (!%p3964_p10), %s222_s12, 4096, %s224_s15, [#allocation7], %s3861_s20, %s3861_s20, %s3862_s21  }
  0x17   : > { %3600 = dma.hbm_to_vmem [thread:$0]  (!%p3964_p10), %s237_s19, 64, %s239_s23, [#allocation7]  }
  0x18   : > { %s249_s11 = sshll.u32 %s3864_s10, 4  ;;  %s3865_s12 = smov 128   ;;  %s250_s11 = int_to_ptr.vmem [resolvable:$true] %s249_s11 }
  0x19   : > { %3603 = dma.hbm_to_vmem [thread:$0]  (!%p3964_p10), %s248_s30, 8192, %s250_s11, [#allocation10], %s3865_s12, %s3865_s12, %s3866_s14  }
  0x1a   : > { %s3982_s15 = sadd.s32 1, %s3858_s29   ;;  %s34_s18 = sadd.s32 1, %s3854_s28 }
  0x1b   : > { %s31_s17 = ssub.s32 %s3858_s29, %s3982_s15  ;;  %p41_p13 = scmp.ne.s32.totalorder %s3854_s28, %s3850_s27 }
  0x1c   : > { %p32_p12 = scmp.eq.s32.totalorder %s31_s17, 0  ;;  %p42_p0 = scmp.eq.s32.totalorder %s3858_s29, 0 }
  0x1d   : > { %p3615_p3 = scmp.lt.s32.totalorder %s3858_s29, 2  ;;  %p3996_p7 = por %p197_p2, %p41_p13 }
  0x1e   : > { %s3992_s19 = scalar_select %p32_p12, %s3854_s28, %s34_s18  }
  0x1f   : > { %p43_p5 = por %p42_p0, %p41_p13  ;;  %s272_s16 = sand.u32 1, %s3854_s28  }
  0x20   : > { %s3465_s21 = sshll.u32 %s3858_s29, 7  ;;  %s3004_s22 = sshll.u32 %s272_s16, 7 }
  0x21   : > { %s281_s25 = scalar_lea.hbm %s4883_s0, %s3465_s21  ;;  %s276_s10 = scalar_lea.vmem [#allocation3], %s3004_s22 }
  0x22   : > { %s282_s30 = sshll.u32 %s281_s25, 4  ;;  %s284_s11 = sshll.u32 %s276_s10, 4  ;;  %s283_s30 = int_to_ptr.hbm [resolvable:$true] %s282_s30  ;;  %s285_s11 = int_to_ptr.vmem [resolvable:$true] %s284_s11 }
  0x23   : > { %p4007_p9 = pnand %p3615_p3, %p43_p5  ;;  %s273_s14 = scalar_lea.sflag [#allocation4], %s272_s16 }
  0x24   : > { %s3754_s17 = sshra.s32 %s283_s30, 4  ;;  %s3761_s23 = scalar_lea.hbm %s4883_s0, 256  ;;  %s3755_s17 = int_to_ptr.hbm [resolvable:$true] %s3754_s17 }
  0x25   : > { %s3756_s18 = scalar_lea.hbm %s3755_s17, 128  ;;  %p3758_p10 = pneg %p4007_p9 }
  0x26   : > { %p3757_p2 = scmp.ne.s32.totalorder %s3755_s17, %s3756_s18  ;;  %p3762_p0 = scmp.lt.s32.totalorder %s3755_s17, %s4883_s0 }
  0x27   : > { %p3763_p3 = scmp.lt.s32.totalorder %s3761_s23, %s3756_s18 }
  0x28   : > { %p3759_p12 = pnand %p3758_p10, %p3757_p2 }
  0x29   : > { %p3764_p5 = por %p3763_p3, %p3762_p0 }
  0x2a   : > { %p3760_p13 = pneg %p3759_p12 }
  0x2c   : > { %p3765_p11 = pnand %p3764_p5, %p3760_p13 }
  0x2e   : > { %3768 = shalt.err (!%p3765_p11)
}
  0x2f   : > { %s3867_s16 = smov 64   ;;  %s3868_s10 = smov 4  }
  0x30   : > { %3607 = dma.hbm_to_vmem [thread:$0]  (!%p4007_p9), %s283_s30, 2048, %s285_s11, %s273_s14, %s3867_s16, %s3867_s16, %s3868_s10  }
  0x31   : > { %296 = sbr.rel (%p3956_p8) target bundleno = 1200 (0x4b0), region = 48 }
  0x36   : > { %s4024_s21 = sand.u32 1, %s3850_s27  }
  0x37   : > { %s3008_s22 = sshll.u32 %s4024_s21, 7  ;;  %s299_s17 = scalar_lea.sflag [#allocation4], %s4024_s21 }
  0x38   : > { %s4028_s18 = scalar_lea.vmem [#allocation3], %s3008_s22 }
  0x39   : > { %3829 = dma.done.wait (%p3943_p4), %s299_s17, 2048  }
  0x3a   : > { %3831 = vsyncadd (%p3943_p4), %s299_s17, 4294965248 }
  0x3b   : > { %3833 = dma.done.wait (%p48_p1), [#allocation7], 4160  }
  0x3c   : > { %3835 = vsyncadd (%p48_p1), [#allocation7], 4294963136 }
  0x3d   : > { %3837 = dma.done.wait (%p48_p1), [#allocation10], 8192  }
  0x3e   : > { %3839 = vsyncadd (%p48_p1), [#allocation10], 4294959104  ;;  %v3191_v1 = vld [vmem:[#allocation6 + $0xe0] sm:$0xf]  ;;  %v3512_v2 = vld [vmem:[#allocation6 + $0xec] sm:$0xf0] }
  0x3f   : > { %v3510_v3 = vld [vmem:[#allocation6 + $0xe4] sm:$0xf]  ;;  %v3192_v4 = vor.u32 %v3512_v2, %v3191_v1  ;;  %v3193_v5 = vld [vmem:[#allocation6 + $0xf0] sm:$0xf0]  ;;  %v3199_v6 = vld [vmem:[#allocation6 + $0xe8] sm:$0xf] }
  0x40   : > { %v3513_v7 = vld [vmem:[#allocation6 + $0xf4] sm:$0xf0]  ;;  %v3196_v8 = vor.u32 %v3510_v3, %v3193_v5  ;;  %v3511_v10 = vld [vmem:[#allocation6 + $0xec] sm:$0xf]  ;;  %v3201_v11 = vld [vmem:[#allocation6 + $0xf8] sm:$0xf0] }
  0x41   : > { %v3200_v9 = vor.u32 %v3513_v7, %v3199_v6  ;;  %v3175_v12 = vld [vmem:[#allocation6 + $0xc0] sm:$0xf]  ;;  %681 = vmatpush.bf16.msra.mxu0 %v3192_v4  ;;  %v3204_v13 = vor.u32 %v3511_v10, %v3201_v11  ;;  %v3508_v14 = vld [vmem:[#allocation6 + $0xcc] sm:$0xf0]  ;;  %v3506_v15 = vld [vmem:[#allocation6 + $0xc4] sm:$0xf] }
  0x42   : > { %v3177_v16 = vld [vmem:[#allocation6 + $0xd0] sm:$0xf0]  ;;  %770 = vmatpush.bf16.msra.mxu1 %v3196_v8  ;;  %v3176_v17 = vor.u32 %v3508_v14, %v3175_v12  ;;  %v3183_v19 = vld [vmem:[#allocation6 + $0xc8] sm:$0xf]  ;;  %v3509_v20 = vld [vmem:[#allocation6 + $0xd4] sm:$0xf0] }
  0x43   : > { %859 = vmatpush.bf16.msra.mxu2 %v3200_v9  ;;  %v3180_v18 = vor.u32 %v3506_v15, %v3177_v16  ;;  %v3507_v21 = vld [vmem:[#allocation6 + $0xcc] sm:$0xf]  ;;  %948 = vmatpush.bf16.msra.mxu3 %v3204_v13  ;;  %v3184_v22 = vor.u32 %v3509_v20, %v3183_v19  ;;  %v3185_v23 = vld [vmem:[#allocation6 + $0xd8] sm:$0xf0]  ;;  %v3159_v24 = vld [vmem:[#allocation6 + $0xa0] sm:$0xf] }
  0x44   : > { %v3504_v25 = vld [vmem:[#allocation6 + $0xac] sm:$0xf0]  ;;  %v3188_v26 = vor.u32 %v3507_v21, %v3185_v23  ;;  %v3502_v27 = vld [vmem:[#allocation6 + $0xa4] sm:$0xf]  ;;  %v3161_v28 = vld [vmem:[#allocation6 + $0xb0] sm:$0xf0] }
  0x45   : > { %v3167_v29 = vld [vmem:[#allocation6 + $0xa8] sm:$0xf]  ;;  %682 = vmatpush.bf16.msra.mxu0 %v3176_v17  ;;  %v3160_v30 = vor.u32 %v3504_v25, %v3159_v24  ;;  %v3505_v31 = vld [vmem:[#allocation6 + $0xb4] sm:$0xf0]  ;;  %v3503_v32 = vld [vmem:[#allocation6 + $0xac] sm:$0xf]  ;;  %v3164_v34 = vor.u32 %v3502_v27, %v3161_v28 }
  0x46   : > { %v3169_v33 = vld [vmem:[#allocation6 + $0xb8] sm:$0xf0]  ;;  %771 = vmatpush.bf16.msra.mxu1 %v3180_v18  ;;  %v3168_v35 = vor.u32 %v3505_v31, %v3167_v29  ;;  %v3143_v36 = vld [vmem:[#allocation6 + $0x80] sm:$0xf]  ;;  %v3500_v37 = vld [vmem:[#allocation6 + $0x8c] sm:$0xf0] }
  0x47   : > { %860 = vmatpush.bf16.msra.mxu2 %v3184_v22  ;;  %v3498_v38 = vld [vmem:[#allocation6 + $0x84] sm:$0xf]  ;;  %949 = vmatpush.bf16.msra.mxu3 %v3188_v26  ;;  %v3172_v39 = vor.u32 %v3503_v32, %v3169_v33  ;;  %v3145_v40 = vld [vmem:[#allocation6 + $0x90] sm:$0xf0]  ;;  %v3151_v41 = vld [vmem:[#allocation6 + $0x88] sm:$0xf]  ;;  %v3144_v45 = vor.u32 %v3500_v37, %v3143_v36 }
  0x48   : > { %v3501_v42 = vld [vmem:[#allocation6 + $0x94] sm:$0xf0]  ;;  %v3499_v43 = vld [vmem:[#allocation6 + $0x8c] sm:$0xf]  ;;  %v3153_v44 = vld [vmem:[#allocation6 + $0x98] sm:$0xf0]  ;;  %v3148_v46 = vor.u32 %v3498_v38, %v3145_v40 }
  0x49   : > { %683 = vmatpush.bf16.msra.mxu0 %v3160_v30  ;;  %v3152_v47 = vor.u32 %v3501_v42, %v3151_v41  ;;  %v3127_v48 = vld [vmem:[#allocation6 + $0x60] sm:$0xf]  ;;  %v3496_v49 = vld [vmem:[#allocation6 + $0x6c] sm:$0xf0]  ;;  %v3494_v50 = vld [vmem:[#allocation6 + $0x64] sm:$0xf]  ;;  %v3156_v51 = vor.u32 %v3499_v43, %v3153_v44 }
  0x4a   : > { %772 = vmatpush.bf16.msra.mxu1 %v3164_v34  ;;  %v3129_v52 = vld [vmem:[#allocation6 + $0x70] sm:$0xf0]  ;;  %v3135_v53 = vld [vmem:[#allocation6 + $0x68] sm:$0xf]  ;;  %v3497_v54 = vld [vmem:[#allocation6 + $0x74] sm:$0xf0]  ;;  %v3128_v57 = vor.u32 %v3496_v49, %v3127_v48 }
  0x4b   : > { %861 = vmatpush.bf16.msra.mxu2 %v3168_v35  ;;  %950 = vmatpush.bf16.msra.mxu3 %v3172_v39  ;;  %v3495_v55 = vld [vmem:[#allocation6 + $0x6c] sm:$0xf]  ;;  %v3137_v56 = vld [vmem:[#allocation6 + $0x78] sm:$0xf0]  ;;  %v3132_v58 = vor.u32 %v3494_v50, %v3129_v52  ;;  %v3136_v59 = vor.u32 %v3497_v54, %v3135_v53  ;;  %v3111_v60 = vld [vmem:[#allocation6 + $0x40] sm:$0xf] }
  0x4c   : > { %v3492_v61 = vld [vmem:[#allocation6 + $0x4c] sm:$0xf0]  ;;  %v3490_v62 = vld [vmem:[#allocation6 + $0x44] sm:$0xf]  ;;  %v3140_v63 = vor.u32 %v3495_v55, %v3137_v56  ;;  %v3113_v0 = vld [vmem:[#allocation6 + $0x50] sm:$0xf0] }
  0x4d   : > { %684 = vmatpush.bf16.msra.mxu0 %v3144_v45  ;;  %v3119_v1 = vld [vmem:[#allocation6 + $0x48] sm:$0xf]  ;;  %v3493_v2 = vld [vmem:[#allocation6 + $0x54] sm:$0xf0]  ;;  %v3491_v3 = vld [vmem:[#allocation6 + $0x4c] sm:$0xf]  ;;  %v3112_v5 = vor.u32 %v3492_v61, %v3111_v60  ;;  %v3116_v6 = vor.u32 %v3490_v62, %v3113_v0 }
  0x4e   : > { %773 = vmatpush.bf16.msra.mxu1 %v3148_v46  ;;  %v3121_v4 = vld [vmem:[#allocation6 + $0x58] sm:$0xf0]  ;;  %v3120_v7 = vor.u32 %v3493_v2, %v3119_v1  ;;  %v3095_v8 = vld [vmem:[#allocation6 + $0x20] sm:$0xf]  ;;  %v3488_v9 = vld [vmem:[#allocation6 + $0x2c] sm:$0xf0] }
  0x4f   : > { %862 = vmatpush.bf16.msra.mxu2 %v3152_v47  ;;  %951 = vmatpush.bf16.msra.mxu3 %v3156_v51  ;;  %v3486_v10 = vld [vmem:[#allocation6 + $0x24] sm:$0xf]  ;;  %v3124_v11 = vor.u32 %v3491_v3, %v3121_v4  ;;  %v3097_v12 = vld [vmem:[#allocation6 + $0x30] sm:$0xf0]  ;;  %v3103_v13 = vld [vmem:[#allocation6 + $0x28] sm:$0xf]  ;;  %v3096_v17 = vor.u32 %v3488_v9, %v3095_v8 }
  0x50   : > { %v3489_v14 = vld [vmem:[#allocation6 + $0x34] sm:$0xf0]  ;;  %v3487_v15 = vld [vmem:[#allocation6 + $0x2c] sm:$0xf]  ;;  %v3105_v16 = vld [vmem:[#allocation6 + $0x38] sm:$0xf0]  ;;  %v3100_v18 = vor.u32 %v3486_v10, %v3097_v12 }
  0x51   : > { %685 = vmatpush.bf16.msra.mxu0 %v3128_v57  ;;  %v3104_v19 = vor.u32 %v3489_v14, %v3103_v13  ;;  %v3079_v20 = vld [vmem:[#allocation6] sm:$0xf]  ;;  %v3484_v21 = vld [vmem:[#allocation6 + $0xc] sm:$0xf0]  ;;  %v3482_v22 = vld [vmem:[#allocation6 + $0x4] sm:$0xf]  ;;  %v3108_v23 = vor.u32 %v3487_v15, %v3105_v16 }
  0x52   : > { %774 = vmatpush.bf16.msra.mxu1 %v3132_v58  ;;  %v3081_v24 = vld [vmem:[#allocation6 + $0x10] sm:$0xf0]  ;;  %v3087_v25 = vld [vmem:[#allocation6 + $0x8] sm:$0xf]  ;;  %v3485_v26 = vld [vmem:[#allocation6 + $0x14] sm:$0xf0]  ;;  %v3080_v29 = vor.u32 %v3484_v21, %v3079_v20 }
  0x53   : > { %863 = vmatpush.bf16.msra.mxu2 %v3136_v59  ;;  %952 = vmatpush.bf16.msra.mxu3 %v3140_v63  ;;  %v3483_v27 = vld [vmem:[#allocation6 + $0xc] sm:$0xf]  ;;  %v3089_v28 = vld [vmem:[#allocation6 + $0x18] sm:$0xf0]  ;;  %v3084_v30 = vor.u32 %v3482_v22, %v3081_v24  ;;  %v3088_v31 = vor.u32 %v3485_v26, %v3087_v25  ;;  %v3466_v33 = vld [vmem:[%s4028_s18] sm:$0xff]  ;;  %s3012_s23 = sshll.u32 %s4024_s21, 1 }
  0x54   : > { %v3092_v32 = vor.u32 %v3483_v27, %v3089_v28  ;;  %v3467_v34 = vld [vmem:[%s4028_s18 + $0x8] sm:$0xff]  ;;  %v3468_v35 = vld [vmem:[%s4028_s18 + $0x10] sm:$0xff]  ;;  %v3469_v36 = vld [vmem:[%s4028_s18 + $0x18] sm:$0xff]  ;;  %s3462_s24 = sshll.u32 %s3934_s6, 1  ;;  %s348_s22 = scalar_lea.vmem [#allocation11], %s3012_s23 }
  0x55   : > { %686 = vmatpush.bf16.msra.mxu0 %v3112_v5  ;;  %v3470_v37 = vld [vmem:[%s4028_s18 + $0x20] sm:$0xff]  ;;  %v3471_v38 = vld [vmem:[%s4028_s18 + $0x28] sm:$0xff]  ;;  %v3472_v39 = vld [vmem:[%s4028_s18 + $0x30] sm:$0xff]  ;;  %s2894_s10 = scalar_lea.hbm %s4890_s7, %s3462_s24  ;;  %s2896_s17 = sshll.u32 %s348_s22, 4  ;;  %s2897_s17 = int_to_ptr.vmem [resolvable:$true] %s2896_s17 }
  0x56   : > { %775 = vmatpush.bf16.msra.mxu1 %v3116_v6  ;;  %v3473_v40 = vld [vmem:[%s4028_s18 + $0x38] sm:$0xff]  ;;  %v415_v41 = vld [vmem:[#allocation8] sm:$0xf]  ;;  %v3475_v6 = vld [vmem:[%s4028_s18 + $0x48] sm:$0xff]  ;;  %s2884_s6 = scalar_lea.sflag [#allocation5], %s4024_s21  ;;  %s3804_s12 = scalar_lea.hbm %s4890_s7, 4 }
  0x57   : > { %864 = vmatpush.bf16.msra.mxu2 %v3120_v7  ;;  %953 = vmatpush.bf16.msra.mxu3 %v3124_v11  ;;  %v3474_v42 = vld [vmem:[%s4028_s18 + $0x40] sm:$0xff]  ;;  %v4051_v44 = vperm.slane %v415_v41, 0  ;;  %v4053_v46 = vperm.slane %v415_v41, 1  ;;  %v4057_v50 = vperm.slane %v415_v41, 2  ;;  %v4059_v54 = vperm.slane %v415_v41, 3 }
  0x59   : > { %687 = vmatpush.bf16.msra.mxu0 %v3096_v17 }
  0x5a   : > { %776 = vmatpush.bf16.msra.mxu1 %v3100_v18 }
  0x5b   : > { %865 = vmatpush.bf16.msra.mxu2 %v3104_v19  ;;  %954 = vmatpush.bf16.msra.mxu3 %v3108_v23 }
  0x5d   : > { %688 = vmatpush.bf16.msra.mxu0 %v3080_v29 }
  0x5e   : > { %777 = vmatpush.bf16.msra.mxu1 %v3084_v30 }
  0x5f   : > { %866 = vmatpush.bf16.msra.mxu2 %v3088_v31  ;;  %955 = vmatpush.bf16.msra.mxu3 %v3092_v32 }
  0x60   : > { %689 = vmatmul.bf16.vlgmr.msra.gmra.mxu0 %v3466_v33 }
  0x61   : > { %778 = vmatmul.bf16.vlgmr.msra.gmra.mxu1 %v3466_v33 }
  0x62   : > { %867 = vmatmul.bf16.vlgmr.msra.gmra.mxu2 %v3466_v33  ;;  %956 = vmatmul.bf16.vlgmr.msra.gmra.mxu3 %v3466_v33 }
  0x70   : > { %694 = vmatmul.bf16.gmra.mxu0 %v3467_v34 }
  0x71   : > { %783 = vmatmul.bf16.gmra.mxu1 %v3467_v34 }
  0x72   : > { %872 = vmatmul.bf16.gmra.mxu2 %v3467_v34  ;;  %961 = vmatmul.bf16.gmra.mxu3 %v3467_v34 }
  0x80   : > { %699 = vmatmul.bf16.gmra.mxu0 %v3468_v35 }
  0x81   : > { %788 = vmatmul.bf16.gmra.mxu1 %v3468_v35 }
  0x82   : > { %877 = vmatmul.bf16.gmra.mxu2 %v3468_v35  ;;  %966 = vmatmul.bf16.gmra.mxu3 %v3468_v35 }
  0x90   : > { %704 = vmatmul.bf16.gmra.mxu0 %v3469_v36 }
  0x91   : > { %793 = vmatmul.bf16.gmra.mxu1 %v3469_v36 }
  0x92   : > { %882 = vmatmul.bf16.gmra.mxu2 %v3469_v36  ;;  %971 = vmatmul.bf16.gmra.mxu3 %v3469_v36 }
  0xa0   : > { %709 = vmatmul.bf16.gmra.mxu0 %v3470_v37 }
  0xa1   : > { %798 = vmatmul.bf16.gmra.mxu1 %v3470_v37 }
  0xa2   : > { %887 = vmatmul.bf16.gmra.mxu2 %v3470_v37  ;;  %976 = vmatmul.bf16.gmra.mxu3 %v3470_v37 }
  0xb0   : > { %714 = vmatmul.bf16.gmra.mxu0 %v3471_v38 }
  0xb1   : > { %803 = vmatmul.bf16.gmra.mxu1 %v3471_v38 }
  0xb2   : > { %892 = vmatmul.bf16.gmra.mxu2 %v3471_v38  ;;  %981 = vmatmul.bf16.gmra.mxu3 %v3471_v38 }
  0xc0   : > { %719 = vmatmul.bf16.gmra.mxu0 %v3472_v39 }
  0xc1   : > { %808 = vmatmul.bf16.gmra.mxu1 %v3472_v39 }
  0xc2   : > { %897 = vmatmul.bf16.gmra.mxu2 %v3472_v39  ;;  %986 = vmatmul.bf16.gmra.mxu3 %v3472_v39 }
  0xd0   : > { %724 = vmatmul.bf16.gmra.mxu0 %v3473_v40 }
  0xd1   : > { %813 = vmatmul.bf16.gmra.mxu1 %v3473_v40 }
  0xd2   : > { %902 = vmatmul.bf16.gmra.mxu2 %v3473_v40  ;;  %991 = vmatmul.bf16.gmra.mxu3 %v3473_v40 }
  0xdd   : > { %v690_v43 = vpop.f32.mrf.mxu0 }
  0xde   : > { %v779_v45 = vpop.f32.mrf.mxu1  ;;  %v691_v47 = vadd.f32 %v690_v43, %v4051_v44 }
  0xdf   : > { %v780_v48 = vadd.f32 %v779_v45, %v4053_v46 }
  0xe0   : > { %729 = vmatmul.bf16.gmra.mxu0 %v3474_v42  ;;  %v1165_v53 = vmul.f32 0.2, %v691_v47  ;;  %vm1037_vm0 = vcmp.gt.f32.partialorder %v691_v47, 0.0 }
  0xe1   : > { %818 = vmatmul.bf16.gmra.mxu1 %v3474_v42  ;;  %v1166_v57 = vmul.f32 0.2, %v780_v48  ;;  %vm1038_vm1 = vcmp.gt.f32.partialorder %v780_v48, 0.0 }
  0xe2   : > { %907 = vmatmul.bf16.gmra.mxu2 %v3474_v42  ;;  %996 = vmatmul.bf16.gmra.mxu3 %v3474_v42  ;;  %v1293_v62 = vsel %vm1037_vm0, %v691_v47, %v1165_v53  ;;  %v3476_v42 = vld [vmem:[%s4028_s18 + $0x50] sm:$0xff] }
  0xe3   : > { %v1294_v1 = vsel %vm1038_vm1, %v780_v48, %v1166_v57 }
  0xe5   : > { %v868_v49 = vpop.f32.mrf.mxu2  ;;  %v957_v51 = vpop.f32.mrf.mxu3 }
  0xe6   : > { %v692_v52 = vpop.f32.mrf.mxu0  ;;  %v781_v56 = vpop.f32.mrf.mxu1  ;;  %v869_v60 = vadd.f32 %v868_v49, %v4057_v50  ;;  %v958_v63 = vadd.f32 %v957_v51, %v4059_v54 }
  0xe7   : > { %v693_v55 = vadd.f32 %v692_v52, %v4051_v44  ;;  %v782_v58 = vadd.f32 %v781_v56, %v4053_v46 }
  0xe8   : > { %v1167_v7 = vmul.f32 0.2, %v869_v60  ;;  %vm1039_vm4 = vcmp.gt.f32.partialorder %v869_v60, 0.0  ;;  %v1168_v11 = vmul.f32 0.2, %v958_v63  ;;  %vm1040_vm5 = vcmp.gt.f32.partialorder %v958_v63, 0.0 }
  0xe9   : > { %vm1041_vm2 = vcmp.gt.f32.partialorder %v693_v55, 0.0  ;;  %v1169_v59 = vmul.f32 0.2, %v693_v55  ;;  %vm1042_vm3 = vcmp.gt.f32.partialorder %v782_v58, 0.0  ;;  %v1170_v61 = vmul.f32 0.2, %v782_v58 }
  0xea   : > { %v1295_v16 = vsel %vm1039_vm4, %v869_v60, %v1167_v7  ;;  %v1296_v18 = vsel %vm1040_vm5, %v958_v63, %v1168_v11  ;;  %v3561_v63 = vld [vmem:[#allocation9 + $0x174] sm:$0xf0] }
  0xeb   : > { %v1297_v0 = vsel %vm1041_vm2, %v693_v55, %v1169_v59  ;;  %v1298_v3 = vsel %vm1042_vm3, %v782_v58, %v1170_v61 }
  0xec   : > { %v4065_v2 = vpack.c.bf16 %v1297_v0, %v1293_v62  ;;  %v4067_v4 = vpack.c.bf16 %v1298_v3, %v1294_v1  ;;  %v3391_v62 = vld [vmem:[#allocation9 + $0x170] sm:$0xf] }
  0xed   : > { %v870_v5 = vpop.f32.mrf.mxu2  ;;  %v959_v9 = vpop.f32.mrf.mxu3  ;;  %v3392_v3 = vor.u32 %v3561_v63, %v3391_v62 }
  0xee   : > { %v871_v8 = vadd.f32 %v870_v5, %v4057_v50  ;;  %v695_v10 = vpop.f32.mrf.mxu0  ;;  %v960_v12 = vadd.f32 %v959_v9, %v4059_v54  ;;  %v784_v13 = vpop.f32.mrf.mxu1 }
  0xef   : > { %v696_v21 = vadd.f32 %v695_v10, %v4051_v44  ;;  %v785_v23 = vadd.f32 %v784_v13, %v4053_v46  ;;  %2053 = vmatpush.bf16.msrb.mxu2 %v3392_v3 }
  0xf0   : > { %vm1043_vm6 = vcmp.gt.f32.partialorder %v871_v8, 0.0  ;;  %v1171_v14 = vmul.f32 0.2, %v871_v8  ;;  %vm1044_vm7 = vcmp.gt.f32.partialorder %v960_v12, 0.0  ;;  %v1172_v15 = vmul.f32 0.2, %v960_v12  ;;  %734 = vmatmul.bf16.gmra.mxu0 %v3475_v6 }
  0xf1   : > { %823 = vmatmul.bf16.gmra.mxu1 %v3475_v6  ;;  %v1173_v27 = vmul.f32 0.2, %v696_v21  ;;  %vm1045_vm8 = vcmp.gt.f32.partialorder %v696_v21, 0.0  ;;  %v1174_v30 = vmul.f32 0.2, %v785_v23  ;;  %vm1046_vm9 = vcmp.gt.f32.partialorder %v785_v23, 0.0 }
  0xf2   : > { %v1299_v17 = vsel %vm1043_vm6, %v871_v8, %v1171_v14  ;;  %912 = vmatmul.bf16.gmra.mxu2 %v3475_v6  ;;  %v1300_v20 = vsel %vm1044_vm7, %v960_v12, %v1172_v15  ;;  %1001 = vmatmul.bf16.gmra.mxu3 %v3475_v6 }
  0xf3   : > { %v4072_v19 = vpack.c.bf16 %v1299_v17, %v1295_v16  ;;  %v4075_v22 = vpack.c.bf16 %v1300_v20, %v1296_v18  ;;  %v1301_v36 = vsel %vm1045_vm8, %v696_v21, %v1173_v27  ;;  %v1302_v39 = vsel %vm1046_vm9, %v785_v23, %v1174_v30  ;;  %v3263_v17 = vld [vmem:[#allocation9 + $0x70] sm:$0xf]  ;;  %v3529_v20 = vld [vmem:[#allocation9 + $0x74] sm:$0xf0] }
  0xf4   : > { %v3455_v21 = vld [vmem:[#allocation9 + $0x1f0] sm:$0xf]  ;;  %v3577_v23 = vld [vmem:[#allocation9 + $0x1f4] sm:$0xf0]  ;;  %v3264_v27 = vor.u32 %v3529_v20, %v3263_v17 }
  0xf5   : > { %v873_v24 = vpop.f32.mrf.mxu2  ;;  %v962_v25 = vpop.f32.mrf.mxu3  ;;  %v3545_v30 = vld [vmem:[#allocation9 + $0xf4] sm:$0xf0] }
  0xf6   : > { %v697_v26 = vpop.f32.mrf.mxu0  ;;  %v786_v29 = vpop.f32.mrf.mxu1  ;;  %v874_v33 = vadd.f32 %v873_v24, %v4057_v50  ;;  %v963_v34 = vadd.f32 %v962_v25, %v4059_v54  ;;  %1875 = vmatpush.bf16.msrb.mxu0 %v3264_v27 }
  0xf7   : > { %v698_v28 = vadd.f32 %v697_v26, %v4051_v44  ;;  %v787_v31 = vadd.f32 %v786_v29, %v4053_v46  ;;  %v3327_v29 = vld [vmem:[#allocation9 + $0xf0] sm:$0xf] }
  0xf8   : > { %v1175_v45 = vmul.f32 0.2, %v874_v33  ;;  %v1176_v47 = vmul.f32 0.2, %v963_v34  ;;  %vm1047_vm12 = vcmp.gt.f32.partialorder %v874_v33, 0.0  ;;  %vm1048_vm13 = vcmp.gt.f32.partialorder %v963_v34, 0.0 }
  0xf9   : > { %vm1049_vm10 = vcmp.gt.f32.partialorder %v698_v28, 0.0  ;;  %v1177_v32 = vmul.f32 0.2, %v698_v28  ;;  %vm1050_vm11 = vcmp.gt.f32.partialorder %v787_v31, 0.0  ;;  %v1178_v35 = vmul.f32 0.2, %v787_v31 }
  0xfa   : > { %v1303_v57 = vsel %vm1047_vm12, %v874_v33, %v1175_v45  ;;  %v1304_v59 = vsel %vm1048_vm13, %v963_v34, %v1176_v47  ;;  %v3477_v34 = vld [vmem:[%s4028_s18 + $0x58] sm:$0xff] }
  0xfb   : > { %v1305_v37 = vsel %vm1049_vm10, %v698_v28, %v1177_v32  ;;  %v1306_v40 = vsel %vm1050_vm11, %v787_v31, %v1178_v35  ;;  %v3456_v28 = vor.u32 %v3577_v23, %v3455_v21  ;;  %v3328_v35 = vor.u32 %v3545_v30, %v3327_v29 }
  0xfc   : > { %v4082_v38 = vpack.c.bf16 %v1305_v37, %v1301_v36  ;;  %v4085_v43 = vpack.c.bf16 %v1306_v40, %v1302_v39 }
  0xfd   : > { %v875_v41 = vpop.f32.mrf.mxu2  ;;  %v964_v49 = vpop.f32.mrf.mxu3  ;;  %2142 = vmatpush.bf16.msrb.mxu3 %v3456_v28  ;;  %1964 = vmatpush.bf16.msrb.mxu1 %v3328_v35 }
  0xfe   : > { %v876_v48 = vadd.f32 %v875_v41, %v4057_v50  ;;  %v700_v51 = vpop.f32.mrf.mxu0  ;;  %v965_v52 = vadd.f32 %v964_v49, %v4059_v54  ;;  %v789_v53 = vpop.f32.mrf.mxu1 }
  0xff   : > { %v701_v60 = vadd.f32 %v700_v51, %v4051_v44  ;;  %v790_v61 = vadd.f32 %v789_v53, %v4053_v46 }
 0x100   : > { %vm1051_vm14 = vcmp.gt.f32.partialorder %v876_v48, 0.0  ;;  %v1179_v55 = vmul.f32 0.2, %v876_v48  ;;  %vm1052_vm15 = vcmp.gt.f32.partialorder %v965_v52, 0.0  ;;  %v1180_v56 = vmul.f32 0.2, %v965_v52  ;;  %739 = vmatmul.bf16.gmra.mxu0 %v3476_v42 }
 0x101   : > { %828 = vmatmul.bf16.gmra.mxu1 %v3476_v42  ;;  %v1181_v9 = vmul.f32 0.2, %v701_v60  ;;  %v1182_v10 = vmul.f32 0.2, %v790_v61  ;;  %vm1053_vm0 = vcmp.gt.f32.partialorder %v701_v60, 0.0  ;;  %vm1054_vm1 = vcmp.gt.f32.partialorder %v790_v61, 0.0 }
 0x102   : > { %917 = vmatmul.bf16.gmra.mxu2 %v3476_v42  ;;  %v1307_v58 = vsel %vm1051_vm14, %v876_v48, %v1179_v55  ;;  %1006 = vmatmul.bf16.gmra.mxu3 %v3476_v42  ;;  %v1308_v1 = vsel %vm1052_vm15, %v965_v52, %v1180_v56 }
 0x103   : > { %v4091_v0 = vpack.c.bf16 %v1307_v58, %v1303_v57  ;;  %v4093_v5 = vpack.c.bf16 %v1308_v1, %v1304_v59  ;;  %v1309_v24 = vsel %vm1053_vm0, %v701_v60, %v1181_v9  ;;  %v1310_v26 = vsel %vm1054_vm1, %v790_v61, %v1182_v10 }
 0x105   : > { %4946 = vst [vmem:[#allocation16_spill] sm:$0xff] %v4093_v5  ;;  %v878_v6 = vpop.f32.mrf.mxu2  ;;  %v967_v7 = vpop.f32.mrf.mxu3 }
 0x106   : > { %v702_v8 = vpop.f32.mrf.mxu0  ;;  %v791_v12 = vpop.f32.mrf.mxu1  ;;  %v879_v15 = vadd.f32 %v878_v6, %v4057_v50  ;;  %v968_v18 = vadd.f32 %v967_v7, %v4059_v54 }
 0x107   : > { %v703_v11 = vadd.f32 %v702_v8, %v4051_v44  ;;  %v792_v13 = vadd.f32 %v791_v12, %v4053_v46 }
 0x108   : > { %v1183_v37 = vmul.f32 0.2, %v879_v15  ;;  %vm1055_vm4 = vcmp.gt.f32.partialorder %v879_v15, 0.0  ;;  %v1184_v42 = vmul.f32 0.2, %v968_v18  ;;  %vm1056_vm5 = vcmp.gt.f32.partialorder %v968_v18, 0.0 }
 0x109   : > { %vm1057_vm2 = vcmp.gt.f32.partialorder %v703_v11, 0.0  ;;  %v1185_v14 = vmul.f32 0.2, %v703_v11  ;;  %vm1058_vm3 = vcmp.gt.f32.partialorder %v792_v13, 0.0  ;;  %v1186_v16 = vmul.f32 0.2, %v792_v13 }
 0x10a   : > { %v1311_v51 = vsel %vm1055_vm4, %v879_v15, %v1183_v37  ;;  %v1312_v56 = vsel %vm1056_vm5, %v968_v18, %v1184_v42  ;;  %v3478_v18 = vld [vmem:[%s4028_s18 + $0x60] sm:$0xff] }
 0x10b   : > { %v1313_v25 = vsel %vm1057_vm2, %v703_v11, %v1185_v14  ;;  %v1314_v32 = vsel %vm1058_vm3, %v792_v13, %v1186_v16  ;;  %v3383_v37 = vld [vmem:[#allocation9 + $0x160] sm:$0xf] }
 0x10c   : > { %v4099_v31 = vpack.c.bf16 %v1313_v25, %v1309_v24  ;;  %v4102_v36 = vpack.c.bf16 %v1314_v32, %v1310_v26 }
 0x10d   : > { %v880_v33 = vpop.f32.mrf.mxu2  ;;  %v969_v40 = vpop.f32.mrf.mxu3 }
 0x10e   : > { %4947 = vst [vmem:[#allocation17_spill] sm:$0xff] %v4099_v31  ;;  %v881_v39 = vadd.f32 %v880_v33, %v4057_v50  ;;  %v705_v41 = vpop.f32.mrf.mxu0  ;;  %v970_v45 = vadd.f32 %v969_v40, %v4059_v54  ;;  %v794_v47 = vpop.f32.mrf.mxu1 }
 0x10f   : > { %4948 = vst [vmem:[#allocation18_spill] sm:$0xff] %v4102_v36  ;;  %v706_v53 = vadd.f32 %v705_v41, %v4051_v44  ;;  %v795_v58 = vadd.f32 %v794_v47, %v4053_v46 }
 0x110   : > { %vm1059_vm6 = vcmp.gt.f32.partialorder %v881_v39, 0.0  ;;  %v1187_v48 = vmul.f32 0.2, %v881_v39  ;;  %vm1060_vm7 = vcmp.gt.f32.partialorder %v970_v45, 0.0  ;;  %v1188_v49 = vmul.f32 0.2, %v970_v45  ;;  %744 = vmatmul.bf16.gmra.mxu0 %v3477_v34 }
 0x111   : > { %833 = vmatmul.bf16.gmra.mxu1 %v3477_v34  ;;  %v1189_v63 = vmul.f32 0.2, %v706_v53  ;;  %vm1061_vm8 = vcmp.gt.f32.partialorder %v706_v53, 0.0  ;;  %v1190_v6 = vmul.f32 0.2, %v795_v58  ;;  %vm1062_vm9 = vcmp.gt.f32.partialorder %v795_v58, 0.0 }
 0x112   : > { %922 = vmatmul.bf16.gmra.mxu2 %v3477_v34  ;;  %v1315_v52 = vsel %vm1059_vm6, %v881_v39, %v1187_v48  ;;  %1011 = vmatmul.bf16.gmra.mxu3 %v3477_v34  ;;  %v1316_v57 = vsel %vm1060_vm7, %v970_v45, %v1188_v49  ;;  %v3559_v39 = vld [vmem:[#allocation9 + $0x164] sm:$0xf0] }
 0x113   : > { %v4107_v55 = vpack.c.bf16 %v1315_v52, %v1311_v51  ;;  %v4110_v59 = vpack.c.bf16 %v1316_v57, %v1312_v56  ;;  %v1317_v12 = vsel %vm1061_vm8, %v706_v53, %v1189_v63  ;;  %v1318_v15 = vsel %vm1062_vm9, %v795_v58, %v1190_v6  ;;  %v3255_v52 = vld [vmem:[#allocation9 + $0x60] sm:$0xf]  ;;  %v3527_v53 = vld [vmem:[#allocation9 + $0x64] sm:$0xf0] }
 0x114   : > { %v3384_v48 = vor.u32 %v3559_v39, %v3383_v37  ;;  %v3447_v56 = vld [vmem:[#allocation9 + $0x1e0] sm:$0xf] }
 0x115   : > { %4949 = vst [vmem:[#allocation19_spill] sm:$0xff] %v4107_v55  ;;  %v883_v60 = vpop.f32.mrf.mxu2  ;;  %v972_v61 = vpop.f32.mrf.mxu3  ;;  %v3319_v63 = vld [vmem:[#allocation9 + $0xe0] sm:$0xf] }
 0x116   : > { %4950 = vst [vmem:[#allocation20_spill] sm:$0xff] %v4110_v59  ;;  %v707_v62 = vpop.f32.mrf.mxu0  ;;  %v796_v3 = vpop.f32.mrf.mxu1  ;;  %v884_v9 = vadd.f32 %v883_v60, %v4057_v50  ;;  %v973_v11 = vadd.f32 %v972_v61, %v4059_v54  ;;  %2054 = vmatpush.bf16.msrb.mxu2 %v3384_v48  ;;  %v3256_v61 = vor.u32 %v3527_v53, %v3255_v52  ;;  %v3239_v48 = vld [vmem:[#allocation9 + $0x40] sm:$0xf] }
 0x117   : > { %v708_v1 = vadd.f32 %v707_v62, %v4051_v44  ;;  %v797_v7 = vadd.f32 %v796_v3, %v4053_v46  ;;  %v3575_v62 = vld [vmem:[#allocation9 + $0x1e4] sm:$0xf0]  ;;  %v3303_v53 = vld [vmem:[#allocation9 + $0xc0] sm:$0xf] }
 0x118   : > { %v1191_v21 = vmul.f32 0.2, %v884_v9  ;;  %vm1063_vm12 = vcmp.gt.f32.partialorder %v884_v9, 0.0  ;;  %vm1064_vm13 = vcmp.gt.f32.partialorder %v973_v11, 0.0  ;;  %v1192_v26 = vmul.f32 0.2, %v973_v11  ;;  %1876 = vmatpush.bf16.msrb.mxu0 %v3256_v61 }
 0x119   : > { %vm1065_vm10 = vcmp.gt.f32.partialorder %v708_v1, 0.0  ;;  %v1193_v8 = vmul.f32 0.2, %v708_v1  ;;  %vm1066_vm11 = vcmp.gt.f32.partialorder %v797_v7, 0.0  ;;  %v1194_v10 = vmul.f32 0.2, %v797_v7 }
 0x11a   : > { %v1319_v34 = vsel %vm1063_vm12, %v884_v9, %v1191_v21  ;;  %v1320_v41 = vsel %vm1064_vm13, %v973_v11, %v1192_v26  ;;  %v3311_v21 = vld [vmem:[#allocation9 + $0xd0] sm:$0xf] }
 0x11b   : > { %v1321_v13 = vsel %vm1065_vm10, %v708_v1, %v1193_v8  ;;  %v1322_v16 = vsel %vm1066_vm11, %v797_v7, %v1194_v10  ;;  %v3543_v1 = vld [vmem:[#allocation9 + $0xe4] sm:$0xf0]  ;;  %v3448_v8 = vor.u32 %v3575_v62, %v3447_v56 }
 0x11c   : > { %v4116_v14 = vpack.c.bf16 %v1321_v13, %v1317_v12  ;;  %v4119_v20 = vpack.c.bf16 %v1322_v16, %v1318_v15  ;;  %v3320_v9 = vor.u32 %v3543_v1, %v3319_v63  ;;  %v3247_v16 = vld [vmem:[#allocation9 + $0x50] sm:$0xf]  ;;  %v3539_v56 = vld [vmem:[#allocation9 + $0xc4] sm:$0xf0] }
 0x11d   : > { %v885_v17 = vpop.f32.mrf.mxu2  ;;  %v974_v24 = vpop.f32.mrf.mxu3  ;;  %2143 = vmatpush.bf16.msrb.mxu3 %v3448_v8  ;;  %v3431_v8 = vld [vmem:[#allocation9 + $0x1c0] sm:$0xf] }
 0x11e   : > { %4951 = vst [vmem:[#allocation21_spill] sm:$0xff] %v4116_v14  ;;  %v886_v23 = vadd.f32 %v885_v17, %v4057_v50  ;;  %v710_v25 = vpop.f32.mrf.mxu0  ;;  %v975_v27 = vadd.f32 %v974_v24, %v4059_v54  ;;  %v799_v28 = vpop.f32.mrf.mxu1  ;;  %1965 = vmatpush.bf16.msrb.mxu1 %v3320_v9  ;;  %v3479_v17 = vld [vmem:[%s4028_s18 + $0x68] sm:$0xff] }
 0x11f   : > { %4952 = vst [vmem:[#allocation22_spill] sm:$0xff] %v4119_v20  ;;  %v711_v30 = vadd.f32 %v710_v25, %v4051_v44  ;;  %v800_v32 = vadd.f32 %v799_v28, %v4053_v46  ;;  %v3571_v9 = vld [vmem:[#allocation9 + $0x1c4] sm:$0xf0] }
 0x120   : > { %vm1067_vm14 = vcmp.gt.f32.partialorder %v886_v23, 0.0  ;;  %v1195_v29 = vmul.f32 0.2, %v886_v23  ;;  %vm1068_vm15 = vcmp.gt.f32.partialorder %v975_v27, 0.0  ;;  %v1196_v33 = vmul.f32 0.2, %v975_v27  ;;  %749 = vmatmul.bf16.gmra.mxu0 %v3478_v18 }
 0x121   : > { %838 = vmatmul.bf16.gmra.mxu1 %v3478_v18  ;;  %v1197_v45 = vmul.f32 0.2, %v711_v30  ;;  %v1198_v47 = vmul.f32 0.2, %v800_v32  ;;  %vm1069_vm0 = vcmp.gt.f32.partialorder %v711_v30, 0.0  ;;  %vm1070_vm1 = vcmp.gt.f32.partialorder %v800_v32, 0.0 }
 0x122   : > { %927 = vmatmul.bf16.gmra.mxu2 %v3478_v18  ;;  %v1323_v35 = vsel %vm1067_vm14, %v886_v23, %v1195_v29  ;;  %1016 = vmatmul.bf16.gmra.mxu3 %v3478_v18  ;;  %v1324_v42 = vsel %vm1068_vm15, %v975_v27, %v1196_v33  ;;  %v3525_v18 = vld [vmem:[#allocation9 + $0x54] sm:$0xf0]  ;;  %v3375_v29 = vld [vmem:[#allocation9 + $0x150] sm:$0xf] }
 0x123   : > { %v4125_v40 = vpack.c.bf16 %v1323_v35, %v1319_v34  ;;  %v4128_v49 = vpack.c.bf16 %v1324_v42, %v1320_v41  ;;  %v3541_v23 = vld [vmem:[#allocation9 + $0xd4] sm:$0xf0]  ;;  %v1325_v24 = vsel %vm1069_vm0, %v711_v30, %v1197_v45  ;;  %v1326_v26 = vsel %vm1070_vm1, %v800_v32, %v1198_v47  ;;  %v3439_v34 = vld [vmem:[#allocation9 + $0x1d0] sm:$0xf] }
 0x124   : > { %v3248_v27 = vor.u32 %v3525_v18, %v3247_v16  ;;  %v3312_v28 = vor.u32 %v3541_v23, %v3311_v21  ;;  %v3557_v33 = vld [vmem:[#allocation9 + $0x154] sm:$0xf0]  ;;  %v3432_v18 = vor.u32 %v3571_v9, %v3431_v8  ;;  %v3231_v21 = vld [vmem:[#allocation9 + $0x30] sm:$0xf]  ;;  %v3567_v8 = vld [vmem:[#allocation9 + $0x1a4] sm:$0xf0] }
 0x125   : > { %4953 = vst [vmem:[#allocation23_spill] sm:$0xff] %v4125_v40  ;;  %v888_v51 = vpop.f32.mrf.mxu2  ;;  %v977_v58 = vpop.f32.mrf.mxu3  ;;  %v3376_v41 = vor.u32 %v3557_v33, %v3375_v29  ;;  %v3573_v42 = vld [vmem:[#allocation9 + $0x1d4] sm:$0xf0] }
 0x126   : > { %4954 = vst [vmem:[#allocation24_spill] sm:$0xff] %v4128_v49  ;;  %v889_v57 = vadd.f32 %v888_v51, %v4057_v50  ;;  %v712_v60 = vpop.f32.mrf.mxu0  ;;  %v4132_v3 = vadd.f32 %v977_v58, %v4059_v54  ;;  %v801_v7 = vpop.f32.mrf.mxu1  ;;  %v3523_v51 = vld [vmem:[#allocation9 + $0x44] sm:$0xf0]  ;;  %1877 = vmatpush.bf16.msrb.mxu0 %v3248_v27  ;;  %1966 = vmatpush.bf16.msrb.mxu1 %v3312_v28  ;;  %v3367_v58 = vld [vmem:[#allocation9 + $0x140] sm:$0xf] }
 0x127   : > { %v713_v6 = vadd.f32 %v712_v60, %v4051_v44  ;;  %v802_v11 = vadd.f32 %v801_v7, %v4053_v46  ;;  %v3440_v47 = vor.u32 %v3573_v42, %v3439_v34  ;;  %2055 = vmatpush.bf16.msrb.mxu2 %v3376_v41  ;;  %v3240_v1 = vor.u32 %v3523_v51, %v3239_v48  ;;  %v3555_v7 = vld [vmem:[#allocation9 + $0x144] sm:$0xf0]  ;;  %v3569_v51 = vld [vmem:[#allocation9 + $0x1b4] sm:$0xf0] }
 0x128   : > { %v1199_v10 = vmul.f32 0.2, %v889_v57  ;;  %vm1071_vm2 = vcmp.gt.f32.partialorder %v889_v57, 0.0  ;;  %v4137_v12 = vmul.f32 0.2, %v4132_v3  ;;  %vm1072_vm4 = vcmp.gt.f32.partialorder %v4132_v3, 0.0 }
 0x129   : > { %vm1073_vm3 = vcmp.gt.f32.partialorder %v713_v6, 0.0  ;;  %v1201_v13 = vmul.f32 0.2, %v713_v6  ;;  %vm1074_vm5 = vcmp.gt.f32.partialorder %v802_v11, 0.0  ;;  %v1202_v15 = vmul.f32 0.2, %v802_v11  ;;  %2144 = vmatpush.bf16.msrb.mxu3 %v3440_v47 }
 0x12a   : > { %v1327_v60 = vsel %vm1071_vm2, %v889_v57, %v1199_v10  ;;  %1878 = vmatpush.bf16.msrb.mxu0 %v3240_v1  ;;  %v1328_v28 = vsel %vm1072_vm4, %v4132_v3, %v4137_v12 }
 0x12b   : > { %v1329_v25 = vsel %vm1073_vm3, %v713_v6, %v1201_v13  ;;  %v1330_v37 = vsel %vm1074_vm5, %v802_v11, %v1202_v15  ;;  %v3304_v6 = vor.u32 %v3539_v56, %v3303_v53  ;;  %v3368_v15 = vor.u32 %v3555_v7, %v3367_v58  ;;  %v3287_v53 = vld [vmem:[#allocation9 + $0xa0] sm:$0xf]  ;;  %v3535_v56 = vld [vmem:[#allocation9 + $0xa4] sm:$0xf0] }
 0x12c   : > { %v4143_v35 = vpack.c.bf16 %v1329_v25, %v1325_v24  ;;  %v4146_v52 = vpack.c.bf16 %v1330_v37, %v1326_v26  ;;  %v3521_v24 = vld [vmem:[#allocation9 + $0x34] sm:$0xf0]  ;;  %v3295_v25 = vld [vmem:[#allocation9 + $0xb0] sm:$0xf]  ;;  %v3351_v58 = vld [vmem:[#allocation9 + $0x120] sm:$0xf] }
 0x12d   : > { %v890_v39 = vpop.f32.mrf.mxu2  ;;  %v979_v45 = vpop.f32.mrf.mxu3  ;;  %v3537_v26 = vld [vmem:[#allocation9 + $0xb4] sm:$0xf0]  ;;  %1967 = vmatpush.bf16.msrb.mxu1 %v3304_v6  ;;  %2056 = vmatpush.bf16.msrb.mxu2 %v3368_v15  ;;  %v3232_v33 = vor.u32 %v3521_v24, %v3231_v21  ;;  %v3359_v37 = vld [vmem:[#allocation9 + $0x130] sm:$0xf]  ;;  %v3551_v6 = vld [vmem:[#allocation9 + $0x124] sm:$0xf0]  ;;  %v3288_v15 = vor.u32 %v3535_v56, %v3287_v53 }
 0x12e   : > { %4955 = vst [vmem:[#allocation25_spill] sm:$0xff] %v4143_v35  ;;  %v891_v30 = vadd.f32 %v890_v39, %v4057_v50  ;;  %v715_v32 = vpop.f32.mrf.mxu0  ;;  %v980_v61 = vadd.f32 %v979_v45, %v4059_v54  ;;  %v804_v63 = vpop.f32.mrf.mxu1  ;;  %v3296_v34 = vor.u32 %v3537_v26, %v3295_v25  ;;  %v3553_v39 = vld [vmem:[#allocation9 + $0x134] sm:$0xf0]  ;;  %2145 = vmatpush.bf16.msrb.mxu3 %v3432_v18  ;;  %v3519_v45 = vld [vmem:[#allocation9 + $0x24] sm:$0xf0]  ;;  %v3480_v26 = vld [vmem:[%s4028_s18 + $0x70] sm:$0xff] }
 0x12f   : > { %4956 = vst [vmem:[#allocation26_spill] sm:$0xff] %v4146_v52  ;;  %v4152_v62 = vadd.f32 %v715_v32, %v4051_v44  ;;  %v4155_v13 = vadd.f32 %v804_v63, %v4053_v46  ;;  %v3360_v48 = vor.u32 %v3553_v39, %v3359_v37  ;;  %1879 = vmatpush.bf16.msrb.mxu0 %v3232_v33  ;;  %v3415_v7 = vld [vmem:[#allocation9 + $0x1a0] sm:$0xf]  ;;  %v3215_v25 = vld [vmem:[#allocation9 + $0x10] sm:$0xf] }
 0x130   : > { %vm1075_vm6 = vcmp.gt.f32.partialorder %v891_v30, 0.0  ;;  %v1203_v11 = vmul.f32 0.2, %v891_v30  ;;  %vm1076_vm7 = vcmp.gt.f32.partialorder %v980_v61, 0.0  ;;  %v1204_v57 = vmul.f32 0.2, %v980_v61  ;;  %754 = vmatmul.bf16.gmra.mxu0 %v3479_v17 }
 0x131   : > { %vm1077_vm8 = vcmp.gt.f32.partialorder %v4152_v62, 0.0  ;;  %v4159_v10 = vmul.f32 0.2, %v4152_v62  ;;  %vm1078_vm9 = vcmp.gt.f32.partialorder %v4155_v13, 0.0  ;;  %v4163_v16 = vmul.f32 0.2, %v4155_v13  ;;  %843 = vmatmul.bf16.gmra.mxu1 %v3479_v17  ;;  %2057 = vmatpush.bf16.msrb.mxu2 %v3360_v48 }
 0x132   : > { %932 = vmatmul.bf16.gmra.mxu2 %v3479_v17  ;;  %v1331_v23 = vsel %vm1075_vm6, %v891_v30, %v1203_v11  ;;  %1021 = vmatmul.bf16.gmra.mxu3 %v3479_v17  ;;  %v1332_v29 = vsel %vm1076_vm7, %v980_v61, %v1204_v57  ;;  %v3423_v17 = vld [vmem:[#allocation9 + $0x1b0] sm:$0xf]  ;;  %v3223_v30 = vld [vmem:[#allocation9 + $0x20] sm:$0xf]  ;;  %v3352_v57 = vor.u32 %v3551_v6, %v3351_v58  ;;  %v3533_v33 = vld [vmem:[#allocation9 + $0x94] sm:$0xf0] }
 0x133   : > { %v4166_v27 = vpack.c.bf16 %v1331_v23, %v1327_v60  ;;  %v4173_v41 = vpack.c.bf16 %v1332_v29, %v1328_v28  ;;  %v3424_v47 = vor.u32 %v3569_v51, %v3423_v17  ;;  %v3224_v1 = vor.u32 %v3519_v45, %v3223_v30  ;;  %1968 = vmatpush.bf16.msrb.mxu1 %v3296_v34  ;;  %v3517_v28 = vld [vmem:[#allocation9 + $0x14] sm:$0xf0]  ;;  %v3279_v29 = vld [vmem:[#allocation9 + $0x90] sm:$0xf]  ;;  %v3515_v53 = vld [vmem:[#allocation9 + $0x4] sm:$0xf0] }
 0x134   : > { %v3416_v24 = vor.u32 %v3567_v8, %v3415_v7  ;;  %v1333_v34 = vsel %vm1077_vm8, %v4152_v62, %v4159_v10  ;;  %v3216_v39 = vor.u32 %v3517_v28, %v3215_v25  ;;  %v3280_v17 = vor.u32 %v3533_v33, %v3279_v29  ;;  %v3549_v48 = vld [vmem:[#allocation9 + $0x114] sm:$0xf0]  ;;  %v3407_v51 = vld [vmem:[#allocation9 + $0x190] sm:$0xf]  ;;  %v3531_v6 = vld [vmem:[#allocation9 + $0x84] sm:$0xf0] }
 0x135   : > { %4957 = vst [vmem:[#allocation27_spill] sm:$0xff] %v4166_v27  ;;  %v893_v42 = vpop.f32.mrf.mxu2  ;;  %v982_v3 = vpop.f32.mrf.mxu3  ;;  %2146 = vmatpush.bf16.msrb.mxu3 %v3424_v47  ;;  %1880 = vmatpush.bf16.msrb.mxu0 %v3224_v1  ;;  %v3207_v47 = vld [vmem:[#allocation9] sm:$0xf]  ;;  %v1334_v62 = vsel %vm1078_vm9, %v4155_v13, %v4163_v16  ;;  %v3563_v13 = vld [vmem:[#allocation9 + $0x184] sm:$0xf0] }
 0x136   : > { %4958 = vst [vmem:[#allocation28_spill] sm:$0xff] %v4173_v41  ;;  %v4176_v32 = vadd.f32 %v893_v42, %v4057_v50  ;;  %v717_v12 = vpop.f32.mrf.mxu0  ;;  %v4179_v60 = vadd.f32 %v982_v3, %v4059_v54  ;;  %v806_v63 = vpop.f32.mrf.mxu1  ;;  %2058 = vmatpush.bf16.msrb.mxu2 %v3352_v57  ;;  %v3343_v42 = vld [vmem:[#allocation9 + $0x110] sm:$0xf]  ;;  %v3271_v1 = vld [vmem:[#allocation9 + $0x80] sm:$0xf] }
 0x137   : > { %v718_v61 = vadd.f32 %v717_v12, %v4051_v44  ;;  %v807_v11 = vadd.f32 %v806_v63, %v4053_v46  ;;  %1969 = vmatpush.bf16.msrb.mxu1 %v3288_v15  ;;  %v3344_v3 = vor.u32 %v3549_v48, %v3343_v42  ;;  %v3565_v12 = vld [vmem:[#allocation9 + $0x194] sm:$0xf0]  ;;  %v3335_v7 = vld [vmem:[#allocation9 + $0x100] sm:$0xf] }
 0x138   : > { %v4183_v9 = vmul.f32 0.2, %v4176_v32  ;;  %vm1079_vm10 = vcmp.gt.f32.partialorder %v4176_v32, 0.0  ;;  %v4188_v18 = vmul.f32 0.2, %v4179_v60  ;;  %vm1080_vm12 = vcmp.gt.f32.partialorder %v4179_v60, 0.0 }
 0x139   : > { %vm1081_vm11 = vcmp.gt.f32.partialorder %v718_v61, 0.0  ;;  %v1209_v21 = vmul.f32 0.2, %v718_v61  ;;  %vm1082_vm13 = vcmp.gt.f32.partialorder %v807_v11, 0.0  ;;  %v1210_v23 = vmul.f32 0.2, %v807_v11  ;;  %2147 = vmatpush.bf16.msrb.mxu3 %v3416_v24  ;;  %1881 = vmatpush.bf16.msrb.mxu0 %v3216_v39 }
 0x13a   : > { %v3408_v63 = vor.u32 %v3565_v12, %v3407_v51  ;;  %v3547_v24 = vld [vmem:[#allocation9 + $0x104] sm:$0xf0]  ;;  %v3399_v25 = vld [vmem:[#allocation9 + $0x180] sm:$0xf]  ;;  %2059 = vmatpush.bf16.msrb.mxu2 %v3344_v3  ;;  %v1335_v29 = vsel %vm1079_vm10, %v4176_v32, %v4183_v9 }
 0x13b   : > { %v1337_v37 = vsel %vm1081_vm11, %v718_v61, %v1209_v21  ;;  %v1338_v10 = vsel %vm1082_vm13, %v807_v11, %v1210_v23  ;;  %v3208_v21 = vor.u32 %v3515_v53, %v3207_v47  ;;  %1970 = vmatpush.bf16.msrb.mxu1 %v3280_v17  ;;  %v3272_v11 = vor.u32 %v3531_v6, %v3271_v1 }
 0x13c   : > { %v4196_v30 = vpack.c.bf16 %v1337_v37, %v1333_v34  ;;  %v4204_v8 = vpack.c.bf16 %v1338_v10, %v1334_v62  ;;  %v3336_v23 = vor.u32 %v3547_v24, %v3335_v7  ;;  %v3400_v33 = vor.u32 %v3563_v13, %v3399_v25  ;;  %v3481_v7 = vld [vmem:[%s4028_s18 + $0x78] sm:$0xff]  ;;  %s2898_s18 = sshll.u32 %s2894_s10, 4  ;;  %s2899_s18 = int_to_ptr.hbm [resolvable:$true] %s2898_s18 }
 0x13d   : > { %v895_v45 = vpop.f32.mrf.mxu2  ;;  %v984_v58 = vpop.f32.mrf.mxu3  ;;  %2148 = vmatpush.bf16.msrb.mxu3 %v3408_v63  ;;  %v1336_v37 = vsel %vm1080_vm12, %v4179_v60, %v4188_v18  ;;  %1882 = vmatpush.bf16.msrb.mxu0 %v3208_v21  ;;  %s3798_s8 = sshra.s32 %s2899_s18, 4  ;;  %s3799_s8 = int_to_ptr.hbm [resolvable:$true] %s3798_s8 }
 0x13e   : > { %4959 = vst [vmem:[#allocation29_spill] sm:$0xff] %v4196_v30  ;;  %v896_v56 = vadd.f32 %v895_v45, %v4057_v50  ;;  %v720_v61 = vpop.f32.mrf.mxu0  ;;  %v985_v15 = vadd.f32 %v984_v58, %v4059_v54  ;;  %v809_v57 = vpop.f32.mrf.mxu1  ;;  %2060 = vmatpush.bf16.msrb.mxu2 %v3336_v23  ;;  %s3800_s13 = scalar_lea.hbm %s3799_s8, 2  ;;  %p3805_p11 = scmp.lt.s32.totalorder %s3799_s8, %s4890_s7 }
 0x13f   : > { %4960 = vst [vmem:[#allocation30_spill] sm:$0xff] %v4204_v8  ;;  %v721_v39 = vadd.f32 %v720_v61, %v4051_v44  ;;  %v810_v48 = vadd.f32 %v809_v57, %v4053_v46  ;;  %1971 = vmatpush.bf16.msrb.mxu1 %v3272_v11  ;;  %p3801_p1 = scmp.ne.s32.totalorder %s3799_s8, %s3800_s13  ;;  %p3806_p9 = scmp.lt.s32.totalorder %s3804_s12, %s3800_s13 }
 0x140   : > { %vm1083_vm14 = vcmp.gt.f32.partialorder %v896_v56, 0.0  ;;  %v1211_v16 = vmul.f32 0.2, %v896_v56  ;;  %vm1084_vm15 = vcmp.gt.f32.partialorder %v985_v15, 0.0  ;;  %v1212_v28 = vmul.f32 0.2, %v985_v15  ;;  %759 = vmatmul.bf16.gmra.mxu0 %v3480_v26 }
 0x141   : > { %848 = vmatmul.bf16.gmra.mxu1 %v3480_v26  ;;  %2149 = vmatpush.bf16.msrb.mxu3 %v3400_v33  ;;  %v1213_v3 = vmul.f32 0.2, %v721_v39  ;;  %vm1085_vm0 = vcmp.gt.f32.partialorder %v721_v39, 0.0  ;;  %vm1086_vm1 = vcmp.gt.f32.partialorder %v810_v48, 0.0  ;;  %p3802_p4 = pnand %p3801_p1, %p3996_p7  ;;  %p3807_p2 = por %p3806_p9, %p3805_p11 }
 0x142   : > { %937 = vmatmul.bf16.gmra.mxu2 %v3480_v26  ;;  %v1339_v34 = vsel %vm1083_vm14, %v896_v56, %v1211_v16  ;;  %1026 = vmatmul.bf16.gmra.mxu3 %v3480_v26  ;;  %v1340_v42 = vsel %vm1084_vm15, %v985_v15, %v1212_v28  ;;  %v1214_v26 = vmul.f32 0.2, %v810_v48 }
 0x143   : > { %v4216_v17 = vpack.c.bf16 %v1339_v34, %v1335_v29  ;;  %v4219_v32 = vpack.c.bf16 %v1340_v42, %v1336_v37  ;;  %v1341_v56 = vsel %vm1085_vm0, %v721_v39, %v1213_v3  ;;  %p3803_p8 = pneg %p3802_p4 }
 0x144   : > { %v1342_v63 = vsel %vm1086_vm1, %v810_v48, %v1214_v26 }
 0x145   : > { %4961 = vst [vmem:[#allocation31_spill] sm:$0xff] %v4216_v17  ;;  %v898_v9 = vpop.f32.mrf.mxu2  ;;  %v987_v51 = vpop.f32.mrf.mxu3  ;;  %p3808_p10 = pnand %p3807_p2, %p3803_p8 }
 0x146   : > { %4962 = vst [vmem:[#allocation32_spill] sm:$0xff] %v4219_v32  ;;  %v722_v45 = vpop.f32.mrf.mxu0  ;;  %v811_v18 = vpop.f32.mrf.mxu1  ;;  %v899_v53 = vadd.f32 %v898_v9, %v4057_v50  ;;  %v988_v10 = vadd.f32 %v987_v51, %v4059_v54 }
 0x147   : > { %v723_v60 = vadd.f32 %v722_v45, %v4051_v44  ;;  %v812_v12 = vadd.f32 %v811_v18, %v4053_v46 }
 0x148   : > { %v1215_v57 = vmul.f32 0.2, %v899_v53  ;;  %vm1087_vm4 = vcmp.gt.f32.partialorder %v899_v53, 0.0  ;;  %v1216_v13 = vmul.f32 0.2, %v988_v10  ;;  %vm1088_vm5 = vcmp.gt.f32.partialorder %v988_v10, 0.0 }
 0x149   : > { %vm1089_vm2 = vcmp.gt.f32.partialorder %v723_v60, 0.0  ;;  %v1217_v47 = vmul.f32 0.2, %v723_v60  ;;  %vm1090_vm3 = vcmp.gt.f32.partialorder %v812_v12, 0.0  ;;  %v1218_v62 = vmul.f32 0.2, %v812_v12 }
 0x14a   : > { %v1343_v29 = vsel %vm1087_vm4, %v899_v53, %v1215_v57  ;;  %v1344_v39 = vsel %vm1088_vm5, %v988_v10, %v1216_v13 }
 0x14b   : > { %v1345_v58 = vsel %vm1089_vm2, %v723_v60, %v1217_v47  ;;  %v1346_v1 = vsel %vm1090_vm3, %v812_v12, %v1218_v62 }
 0x14c   : > { %v4225_v61 = vpack.c.bf16 %v1345_v58, %v1341_v56  ;;  %v4228_v15 = vpack.c.bf16 %v1346_v1, %v1342_v63 }
 0x14d   : > { %v900_v6 = vpop.f32.mrf.mxu2  ;;  %v989_v24 = vpop.f32.mrf.mxu3 }
 0x14e   : > { %4963 = vst [vmem:[#allocation33_spill] sm:$0xff] %v4225_v61  ;;  %v901_v21 = vadd.f32 %v900_v6, %v4057_v50  ;;  %v725_v25 = vpop.f32.mrf.mxu0  ;;  %v990_v16 = vadd.f32 %v989_v24, %v4059_v54  ;;  %v814_v11 = vpop.f32.mrf.mxu1 }
 0x14f   : > { %4964 = vst [vmem:[#allocation34_spill] sm:$0xff] %v4228_v15  ;;  %v726_v34 = vadd.f32 %v725_v25, %v4051_v44  ;;  %v815_v48 = vadd.f32 %v814_v11, %v4053_v46 }
 0x150   : > { %vm1091_vm6 = vcmp.gt.f32.partialorder %v901_v21, 0.0  ;;  %v1219_v23 = vmul.f32 0.2, %v901_v21  ;;  %vm1092_vm7 = vcmp.gt.f32.partialorder %v990_v16, 0.0  ;;  %v1220_v28 = vmul.f32 0.2, %v990_v16  ;;  %764 = vmatmul.bf16.gmra.mxu0 %v3481_v7 }
 0x151   : > { %853 = vmatmul.bf16.gmra.mxu1 %v3481_v7  ;;  %v1221_v60 = vmul.f32 0.2, %v726_v34  ;;  %vm1093_vm8 = vcmp.gt.f32.partialorder %v726_v34, 0.0  ;;  %v1222_v12 = vmul.f32 0.2, %v815_v48  ;;  %vm1094_vm9 = vcmp.gt.f32.partialorder %v815_v48, 0.0 }
 0x152   : > { %942 = vmatmul.bf16.gmra.mxu2 %v3481_v7  ;;  %v1347_v33 = vsel %vm1091_vm6, %v901_v21, %v1219_v23  ;;  %1031 = vmatmul.bf16.gmra.mxu3 %v3481_v7  ;;  %v1348_v42 = vsel %vm1092_vm7, %v990_v16, %v1220_v28 }
 0x153   : > { %v4233_v37 = vpack.c.bf16 %v1347_v33, %v1343_v29  ;;  %v4236_v9 = vpack.c.bf16 %v1348_v42, %v1344_v39  ;;  %v1349_v58 = vsel %vm1093_vm8, %v726_v34, %v1221_v60  ;;  %v1350_v6 = vsel %vm1094_vm9, %v815_v48, %v1222_v12 }
 0x155   : > { %4965 = vst [vmem:[#allocation35_spill] sm:$0xff] %v4233_v37  ;;  %v903_v51 = vpop.f32.mrf.mxu2  ;;  %v992_v45 = vpop.f32.mrf.mxu3 }
 0x156   : > { %4966 = vst [vmem:[#allocation36_spill] sm:$0xff] %v4236_v9  ;;  %v727_v3 = vpop.f32.mrf.mxu0  ;;  %v816_v26 = vpop.f32.mrf.mxu1  ;;  %v904_v62 = vadd.f32 %v903_v51, %v4057_v50  ;;  %v993_v56 = vadd.f32 %v992_v45, %v4059_v54 }
 0x157   : > { %v728_v18 = vadd.f32 %v727_v3, %v4051_v44  ;;  %v817_v47 = vadd.f32 %v816_v26, %v4053_v46 }
 0x158   : > { %v1223_v24 = vmul.f32 0.2, %v904_v62  ;;  %vm1095_vm12 = vcmp.gt.f32.partialorder %v904_v62, 0.0  ;;  %v1224_v11 = vmul.f32 0.2, %v993_v56  ;;  %vm1096_vm13 = vcmp.gt.f32.partialorder %v993_v56, 0.0 }
 0x159   : > { %vm1097_vm10 = vcmp.gt.f32.partialorder %v728_v18, 0.0  ;;  %v1225_v53 = vmul.f32 0.2, %v728_v18  ;;  %vm1098_vm11 = vcmp.gt.f32.partialorder %v817_v47, 0.0  ;;  %v1226_v10 = vmul.f32 0.2, %v817_v47 }
 0x15a   : > { %v1351_v34 = vsel %vm1095_vm12, %v904_v62, %v1223_v24  ;;  %v1352_v51 = vsel %vm1096_vm13, %v993_v56, %v1224_v11 }
 0x15b   : > { %v1353_v63 = vsel %vm1097_vm10, %v728_v18, %v1225_v53  ;;  %v1354_v7 = vsel %vm1098_vm11, %v817_v47, %v1226_v10 }
 0x15c   : > { %v4242_v1 = vpack.c.bf16 %v1353_v63, %v1349_v58  ;;  %v4244_v21 = vpack.c.bf16 %v1354_v7, %v1350_v6 }
 0x15d   : > { %v905_v57 = vpop.f32.mrf.mxu2  ;;  %v994_v13 = vpop.f32.mrf.mxu3 }
 0x15e   : > { %v906_v25 = vadd.f32 %v905_v57, %v4057_v50  ;;  %v730_v16 = vpop.f32.mrf.mxu0  ;;  %v995_v23 = vadd.f32 %v994_v13, %v4059_v54  ;;  %v819_v28 = vpop.f32.mrf.mxu1 }
 0x15f   : > { %v731_v42 = vadd.f32 %v730_v16, %v4051_v44  ;;  %v820_v3 = vadd.f32 %v819_v28, %v4053_v46 }
 0x160   : > { %vm1099_vm14 = vcmp.gt.f32.partialorder %v906_v25, 0.0  ;;  %v1227_v29 = vmul.f32 0.2, %v906_v25  ;;  %vm1100_vm15 = vcmp.gt.f32.partialorder %v995_v23, 0.0  ;;  %v1228_v33 = vmul.f32 0.2, %v995_v23  ;;  %1883 = vmatmul.bf16.vlgmr.msrb.gmra.mxu0 %v4065_v2 }
 0x161   : > { %1972 = vmatmul.bf16.vlgmr.msrb.gmra.mxu1 %v4067_v4  ;;  %v1229_v47 = vmul.f32 0.2, %v731_v42  ;;  %vm1101_vm0 = vcmp.gt.f32.partialorder %v731_v42, 0.0  ;;  %v1230_v10 = vmul.f32 0.2, %v820_v3  ;;  %vm1102_vm1 = vcmp.gt.f32.partialorder %v820_v3, 0.0 }
 0x162   : > { %2061 = vmatmul.bf16.vlgmr.msrb.gmra.mxu2 %v4072_v19  ;;  %v1355_v39 = vsel %vm1099_vm14, %v906_v25, %v1227_v29  ;;  %2150 = vmatmul.bf16.vlgmr.msrb.gmra.mxu3 %v4075_v22  ;;  %v1356_v45 = vsel %vm1100_vm15, %v995_v23, %v1228_v33 }
 0x163   : > { %v4253_v48 = vpack.c.bf16 %v1355_v39, %v1351_v34  ;;  %v4256_v60 = vpack.c.bf16 %v1356_v45, %v1352_v51  ;;  %v1357_v57 = vsel %vm1101_vm0, %v731_v42, %v1229_v47  ;;  %v1358_v13 = vsel %vm1102_vm1, %v820_v3, %v1230_v10 }
 0x165   : > { %4967 = vst [vmem:[#allocation37_spill] sm:$0xff] %v4253_v48  ;;  %v908_v18 = vpop.f32.mrf.mxu2  ;;  %v997_v26 = vpop.f32.mrf.mxu3 }
 0x166   : > { %4968 = vst [vmem:[#allocation38_spill] sm:$0xff] %v4256_v60  ;;  %v732_v12 = vpop.f32.mrf.mxu0  ;;  %v821_v62 = vpop.f32.mrf.mxu1  ;;  %v909_v56 = vadd.f32 %v908_v18, %v4057_v50  ;;  %v998_v7 = vadd.f32 %v997_v26, %v4059_v54 }
 0x167   : > { %v733_v53 = vadd.f32 %v732_v12, %v4051_v44  ;;  %v822_v58 = vadd.f32 %v821_v62, %v4053_v46 }
 0x168   : > { %v1231_v28 = vmul.f32 0.2, %v909_v56  ;;  %vm1103_vm4 = vcmp.gt.f32.partialorder %v909_v56, 0.0  ;;  %v1232_v39 = vmul.f32 0.2, %v998_v7  ;;  %vm1104_vm5 = vcmp.gt.f32.partialorder %v998_v7, 0.0 }
 0x169   : > { %vm1105_vm2 = vcmp.gt.f32.partialorder %v733_v53, 0.0  ;;  %v1233_v63 = vmul.f32 0.2, %v733_v53  ;;  %vm1106_vm3 = vcmp.gt.f32.partialorder %v822_v58, 0.0  ;;  %v1234_v6 = vmul.f32 0.2, %v822_v58 }
 0x16a   : > { %v1359_v3 = vsel %vm1103_vm4, %v909_v56, %v1231_v28 }
 0x16b   : > { %v1361_v24 = vsel %vm1105_vm2, %v733_v53, %v1233_v63  ;;  %v1362_v16 = vsel %vm1106_vm3, %v822_v58, %v1234_v6  ;;  %v1360_v53 = vsel %vm1104_vm5, %v998_v7, %v1232_v39 }
 0x16c   : > { %v4262_v25 = vpack.c.bf16 %v1361_v24, %v1357_v57  ;;  %v4264_v23 = vpack.c.bf16 %v1362_v16, %v1358_v13 }
 0x16d   : > { %v910_v11 = vpop.f32.mrf.mxu2  ;;  %v999_v33 = vpop.f32.mrf.mxu3 }
 0x16e   : > { %v911_v29 = vadd.f32 %v910_v11, %v4057_v50  ;;  %v735_v34 = vpop.f32.mrf.mxu0  ;;  %v1000_v51 = vadd.f32 %v999_v33, %v4059_v54  ;;  %v824_v45 = vpop.f32.mrf.mxu1 }
 0x16f   : > { %v736_v12 = vadd.f32 %v735_v34, %v4051_v44  ;;  %v825_v10 = vadd.f32 %v824_v45, %v4053_v46 }
 0x170   : > { %vm1107_vm6 = vcmp.gt.f32.partialorder %v911_v29, 0.0  ;;  %v1235_v42 = vmul.f32 0.2, %v911_v29  ;;  %vm1108_vm7 = vcmp.gt.f32.partialorder %v1000_v51, 0.0  ;;  %v1236_v18 = vmul.f32 0.2, %v1000_v51  ;;  %1888 = vmatmul.bf16.gmra.mxu0 %v4082_v38 }
 0x171   : > { %1977 = vmatmul.bf16.gmra.mxu1 %v4085_v43  ;;  %v1237_v24 = vmul.f32 0.2, %v736_v12  ;;  %vm1109_vm8 = vcmp.gt.f32.partialorder %v736_v12, 0.0  ;;  %v1238_v16 = vmul.f32 0.2, %v825_v10  ;;  %vm1110_vm9 = vcmp.gt.f32.partialorder %v825_v10, 0.0 }
 0x172   : > { %2066 = vmatmul.bf16.gmra.mxu2 %v4091_v0  ;;  %v1363_v26 = vsel %vm1107_vm6, %v911_v29, %v1235_v42  ;;  %2155 = vmatmul.bf16.gmra.mxu3 %v4093_v5  ;;  %v1364_v62 = vsel %vm1108_vm7, %v1000_v51, %v1236_v18 }
 0x173   : > { %v4273_v47 = vpack.c.bf16 %v1363_v26, %v1359_v3  ;;  %v4276_v58 = vpack.c.bf16 %v1364_v62, %v1360_v53  ;;  %v1365_v34 = vsel %vm1109_vm8, %v736_v12, %v1237_v24  ;;  %v1366_v45 = vsel %vm1110_vm9, %v825_v10, %v1238_v16 }
 0x175   : > { %v913_v63 = vpop.f32.mrf.mxu2  ;;  %v1002_v6 = vpop.f32.mrf.mxu3 }
 0x176   : > { %v737_v57 = vpop.f32.mrf.mxu0  ;;  %v826_v56 = vpop.f32.mrf.mxu1  ;;  %v914_v7 = vadd.f32 %v913_v63, %v4057_v50  ;;  %v1003_v33 = vadd.f32 %v1002_v6, %v4059_v54 }
 0x177   : > { %v738_v13 = vadd.f32 %v737_v57, %v4051_v44  ;;  %v827_v11 = vadd.f32 %v826_v56, %v4053_v46 }
 0x178   : > { %v1239_v26 = vmul.f32 0.2, %v914_v7  ;;  %vm1111_vm12 = vcmp.gt.f32.partialorder %v914_v7, 0.0  ;;  %v1240_v63 = vmul.f32 0.2, %v1003_v33  ;;  %vm1112_vm13 = vcmp.gt.f32.partialorder %v1003_v33, 0.0 }
 0x179   : > { %vm1113_vm10 = vcmp.gt.f32.partialorder %v738_v13, 0.0  ;;  %v1241_v28 = vmul.f32 0.2, %v738_v13  ;;  %vm1114_vm11 = vcmp.gt.f32.partialorder %v827_v11, 0.0  ;;  %v1242_v29 = vmul.f32 0.2, %v827_v11 }
 0x17a   : > { %v1367_v10 = vsel %vm1111_vm12, %v914_v7, %v1239_v26 }
 0x17b   : > { %v1369_v39 = vsel %vm1113_vm10, %v738_v13, %v1241_v28  ;;  %v1370_v42 = vsel %vm1114_vm11, %v827_v11, %v1242_v29  ;;  %v1368_v11 = vsel %vm1112_vm13, %v1003_v33, %v1240_v63 }
 0x17c   : > { %v4282_v51 = vpack.c.bf16 %v1369_v39, %v1365_v34  ;;  %v4284_v3 = vpack.c.bf16 %v1370_v42, %v1366_v45 }
 0x17d   : > { %v915_v18 = vpop.f32.mrf.mxu2  ;;  %v1004_v62 = vpop.f32.mrf.mxu3 }
 0x17e   : > { %v916_v53 = vadd.f32 %v915_v18, %v4057_v50  ;;  %v740_v57 = vpop.f32.mrf.mxu0  ;;  %v1005_v56 = vadd.f32 %v1004_v62, %v4059_v54  ;;  %v829_v5 = vpop.f32.mrf.mxu1 }
 0x17f   : > { %v741_v13 = vadd.f32 %v740_v57, %v4051_v44  ;;  %v830_v29 = vadd.f32 %v829_v5, %v4053_v46 }
 0x180   : > { %vm1115_vm14 = vcmp.gt.f32.partialorder %v916_v53, 0.0  ;;  %v1243_v12 = vmul.f32 0.2, %v916_v53  ;;  %vm1116_vm15 = vcmp.gt.f32.partialorder %v1005_v56, 0.0  ;;  %v1244_v6 = vmul.f32 0.2, %v1005_v56  ;;  %1893 = vmatmul.bf16.gmra.mxu0 %v4099_v31 }
 0x181   : > { %1982 = vmatmul.bf16.gmra.mxu1 %v4102_v36  ;;  %v1245_v18 = vmul.f32 0.2, %v741_v13  ;;  %vm1117_vm0 = vcmp.gt.f32.partialorder %v741_v13, 0.0  ;;  %v1246_v26 = vmul.f32 0.2, %v830_v29  ;;  %vm1118_vm1 = vcmp.gt.f32.partialorder %v830_v29, 0.0 }
 0x182   : > { %2071 = vmatmul.bf16.gmra.mxu2 %v4107_v55  ;;  %v1371_v24 = vsel %vm1115_vm14, %v916_v53, %v1243_v12  ;;  %2160 = vmatmul.bf16.gmra.mxu3 %v4110_v59  ;;  %v1372_v28 = vsel %vm1116_vm15, %v1005_v56, %v1244_v6 }
 0x183   : > { %v4293_v16 = vpack.c.bf16 %v1371_v24, %v1367_v10  ;;  %v4296_v34 = vpack.c.bf16 %v1372_v28, %v1368_v11  ;;  %v1373_v56 = vsel %vm1117_vm0, %v741_v13, %v1245_v18  ;;  %v1374_v10 = vsel %vm1118_vm1, %v830_v29, %v1246_v26 }
 0x185   : > { %4969 = vst [vmem:[#allocation39_spill] sm:$0xff] %v4293_v16  ;;  %v918_v39 = vpop.f32.mrf.mxu2  ;;  %v1007_v45 = vpop.f32.mrf.mxu3 }
 0x186   : > { %4970 = vst [vmem:[#allocation40_spill] sm:$0xff] %v4296_v34  ;;  %v742_v42 = vpop.f32.mrf.mxu0  ;;  %v831_v7 = vpop.f32.mrf.mxu1  ;;  %v919_v33 = vadd.f32 %v918_v39, %v4057_v50  ;;  %v1008_v63 = vadd.f32 %v1007_v45, %v4059_v54 }
 0x187   : > { %v743_v62 = vadd.f32 %v742_v42, %v4051_v44  ;;  %v832_v53 = vadd.f32 %v831_v7, %v4053_v46 }
 0x188   : > { %v1247_v42 = vmul.f32 0.2, %v919_v33  ;;  %vm1119_vm4 = vcmp.gt.f32.partialorder %v919_v33, 0.0  ;;  %v1248_v39 = vmul.f32 0.2, %v1008_v63  ;;  %vm1120_vm5 = vcmp.gt.f32.partialorder %v1008_v63, 0.0 }
 0x189   : > { %vm1121_vm2 = vcmp.gt.f32.partialorder %v743_v62, 0.0  ;;  %v1249_v57 = vmul.f32 0.2, %v743_v62  ;;  %vm1122_vm3 = vcmp.gt.f32.partialorder %v832_v53, 0.0  ;;  %v1250_v5 = vmul.f32 0.2, %v832_v53 }
 0x18a   : > { %v1375_v29 = vsel %vm1119_vm4, %v919_v33, %v1247_v42 }
 0x18b   : > { %v1377_v12 = vsel %vm1121_vm2, %v743_v62, %v1249_v57  ;;  %v1378_v24 = vsel %vm1122_vm3, %v832_v53, %v1250_v5 }
 0x18c   : > { %v4302_v6 = vpack.c.bf16 %v1377_v12, %v1373_v56  ;;  %v4304_v28 = vpack.c.bf16 %v1378_v24, %v1374_v10 }
 0x18d   : > { %v920_v11 = vpop.f32.mrf.mxu2  ;;  %v1009_v59 = vpop.f32.mrf.mxu3 }
 0x18e   : > { %4971 = vst [vmem:[#allocation41_spill] sm:$0xff] %v4302_v6  ;;  %v921_v7 = vadd.f32 %v920_v11, %v4057_v50  ;;  %v745_v55 = vpop.f32.mrf.mxu0  ;;  %v1010_v36 = vadd.f32 %v1009_v59, %v4059_v54  ;;  %v834_v31 = vpop.f32.mrf.mxu1  ;;  %v1376_v59 = vsel %vm1120_vm5, %v1008_v63, %v1248_v39 }
 0x18f   : > { %4972 = vst [vmem:[#allocation42_spill] sm:$0xff] %v4304_v28  ;;  %v746_v62 = vadd.f32 %v745_v55, %v4051_v44  ;;  %v835_v57 = vadd.f32 %v834_v31, %v4053_v46 }
 0x190   : > { %vm1123_vm6 = vcmp.gt.f32.partialorder %v921_v7, 0.0  ;;  %v1251_v13 = vmul.f32 0.2, %v921_v7  ;;  %vm1124_vm7 = vcmp.gt.f32.partialorder %v1010_v36, 0.0  ;;  %v1252_v45 = vmul.f32 0.2, %v1010_v36  ;;  %1898 = vmatmul.bf16.gmra.mxu0 %v4116_v14 }
 0x191   : > { %1987 = vmatmul.bf16.gmra.mxu1 %v4119_v20  ;;  %v1253_v24 = vmul.f32 0.2, %v746_v62  ;;  %vm1125_vm8 = vcmp.gt.f32.partialorder %v746_v62, 0.0  ;;  %v1254_v42 = vmul.f32 0.2, %v835_v57  ;;  %vm1126_vm9 = vcmp.gt.f32.partialorder %v835_v57, 0.0 }
 0x192   : > { %2076 = vmatmul.bf16.gmra.mxu2 %v4125_v40  ;;  %v1379_v18 = vsel %vm1123_vm6, %v921_v7, %v1251_v13  ;;  %2165 = vmatmul.bf16.gmra.mxu3 %v4128_v49  ;;  %v1380_v53 = vsel %vm1124_vm7, %v1010_v36, %v1252_v45 }
 0x193   : > { %v4313_v26 = vpack.c.bf16 %v1379_v18, %v1375_v29  ;;  %v4316_v5 = vpack.c.bf16 %v1380_v53, %v1376_v59  ;;  %v1381_v39 = vsel %vm1125_vm8, %v746_v62, %v1253_v24  ;;  %v1382_v29 = vsel %vm1126_vm9, %v835_v57, %v1254_v42 }
 0x195   : > { %4973 = vst [vmem:[#allocation43_spill] sm:$0xff] %v4313_v26  ;;  %v923_v56 = vpop.f32.mrf.mxu2  ;;  %v1012_v12 = vpop.f32.mrf.mxu3 }
 0x196   : > { %4974 = vst [vmem:[#allocation44_spill] sm:$0xff] %v4316_v5  ;;  %v747_v10 = vpop.f32.mrf.mxu0  ;;  %v836_v33 = vpop.f32.mrf.mxu1  ;;  %v924_v36 = vadd.f32 %v923_v56, %v4057_v50  ;;  %v1013_v63 = vadd.f32 %v1012_v12, %v4059_v54 }
 0x197   : > { %v748_v11 = vadd.f32 %v747_v10, %v4051_v44  ;;  %v837_v55 = vadd.f32 %v836_v33, %v4053_v46 }
 0x198   : > { %v1255_v10 = vmul.f32 0.2, %v924_v36  ;;  %vm1127_vm12 = vcmp.gt.f32.partialorder %v924_v36, 0.0  ;;  %v1256_v56 = vmul.f32 0.2, %v1013_v63  ;;  %vm1128_vm13 = vcmp.gt.f32.partialorder %v1013_v63, 0.0 }
 0x199   : > { %vm1129_vm10 = vcmp.gt.f32.partialorder %v748_v11, 0.0  ;;  %v1257_v7 = vmul.f32 0.2, %v748_v11  ;;  %vm1130_vm11 = vcmp.gt.f32.partialorder %v837_v55, 0.0  ;;  %v1258_v31 = vmul.f32 0.2, %v837_v55 }
 0x19a   : > { %v1383_v57 = vsel %vm1127_vm12, %v924_v36, %v1255_v10 }
 0x19b   : > { %v1385_v13 = vsel %vm1129_vm10, %v748_v11, %v1257_v7  ;;  %v1386_v18 = vsel %vm1130_vm11, %v837_v55, %v1258_v31 }
 0x19c   : > { %v4322_v45 = vpack.c.bf16 %v1385_v13, %v1381_v39  ;;  %v4324_v53 = vpack.c.bf16 %v1386_v18, %v1382_v29 }
 0x19d   : > { %v925_v59 = vpop.f32.mrf.mxu2  ;;  %v1014_v49 = vpop.f32.mrf.mxu3 }
 0x19e   : > { %4975 = vst [vmem:[#allocation45_spill] sm:$0xff] %v4322_v45  ;;  %v926_v33 = vadd.f32 %v925_v59, %v4057_v50  ;;  %v750_v40 = vpop.f32.mrf.mxu0  ;;  %v1015_v20 = vadd.f32 %v1014_v49, %v4059_v54  ;;  %v839_v14 = vpop.f32.mrf.mxu1  ;;  %v1384_v49 = vsel %vm1128_vm13, %v1013_v63, %v1256_v56 }
 0x19f   : > { %4976 = vst [vmem:[#allocation46_spill] sm:$0xff] %v4324_v53  ;;  %v751_v11 = vadd.f32 %v750_v40, %v4051_v44  ;;  %v840_v7 = vadd.f32 %v839_v14, %v4053_v46 }
 0x1a0   : > { %vm1131_vm14 = vcmp.gt.f32.partialorder %v926_v33, 0.0  ;;  %v1259_v62 = vmul.f32 0.2, %v926_v33  ;;  %vm1132_vm15 = vcmp.gt.f32.partialorder %v1015_v20, 0.0  ;;  %v1260_v12 = vmul.f32 0.2, %v1015_v20  ;;  %1903 = vmatmul.bf16.gmra.mxu0 %v4143_v35 }
 0x1a1   : > { %1992 = vmatmul.bf16.gmra.mxu1 %v4146_v52  ;;  %v1261_v18 = vmul.f32 0.2, %v751_v11  ;;  %vm1133_vm0 = vcmp.gt.f32.partialorder %v751_v11, 0.0  ;;  %v1262_v10 = vmul.f32 0.2, %v840_v7  ;;  %vm1134_vm1 = vcmp.gt.f32.partialorder %v840_v7, 0.0 }
 0x1a2   : > { %2081 = vmatmul.bf16.gmra.mxu2 %v4166_v27  ;;  %v1387_v24 = vsel %vm1131_vm14, %v926_v33, %v1259_v62  ;;  %2170 = vmatmul.bf16.gmra.mxu3 %v4173_v41  ;;  %v1388_v55 = vsel %vm1132_vm15, %v1015_v20, %v1260_v12 }
 0x1a3   : > { %v4333_v42 = vpack.c.bf16 %v1387_v24, %v1383_v57  ;;  %v4336_v31 = vpack.c.bf16 %v1388_v55, %v1384_v49  ;;  %v1389_v56 = vsel %vm1133_vm0, %v751_v11, %v1261_v18  ;;  %v1390_v57 = vsel %vm1134_vm1, %v840_v7, %v1262_v10 }
 0x1a5   : > { %4977 = vst [vmem:[#allocation47_spill] sm:$0xff] %v4333_v42  ;;  %v928_v39 = vpop.f32.mrf.mxu2  ;;  %v1017_v13 = vpop.f32.mrf.mxu3 }
 0x1a6   : > { %4978 = vst [vmem:[#allocation48_spill] sm:$0xff] %v4336_v31  ;;  %v752_v29 = vpop.f32.mrf.mxu0  ;;  %v841_v36 = vpop.f32.mrf.mxu1  ;;  %v929_v20 = vadd.f32 %v928_v39, %v4057_v50  ;;  %v1018_v63 = vadd.f32 %v1017_v13, %v4059_v54 }
 0x1a7   : > { %v753_v59 = vadd.f32 %v752_v29, %v4051_v44  ;;  %v842_v40 = vadd.f32 %v841_v36, %v4053_v46 }
 0x1a8   : > { %v1263_v29 = vmul.f32 0.2, %v929_v20  ;;  %vm1135_vm4 = vcmp.gt.f32.partialorder %v929_v20, 0.0  ;;  %v1264_v39 = vmul.f32 0.2, %v1018_v63  ;;  %vm1136_vm5 = vcmp.gt.f32.partialorder %v1018_v63, 0.0 }
 0x1a9   : > { %vm1137_vm2 = vcmp.gt.f32.partialorder %v753_v59, 0.0  ;;  %v1265_v33 = vmul.f32 0.2, %v753_v59  ;;  %vm1138_vm3 = vcmp.gt.f32.partialorder %v842_v40, 0.0  ;;  %v1266_v14 = vmul.f32 0.2, %v842_v40 }
 0x1aa   : > { %v1391_v7 = vsel %vm1135_vm4, %v929_v20, %v1263_v29 }
 0x1ab   : > { %v1393_v62 = vsel %vm1137_vm2, %v753_v59, %v1265_v33  ;;  %v1394_v24 = vsel %vm1138_vm3, %v842_v40, %v1266_v14 }
 0x1ac   : > { %v4342_v12 = vpack.c.bf16 %v1393_v62, %v1389_v56  ;;  %v4344_v55 = vpack.c.bf16 %v1394_v24, %v1390_v57 }
 0x1ad   : > { %v930_v49 = vpop.f32.mrf.mxu2  ;;  %v1019_v41 = vpop.f32.mrf.mxu3 }
 0x1ae   : > { %4979 = vst [vmem:[#allocation49_spill] sm:$0xff] %v4342_v12  ;;  %v931_v36 = vadd.f32 %v930_v49, %v4057_v50  ;;  %v755_v27 = vpop.f32.mrf.mxu0  ;;  %v1020_v52 = vadd.f32 %v1019_v41, %v4059_v54  ;;  %v844_v35 = vpop.f32.mrf.mxu1  ;;  %v1392_v41 = vsel %vm1136_vm5, %v1018_v63, %v1264_v39 }
 0x1af   : > { %4980 = vst [vmem:[#allocation50_spill] sm:$0xff] %v4344_v55  ;;  %v756_v59 = vadd.f32 %v755_v27, %v4051_v44  ;;  %v845_v33 = vadd.f32 %v844_v35, %v4053_v46 }
 0x1b0   : > { %vm1139_vm6 = vcmp.gt.f32.partialorder %v931_v36, 0.0  ;;  %v1267_v11 = vmul.f32 0.2, %v931_v36  ;;  %vm1140_vm7 = vcmp.gt.f32.partialorder %v1020_v52, 0.0  ;;  %v1268_v13 = vmul.f32 0.2, %v1020_v52  ;;  %1908 = vmatmul.bf16.gmra.mxu0 %v4196_v30 }
 0x1b1   : > { %1997 = vmatmul.bf16.gmra.mxu1 %v4204_v8  ;;  %v1269_v24 = vmul.f32 0.2, %v756_v59  ;;  %vm1141_vm8 = vcmp.gt.f32.partialorder %v756_v59, 0.0  ;;  %v1270_v29 = vmul.f32 0.2, %v845_v33  ;;  %vm1142_vm9 = vcmp.gt.f32.partialorder %v845_v33, 0.0 }
 0x1b2   : > { %2086 = vmatmul.bf16.gmra.mxu2 %v4216_v17  ;;  %v1395_v18 = vsel %vm1139_vm6, %v931_v36, %v1267_v11  ;;  %2175 = vmatmul.bf16.gmra.mxu3 %v4219_v32  ;;  %v1396_v40 = vsel %vm1140_vm7, %v1020_v52, %v1268_v13 }
 0x1b3   : > { %v4353_v10 = vpack.c.bf16 %v1395_v18, %v1391_v7  ;;  %v4356_v14 = vpack.c.bf16 %v1396_v40, %v1392_v41  ;;  %v1397_v39 = vsel %vm1141_vm8, %v756_v59, %v1269_v24  ;;  %v1398_v7 = vsel %vm1142_vm9, %v845_v33, %v1270_v29 }
 0x1b5   : > { %4981 = vst [vmem:[#allocation51_spill] sm:$0xff] %v4353_v10  ;;  %v933_v56 = vpop.f32.mrf.mxu2  ;;  %v1022_v62 = vpop.f32.mrf.mxu3 }
 0x1b6   : > { %4982 = vst [vmem:[#allocation52_spill] sm:$0xff] %v4356_v14  ;;  %v757_v57 = vpop.f32.mrf.mxu0  ;;  %v846_v20 = vpop.f32.mrf.mxu1  ;;  %v934_v52 = vadd.f32 %v933_v56, %v4057_v50  ;;  %v1023_v63 = vadd.f32 %v1022_v62, %v4059_v54 }
 0x1b7   : > { %v758_v49 = vadd.f32 %v757_v57, %v4051_v44  ;;  %v847_v27 = vadd.f32 %v846_v20, %v4053_v46 }
 0x1b8   : > { %v1271_v57 = vmul.f32 0.2, %v934_v52  ;;  %vm1143_vm12 = vcmp.gt.f32.partialorder %v934_v52, 0.0  ;;  %v1272_v56 = vmul.f32 0.2, %v1023_v63  ;;  %vm1144_vm13 = vcmp.gt.f32.partialorder %v1023_v63, 0.0 }
 0x1b9   : > { %vm1145_vm10 = vcmp.gt.f32.partialorder %v758_v49, 0.0  ;;  %v1273_v36 = vmul.f32 0.2, %v758_v49  ;;  %vm1146_vm11 = vcmp.gt.f32.partialorder %v847_v27, 0.0  ;;  %v1274_v35 = vmul.f32 0.2, %v847_v27 }
 0x1ba   : > { %v1399_v33 = vsel %vm1143_vm12, %v934_v52, %v1271_v57 }
 0x1bb   : > { %v1401_v11 = vsel %vm1145_vm10, %v758_v49, %v1273_v36  ;;  %v1402_v18 = vsel %vm1146_vm11, %v847_v27, %v1274_v35 }
 0x1bc   : > { %v4362_v13 = vpack.c.bf16 %v1401_v11, %v1397_v39  ;;  %v4364_v40 = vpack.c.bf16 %v1402_v18, %v1398_v7 }
 0x1bd   : > { %v935_v41 = vpop.f32.mrf.mxu2  ;;  %v1024_v32 = vpop.f32.mrf.mxu3 }
 0x1be   : > { %4983 = vst [vmem:[#allocation53_spill] sm:$0xff] %v4362_v13  ;;  %v936_v20 = vadd.f32 %v935_v41, %v4057_v50  ;;  %v760_v17 = vpop.f32.mrf.mxu0  ;;  %v1025_v8 = vadd.f32 %v1024_v32, %v4059_v54  ;;  %v849_v30 = vpop.f32.mrf.mxu1  ;;  %v1400_v32 = vsel %vm1144_vm13, %v1023_v63, %v1272_v56 }
 0x1bf   : > { %4984 = vst [vmem:[#allocation54_spill] sm:$0xff] %v4364_v40  ;;  %v761_v49 = vadd.f32 %v760_v17, %v4051_v44  ;;  %v850_v36 = vadd.f32 %v849_v30, %v4053_v46 }
 0x1c0   : > { %vm1147_vm14 = vcmp.gt.f32.partialorder %v936_v20, 0.0  ;;  %v1275_v59 = vmul.f32 0.2, %v936_v20  ;;  %vm1148_vm15 = vcmp.gt.f32.partialorder %v1025_v8, 0.0  ;;  %v1276_v62 = vmul.f32 0.2, %v1025_v8  ;;  %1913 = vmatmul.bf16.gmra.mxu0 %v4225_v61 }
 0x1c1   : > { %2002 = vmatmul.bf16.gmra.mxu1 %v4228_v15  ;;  %v1277_v18 = vmul.f32 0.2, %v761_v49  ;;  %vm1149_vm0 = vcmp.gt.f32.partialorder %v761_v49, 0.0  ;;  %v1278_v57 = vmul.f32 0.2, %v850_v36  ;;  %vm1150_vm1 = vcmp.gt.f32.partialorder %v850_v36, 0.0 }
 0x1c2   : > { %2091 = vmatmul.bf16.gmra.mxu2 %v4233_v37  ;;  %v1403_v24 = vsel %vm1147_vm14, %v936_v20, %v1275_v59  ;;  %2180 = vmatmul.bf16.gmra.mxu3 %v4236_v9  ;;  %v1404_v27 = vsel %vm1148_vm15, %v1025_v8, %v1276_v62 }
 0x1c3   : > { %v4373_v29 = vpack.c.bf16 %v1403_v24, %v1399_v33  ;;  %v4376_v35 = vpack.c.bf16 %v1404_v27, %v1400_v32  ;;  %v1405_v56 = vsel %vm1149_vm0, %v761_v49, %v1277_v18  ;;  %v1406_v33 = vsel %vm1150_vm1, %v850_v36, %v1278_v57 }
 0x1c5   : > { %4985 = vst [vmem:[#allocation55_spill] sm:$0xff] %v4373_v29  ;;  %v938_v39 = vpop.f32.mrf.mxu2  ;;  %v1027_v11 = vpop.f32.mrf.mxu3 }
 0x1c6   : > { %4986 = vst [vmem:[#allocation56_spill] sm:$0xff] %v4376_v35  ;;  %v762_v7 = vpop.f32.mrf.mxu0  ;;  %v851_v52 = vpop.f32.mrf.mxu1  ;;  %v939_v8 = vadd.f32 %v938_v39, %v4057_v50  ;;  %v1028_v63 = vadd.f32 %v1027_v11, %v4059_v54 }
 0x1c7   : > { %v763_v41 = vadd.f32 %v762_v7, %v4051_v44  ;;  %v852_v17 = vadd.f32 %v851_v52, %v4053_v46 }
 0x1c8   : > { %v1279_v7 = vmul.f32 0.2, %v939_v8  ;;  %vm1151_vm4 = vcmp.gt.f32.partialorder %v939_v8, 0.0  ;;  %v1280_v39 = vmul.f32 0.2, %v1028_v63  ;;  %vm1152_vm5 = vcmp.gt.f32.partialorder %v1028_v63, 0.0 }
 0x1c9   : > { %vm1153_vm2 = vcmp.gt.f32.partialorder %v763_v41, 0.0  ;;  %v1281_v20 = vmul.f32 0.2, %v763_v41  ;;  %vm1154_vm3 = vcmp.gt.f32.partialorder %v852_v17, 0.0  ;;  %v1282_v30 = vmul.f32 0.2, %v852_v17 }
 0x1ca   : > { %v1407_v36 = vsel %vm1151_vm4, %v939_v8, %v1279_v7 }
 0x1cb   : > { %v1409_v59 = vsel %vm1153_vm2, %v763_v41, %v1281_v20  ;;  %v1410_v24 = vsel %vm1154_vm3, %v852_v17, %v1282_v30 }
 0x1cc   : > { %v4382_v62 = vpack.c.bf16 %v1409_v59, %v1405_v56  ;;  %v4384_v27 = vpack.c.bf16 %v1410_v24, %v1406_v33 }
 0x1cd   : > { %v940_v32 = vpop.f32.mrf.mxu2  ;;  %v1029_v9 = vpop.f32.mrf.mxu3 }
 0x1ce   : > { %4987 = vst [vmem:[#allocation57_spill] sm:$0xff] %v4382_v62  ;;  %v941_v52 = vadd.f32 %v940_v32, %v4057_v50  ;;  %v765_v37 = vpop.f32.mrf.mxu0  ;;  %v1030_v15 = vadd.f32 %v1029_v9, %v4059_v54  ;;  %v854_v61 = vpop.f32.mrf.mxu1  ;;  %v1408_v9 = vsel %vm1152_vm5, %v1028_v63, %v1280_v39  ;;  %v1549_v63 = vld [vmem:[%s4887_s4] sm:$0x3] }
 0x1cf   : > { %4988 = vst [vmem:[#allocation58_spill] sm:$0xff] %v4384_v27  ;;  %v766_v41 = vadd.f32 %v765_v37, %v4051_v44  ;;  %v855_v20 = vadd.f32 %v854_v61, %v4053_v46 }
 0x1d0   : > { %vm1155_vm6 = vcmp.gt.f32.partialorder %v941_v52, 0.0  ;;  %v1283_v49 = vmul.f32 0.2, %v941_v52  ;;  %vm1156_vm7 = vcmp.gt.f32.partialorder %v1030_v15, 0.0  ;;  %v1284_v11 = vmul.f32 0.2, %v1030_v15  ;;  %1918 = vmatmul.bf16.gmra.mxu0 %v4242_v1 }
 0x1d1   : > { %2007 = vmatmul.bf16.gmra.mxu1 %v4244_v21  ;;  %v1285_v24 = vmul.f32 0.2, %v766_v41  ;;  %vm1157_vm8 = vcmp.gt.f32.partialorder %v766_v41, 0.0  ;;  %v1286_v7 = vmul.f32 0.2, %v855_v20  ;;  %vm1158_vm9 = vcmp.gt.f32.partialorder %v855_v20, 0.0 }
 0x1d2   : > { %2096 = vmatmul.bf16.gmra.mxu2 %v4253_v48  ;;  %v1411_v18 = vsel %vm1155_vm6, %v941_v52, %v1283_v49  ;;  %2185 = vmatmul.bf16.gmra.mxu3 %v4256_v60  ;;  %v1412_v17 = vsel %vm1156_vm7, %v1030_v15, %v1284_v11  ;;  %v4405_v49 = vperm.slane %v1549_v63, 0 }
 0x1d3   : > { %v4393_v57 = vpack.c.bf16 %v1411_v18, %v1407_v36  ;;  %v4396_v30 = vpack.c.bf16 %v1412_v17, %v1408_v9 }
 0x1d5   : > { %4989 = vst [vmem:[#allocation59_spill] sm:$0xff] %v4393_v57  ;;  %v943_v56 = vpop.f32.mrf.mxu2  ;;  %v1032_v59 = vpop.f32.mrf.mxu3 }
 0x1d6   : > { %4990 = vst [vmem:[#allocation60_spill] sm:$0xff] %v4396_v30  ;;  %v767_v33 = vpop.f32.mrf.mxu0  ;;  %v856_v8 = vpop.f32.mrf.mxu1  ;;  %v944_v15 = vadd.f32 %v943_v56, %v4057_v50  ;;  %v1033_v39 = vadd.f32 %v1032_v59, %v4059_v54 }
 0x1d7   : > { %v768_v32 = vadd.f32 %v767_v33, %v4051_v44  ;;  %v857_v37 = vadd.f32 %v856_v8, %v4053_v46  ;;  %v1413_v44 = vsel %vm1157_vm8, %v766_v41, %v1285_v24  ;;  %v1414_v46 = vsel %vm1158_vm9, %v855_v20, %v1286_v7 }
 0x1d8   : > { %v1287_v33 = vmul.f32 0.2, %v944_v15  ;;  %vm1159_vm12 = vcmp.gt.f32.partialorder %v944_v15, 0.0  ;;  %v1288_v48 = vmul.f32 0.2, %v1033_v39  ;;  %vm1160_vm13 = vcmp.gt.f32.partialorder %v1033_v39, 0.0 }
 0x1d9   : > { %vm1161_vm10 = vcmp.gt.f32.partialorder %v768_v32, 0.0  ;;  %v1289_v61 = vmul.f32 0.2, %v768_v32  ;;  %vm1162_vm11 = vcmp.gt.f32.partialorder %v857_v37, 0.0  ;;  %v1290_v52 = vmul.f32 0.2, %v857_v37 }
 0x1db   : > { %v1417_v11 = vsel %vm1161_vm10, %v768_v32, %v1289_v61  ;;  %v1418_v18 = vsel %vm1162_vm11, %v857_v37, %v1290_v52 }
 0x1dc   : > { %v4407_v36 = vpack.c.bf16 %v1417_v11, %v1413_v44  ;;  %v4409_v17 = vpack.c.bf16 %v1418_v18, %v1414_v46 }
 0x1dd   : > { %v945_v9 = vpop.f32.mrf.mxu2  ;;  %v1034_v60 = vpop.f32.mrf.mxu3 }
 0x1de   : > { %4991 = vst [vmem:[#allocation61_spill] sm:$0xff] %v4407_v36  ;;  %v946_v8 = vadd.f32 %v945_v9, %v4057_v50  ;;  %v1884_v56 = vpop.f32.mrf.mxu0  ;;  %v1035_v59 = vadd.f32 %v1034_v60, %v4059_v54  ;;  %v1973_v41 = vpop.f32.mrf.mxu1  ;;  %v1415_v50 = vsel %vm1159_vm12, %v944_v15, %v1287_v33  ;;  %v1416_v60 = vsel %vm1160_vm13, %v1033_v39, %v1288_v48 }
 0x1df   : > { %4992 = vst [vmem:[#allocation62_spill] sm:$0xff] %v4409_v17  ;;  %v1885_v63 = vadd.f32 %v1884_v56, %v4405_v49 }
 0x1e0   : > { %vm1163_vm14 = vcmp.gt.f32.partialorder %v946_v8, 0.0  ;;  %v1291_v24 = vmul.f32 0.2, %v946_v8  ;;  %vm1164_vm15 = vcmp.gt.f32.partialorder %v1035_v59, 0.0  ;;  %v1292_v20 = vmul.f32 0.2, %v1035_v59  ;;  %1923 = vmatmul.bf16.gmra.mxu0 %v4262_v25 }
 0x1e1   : > { %v1974_v32 = vadd.f32 %v1973_v41, %v1885_v63  ;;  %2012 = vmatmul.bf16.gmra.mxu1 %v4264_v23 }
 0x1e2   : > { %2101 = vmatmul.bf16.gmra.mxu2 %v4273_v47  ;;  %v1419_v7 = vsel %vm1163_vm14, %v946_v8, %v1291_v24  ;;  %2190 = vmatmul.bf16.gmra.mxu3 %v4276_v58  ;;  %v1420_v37 = vsel %vm1164_vm15, %v1035_v59, %v1292_v20 }
 0x1e3   : > { %v4418_v54 = vpack.c.bf16 %v1419_v7, %v1415_v50  ;;  %v4420_v61 = vpack.c.bf16 %v1420_v37, %v1416_v60 }
 0x1e5   : > { %4993 = vst [vmem:[#allocation63_spill] sm:$0xff] %v4418_v54  ;;  %v2062_v52 = vpop.f32.mrf.mxu2  ;;  %v2151_v11 = vpop.f32.mrf.mxu3 }
 0x1e6   : > { %4994 = vst [vmem:[#allocation64_spill] sm:$0xff] %v4420_v61  ;;  %v2063_v44 = vadd.f32 %v2062_v52, %v1974_v32  ;;  %v1886_v46 = vpop.f32.mrf.mxu0  ;;  %v1975_v9 = vpop.f32.mrf.mxu1 }
 0x1e7   : > { %v1887_v18 = vadd.f32 %v1886_v46, %v4405_v49 }
 0x1e8   : > { %v4423_v56 = vadd.f32 %v2151_v11, %v2063_v44 }
 0x1e9   : > { %v1976_v63 = vadd.f32 %v1975_v9, %v1887_v18 }
 0x1ea   : > { %vm2587_vm15 = vcmp.gt.f32.partialorder %v4423_v56, 0.0 }
 0x1ed   : > { %v2064_v15 = vpop.f32.mrf.mxu2  ;;  %v2153_v8 = vpop.f32.mrf.mxu3 }
 0x1ee   : > { %v2065_v33 = vadd.f32 %v2064_v15, %v1976_v63  ;;  %v1889_v41 = vpop.f32.mrf.mxu0  ;;  %v1978_v48 = vpop.f32.mrf.mxu1 }
 0x1ef   : > { %v1890_v24 = vadd.f32 %v1889_v41, %v4405_v49  ;;  %v3560_v41 = vld [vmem:[#allocation9 + $0x174] sm:$0xf] }
 0x1f0   : > { %v4426_v39 = vadd.f32 %v2153_v8, %v2065_v33  ;;  %1928 = vmatmul.bf16.gmra.mxu0 %v4282_v51 }
 0x1f1   : > { %v1979_v59 = vadd.f32 %v1978_v48, %v1890_v24  ;;  %2017 = vmatmul.bf16.gmra.mxu1 %v4284_v3  ;;  %v3393_v24 = vld [vmem:[#allocation9 + $0x178] sm:$0xf0] }
 0x1f2   : > { %2106 = vmatmul.bf16.gmra.mxu2 %v4293_v16  ;;  %2195 = vmatmul.bf16.gmra.mxu3 %v4296_v34  ;;  %v3396_v48 = vor.u32 %v3560_v41, %v3393_v24  ;;  %vm2589_vm14 = vcmp.gt.f32.partialorder %v4426_v39, 0.0 }
 0x1f4   : > { %2409 = vmatpush.bf16.msra.mxu2 %v3396_v48 }
 0x1f5   : > { %v2067_v20 = vpop.f32.mrf.mxu2  ;;  %v2156_v50 = vpop.f32.mrf.mxu3 }
 0x1f6   : > { %v2068_v32 = vadd.f32 %v2067_v20, %v1979_v59  ;;  %v1891_v7 = vpop.f32.mrf.mxu0  ;;  %v1980_v37 = vpop.f32.mrf.mxu1 }
 0x1f7   : > { %v1892_v60 = vadd.f32 %v1891_v7, %v4405_v49 }
 0x1f8   : > { %v4433_v52 = vadd.f32 %v2156_v50, %v2068_v32 }
 0x1f9   : > { %v1981_v44 = vadd.f32 %v1980_v37, %v1892_v60 }
 0x1fa   : > { %vm2591_vm13 = vcmp.gt.f32.partialorder %v4433_v52, 0.0 }
 0x1fd   : > { %v2069_v11 = vpop.f32.mrf.mxu2  ;;  %v2158_v18 = vpop.f32.mrf.mxu3 }
 0x1fe   : > { %v2070_v46 = vadd.f32 %v2069_v11, %v1981_v44  ;;  %v1894_v9 = vpop.f32.mrf.mxu0  ;;  %v1983_v15 = vpop.f32.mrf.mxu1  ;;  %v3528_v11 = vld [vmem:[#allocation9 + $0x74] sm:$0xf] }
 0x1ff   : > { %v1895_v63 = vadd.f32 %v1894_v9, %v4405_v49  ;;  %v3576_v9 = vld [vmem:[#allocation9 + $0x1f4] sm:$0xf] }
 0x200   : > { %v4436_v33 = vadd.f32 %v2158_v18, %v2070_v46  ;;  %1933 = vmatmul.bf16.gmra.mxu0 %v4302_v6  ;;  %v3265_v46 = vld [vmem:[#allocation9 + $0x78] sm:$0xf0] }
 0x201   : > { %v1984_v8 = vadd.f32 %v1983_v15, %v1895_v63  ;;  %2022 = vmatmul.bf16.gmra.mxu1 %v4304_v28  ;;  %v3268_v18 = vor.u32 %v3528_v11, %v3265_v46  ;;  %v3457_v63 = vld [vmem:[#allocation9 + $0x1f8] sm:$0xf0]  ;;  %v3544_v15 = vld [vmem:[#allocation9 + $0xf4] sm:$0xf] }
 0x202   : > { %2111 = vmatmul.bf16.gmra.mxu2 %v4313_v26  ;;  %2200 = vmatmul.bf16.gmra.mxu3 %v4316_v5  ;;  %v3460_v5 = vor.u32 %v3576_v9, %v3457_v63  ;;  %v3329_v26 = vld [vmem:[#allocation9 + $0xf8] sm:$0xf0]  ;;  %v3564_v28 = vld [vmem:[#allocation9 + $0x194] sm:$0xf]  ;;  %vm2593_vm12 = vcmp.gt.f32.partialorder %v4436_v33, 0.0 }
 0x203   : > { %2231 = vmatpush.bf16.msra.mxu0 %v3268_v18  ;;  %v3409_v6 = vld [vmem:[#allocation9 + $0x198] sm:$0xf0] }
 0x204   : > { %2498 = vmatpush.bf16.msra.mxu3 %v3460_v5 }
 0x205   : > { %v2072_v59 = vpop.f32.mrf.mxu2  ;;  %v2161_v32 = vpop.f32.mrf.mxu3 }
 0x206   : > { %v2073_v20 = vadd.f32 %v2072_v59, %v1984_v8  ;;  %v1896_v50 = vpop.f32.mrf.mxu0  ;;  %v1985_v60 = vpop.f32.mrf.mxu1  ;;  %v3332_v8 = vor.u32 %v3544_v15, %v3329_v26 }
 0x207   : > { %v1897_v7 = vadd.f32 %v1896_v50, %v4405_v49 }
 0x208   : > { %v4443_v37 = vadd.f32 %v2161_v32, %v2073_v20  ;;  %2320 = vmatpush.bf16.msra.mxu1 %v3332_v8 }
 0x209   : > { %v1986_v44 = vadd.f32 %v1985_v60, %v1897_v7 }
 0x20a   : > { %vm2595_vm11 = vcmp.gt.f32.partialorder %v4443_v37, 0.0 }
 0x20d   : > { %v2074_v41 = vpop.f32.mrf.mxu2  ;;  %v2163_v59 = vpop.f32.mrf.mxu3 }
 0x20e   : > { %v2075_v24 = vadd.f32 %v2074_v41, %v1986_v44  ;;  %v1899_v48 = vpop.f32.mrf.mxu0  ;;  %v1988_v20 = vpop.f32.mrf.mxu1 }
 0x20f   : > { %v1900_v50 = vadd.f32 %v1899_v48, %v4405_v49 }
 0x210   : > { %v4446_v32 = vadd.f32 %v2163_v59, %v2075_v24  ;;  %1938 = vmatmul.bf16.gmra.mxu0 %v4322_v45  ;;  %v3441_v45 = vld [vmem:[#allocation9 + $0x1d8] sm:$0xf0] }
 0x211   : > { %v1989_v7 = vadd.f32 %v1988_v20, %v1900_v50  ;;  %2027 = vmatmul.bf16.gmra.mxu1 %v4324_v53  ;;  %v3558_v20 = vld [vmem:[#allocation9 + $0x164] sm:$0xf]  ;;  %v3572_v53 = vld [vmem:[#allocation9 + $0x1d4] sm:$0xf] }
 0x212   : > { %2116 = vmatmul.bf16.gmra.mxu2 %v4333_v42  ;;  %2205 = vmatmul.bf16.gmra.mxu3 %v4336_v31  ;;  %v3377_v42 = vld [vmem:[#allocation9 + $0x158] sm:$0xf0]  ;;  %vm2597_vm10 = vcmp.gt.f32.partialorder %v4446_v32, 0.0 }
 0x215   : > { %v2077_v26 = vpop.f32.mrf.mxu2  ;;  %v2166_v44 = vpop.f32.mrf.mxu3 }
 0x216   : > { %v2078_v60 = vadd.f32 %v2077_v26, %v1989_v7  ;;  %v1901_v11 = vpop.f32.mrf.mxu0  ;;  %v1990_v46 = vpop.f32.mrf.mxu1  ;;  %v3385_v7 = vld [vmem:[#allocation9 + $0x168] sm:$0xf0] }
 0x217   : > { %v1902_v5 = vadd.f32 %v1901_v11, %v4405_v49  ;;  %v3388_v26 = vor.u32 %v3558_v20, %v3385_v7  ;;  %v3257_v11 = vld [vmem:[#allocation9 + $0x68] sm:$0xf0]  ;;  %v3524_v7 = vld [vmem:[#allocation9 + $0x54] sm:$0xf] }
 0x218   : > { %v4453_v18 = vadd.f32 %v2166_v44, %v2078_v60  ;;  %v3526_v44 = vld [vmem:[#allocation9 + $0x64] sm:$0xf] }
 0x219   : > { %v1991_v9 = vadd.f32 %v1990_v46, %v1902_v5  ;;  %v3574_v5 = vld [vmem:[#allocation9 + $0x1e4] sm:$0xf]  ;;  %2410 = vmatpush.bf16.msra.mxu2 %v3388_v26  ;;  %v3313_v26 = vld [vmem:[#allocation9 + $0xd8] sm:$0xf0] }
 0x21a   : > { %vm2599_vm9 = vcmp.gt.f32.partialorder %v4453_v18, 0.0 }
 0x21d   : > { %v2079_v63 = vpop.f32.mrf.mxu2  ;;  %v2168_v41 = vpop.f32.mrf.mxu3 }
 0x21e   : > { %v2080_v15 = vadd.f32 %v2079_v63, %v1991_v9  ;;  %v1904_v8 = vpop.f32.mrf.mxu0  ;;  %v1993_v59 = vpop.f32.mrf.mxu1 }
 0x21f   : > { %v1905_v24 = vadd.f32 %v1904_v8, %v4405_v49  ;;  %v3542_v8 = vld [vmem:[#allocation9 + $0xe4] sm:$0xf] }
 0x220   : > { %v4456_v48 = vadd.f32 %v2168_v41, %v2080_v15  ;;  %1943 = vmatmul.bf16.gmra.mxu0 %v4342_v12  ;;  %v3260_v15 = vor.u32 %v3526_v44, %v3257_v11  ;;  %v3449_v41 = vld [vmem:[#allocation9 + $0x1e8] sm:$0xf0]  ;;  %v3556_v44 = vld [vmem:[#allocation9 + $0x154] sm:$0xf] }
 0x221   : > { %v1994_v50 = vadd.f32 %v1993_v59, %v1905_v24  ;;  %2032 = vmatmul.bf16.gmra.mxu1 %v4344_v55  ;;  %v3321_v24 = vld [vmem:[#allocation9 + $0xe8] sm:$0xf0]  ;;  %v3452_v55 = vor.u32 %v3574_v5, %v3449_v41  ;;  %v3444_v5 = vor.u32 %v3572_v53, %v3441_v45  ;;  %v3570_v45 = vld [vmem:[#allocation9 + $0x1c4] sm:$0xf] }
 0x222   : > { %2121 = vmatmul.bf16.gmra.mxu2 %v4353_v10  ;;  %2210 = vmatmul.bf16.gmra.mxu3 %v4356_v14  ;;  %v3324_v14 = vor.u32 %v3542_v8, %v3321_v24  ;;  %v3305_v24 = vld [vmem:[#allocation9 + $0xc8] sm:$0xf0]  ;;  %vm2601_vm8 = vcmp.gt.f32.partialorder %v4456_v48, 0.0 }
 0x223   : > { %2232 = vmatpush.bf16.msra.mxu0 %v3260_v15  ;;  %2499 = vmatpush.bf16.msra.mxu3 %v3452_v55  ;;  %v3433_v53 = vld [vmem:[#allocation9 + $0x1c8] sm:$0xf0] }
 0x224   : > { %2321 = vmatpush.bf16.msra.mxu1 %v3324_v14 }
 0x225   : > { %v2082_v60 = vpop.f32.mrf.mxu2  ;;  %v2171_v9 = vpop.f32.mrf.mxu3 }
 0x226   : > { %v2083_v46 = vadd.f32 %v2082_v60, %v1994_v50  ;;  %v1906_v63 = vpop.f32.mrf.mxu0  ;;  %v1995_v10 = vpop.f32.mrf.mxu1  ;;  %v3249_v50 = vld [vmem:[#allocation9 + $0x58] sm:$0xf0]  ;;  %v3540_v60 = vld [vmem:[#allocation9 + $0xd4] sm:$0xf] }
 0x227   : > { %v1907_v59 = vadd.f32 %v1906_v63, %v4405_v49  ;;  %v3252_v31 = vor.u32 %v3524_v7, %v3249_v50  ;;  %v3316_v11 = vor.u32 %v3540_v60, %v3313_v26  ;;  %v3380_v63 = vor.u32 %v3556_v44, %v3377_v42  ;;  %2500 = vmatpush.bf16.msra.mxu3 %v3444_v5  ;;  %v3369_v7 = vld [vmem:[#allocation9 + $0x148] sm:$0xf0]  ;;  %v3233_v44 = vld [vmem:[#allocation9 + $0x38] sm:$0xf0] }
 0x228   : > { %v4463_v12 = vadd.f32 %v2171_v9, %v2083_v46  ;;  %v3522_v46 = vld [vmem:[#allocation9 + $0x44] sm:$0xf]  ;;  %v3241_v9 = vld [vmem:[#allocation9 + $0x48] sm:$0xf0]  ;;  %v3436_v26 = vor.u32 %v3570_v45, %v3433_v53  ;;  %v3297_v5 = vld [vmem:[#allocation9 + $0xb8] sm:$0xf0] }
 0x229   : > { %v1996_v20 = vadd.f32 %v1995_v10, %v1907_v59  ;;  %2233 = vmatpush.bf16.msra.mxu0 %v3252_v31  ;;  %2322 = vmatpush.bf16.msra.mxu1 %v3316_v11  ;;  %v3538_v10 = vld [vmem:[#allocation9 + $0xc4] sm:$0xf]  ;;  %v3244_v8 = vor.u32 %v3522_v46, %v3241_v9  ;;  %v3536_v11 = vld [vmem:[#allocation9 + $0xb4] sm:$0xf]  ;;  %v3361_v46 = vld [vmem:[#allocation9 + $0x138] sm:$0xf0] }
 0x22a   : > { %2411 = vmatpush.bf16.msra.mxu2 %v3380_v63  ;;  %v3554_v59 = vld [vmem:[#allocation9 + $0x144] sm:$0xf]  ;;  %v3308_v31 = vor.u32 %v3538_v10, %v3305_v24  ;;  %v3300_v9 = vor.u32 %v3536_v11, %v3297_v5  ;;  %v3353_v11 = vld [vmem:[#allocation9 + $0x128] sm:$0xf0]  ;;  %vm2603_vm7 = vcmp.gt.f32.partialorder %v4463_v12, 0.0 }
 0x22b   : > { %v3372_v42 = vor.u32 %v3554_v59, %v3369_v7  ;;  %2501 = vmatpush.bf16.msra.mxu3 %v3436_v26  ;;  %v3518_v59 = vld [vmem:[#allocation9 + $0x24] sm:$0xf]  ;;  %v3225_v7 = vld [vmem:[#allocation9 + $0x28] sm:$0xf0] }
 0x22d   : > { %v2084_v41 = vpop.f32.mrf.mxu2  ;;  %v2173_v14 = vpop.f32.mrf.mxu3  ;;  %2234 = vmatpush.bf16.msra.mxu0 %v3244_v8  ;;  %2323 = vmatpush.bf16.msra.mxu1 %v3308_v31  ;;  %v3534_v31 = vld [vmem:[#allocation9 + $0xa4] sm:$0xf] }
 0x22e   : > { %v2085_v55 = vadd.f32 %v2084_v41, %v1996_v20  ;;  %v4465_v15 = vpop.f32.mrf.mxu0  ;;  %v4467_v50 = vpop.f32.mrf.mxu1  ;;  %v3520_v20 = vld [vmem:[#allocation9 + $0x34] sm:$0xf]  ;;  %2412 = vmatpush.bf16.msra.mxu2 %v3372_v42  ;;  %v3550_v42 = vld [vmem:[#allocation9 + $0x124] sm:$0xf] }
 0x22f   : > { %v3236_v63 = vor.u32 %v3520_v20, %v3233_v44  ;;  %v3552_v41 = vld [vmem:[#allocation9 + $0x134] sm:$0xf]  ;;  %v3228_v20 = vor.u32 %v3518_v59, %v3225_v7  ;;  %v3289_v44 = vld [vmem:[#allocation9 + $0xa8] sm:$0xf0] }
 0x230   : > { %v4469_v60 = vadd.f32 %v2173_v14, %v2085_v55  ;;  %1948 = vmatmul.bf16.gmra.mxu0 %v4362_v13  ;;  %v3364_v10 = vor.u32 %v3552_v41, %v3361_v46  ;;  %v3568_v55 = vld [vmem:[#allocation9 + $0x1b4] sm:$0xf]  ;;  %v3425_v14 = vld [vmem:[#allocation9 + $0x1b8] sm:$0xf0]  ;;  %v3292_v26 = vor.u32 %v3534_v31, %v3289_v44  ;;  %v3566_v41 = vld [vmem:[#allocation9 + $0x1a4] sm:$0xf]  ;;  %v3412_v31 = vor.u32 %v3564_v28, %v3409_v6 }
 0x231   : > { %2037 = vmatmul.bf16.gmra.mxu1 %v4364_v40  ;;  %2235 = vmatpush.bf16.msra.mxu0 %v3236_v63  ;;  %v3428_v8 = vor.u32 %v3568_v55, %v3425_v14  ;;  %v3356_v63 = vor.u32 %v3550_v42, %v3353_v11  ;;  %v3417_v46 = vld [vmem:[#allocation9 + $0x1a8] sm:$0xf0]  ;;  %v3516_v55 = vld [vmem:[#allocation9 + $0x14] sm:$0xf]  ;;  %v3217_v14 = vld [vmem:[#allocation9 + $0x18] sm:$0xf0] }
 0x232   : > { %2126 = vmatmul.bf16.gmra.mxu2 %v4373_v29  ;;  %2215 = vmatmul.bf16.gmra.mxu3 %v4376_v35  ;;  %v3532_v35 = vld [vmem:[#allocation9 + $0x94] sm:$0xf]  ;;  %v3220_v29 = vor.u32 %v3516_v55, %v3217_v14  ;;  %v3281_v40 = vld [vmem:[#allocation9 + $0x98] sm:$0xf0]  ;;  %v3530_v42 = vld [vmem:[#allocation9 + $0x84] sm:$0xf] }
 0x233   : > { %2324 = vmatpush.bf16.msra.mxu1 %v3300_v9  ;;  %2413 = vmatpush.bf16.msra.mxu2 %v3364_v10  ;;  %v3420_v9 = vor.u32 %v3566_v41, %v3417_v46  ;;  %v3548_v59 = vld [vmem:[#allocation9 + $0x114] sm:$0xf]  ;;  %v3284_v7 = vor.u32 %v3532_v35, %v3281_v40  ;;  %v3345_v13 = vld [vmem:[#allocation9 + $0x118] sm:$0xf0]  ;;  %v3273_v46 = vld [vmem:[#allocation9 + $0x88] sm:$0xf0] }
 0x234   : > { %2502 = vmatpush.bf16.msra.mxu3 %v3428_v8  ;;  %v3348_v10 = vor.u32 %v3548_v59, %v3345_v13  ;;  %v3514_v8 = vld [vmem:[#allocation9 + $0x4] sm:$0xf]  ;;  %v3337_v40 = vld [vmem:[#allocation9 + $0x108] sm:$0xf0]  ;;  %v3276_v55 = vor.u32 %v3530_v42, %v3273_v46  ;;  %vm2605_vm6 = vcmp.gt.f32.partialorder %v4469_v60, 0.0 }
 0x235   : > { %v4475_v24 = vpop.f32.mrf.mxu2  ;;  %v4477_v45 = vpop.f32.mrf.mxu3  ;;  %2236 = vmatpush.bf16.msra.mxu0 %v3228_v20  ;;  %v3209_v20 = vld [vmem:[#allocation9 + $0x8] sm:$0xf0] }
 0x236   : > { %v4479_v53 = vpop.f32.mrf.mxu0  ;;  %v4481_v5 = vpop.f32.mrf.mxu1  ;;  %v3212_v41 = vor.u32 %v3514_v8, %v3209_v20  ;;  %v3401_v13 = vld [vmem:[#allocation9 + $0x188] sm:$0xf0] }
 0x237   : > { %2325 = vmatpush.bf16.msra.mxu1 %v3292_v26  ;;  %2414 = vmatpush.bf16.msra.mxu2 %v3356_v63  ;;  %v3546_v63 = vld [vmem:[#allocation9 + $0x104] sm:$0xf] }
 0x238   : > { %2503 = vmatpush.bf16.msra.mxu3 %v3420_v9  ;;  %v3340_v9 = vor.u32 %v3546_v63, %v3337_v40 }
 0x239   : > { %2237 = vmatpush.bf16.msra.mxu0 %v3220_v29  ;;  %v3562_v29 = vld [vmem:[#allocation9 + $0x184] sm:$0xf] }
 0x23a   : > { %v3404_v6 = vor.u32 %v3562_v29, %v3401_v13 }
 0x23b   : > { %2326 = vmatpush.bf16.msra.mxu1 %v3284_v7  ;;  %2415 = vmatpush.bf16.msra.mxu2 %v3348_v10 }
 0x23c   : > { %2504 = vmatpush.bf16.msra.mxu3 %v3412_v31 }
 0x23d   : > { %v4483_v44 = vpop.f32.mrf.mxu2  ;;  %v4485_v11 = vpop.f32.mrf.mxu3  ;;  %2238 = vmatpush.bf16.msra.mxu0 %v3212_v41 }
 0x23e   : > { %v1914_v26 = vpop.f32.mrf.mxu0  ;;  %v2003_v35 = vpop.f32.mrf.mxu1 }
 0x23f   : > { %2327 = vmatpush.bf16.msra.mxu1 %v3276_v55  ;;  %2416 = vmatpush.bf16.msra.mxu2 %v3340_v9 }
 0x240   : > { %1953 = vmatmul.bf16.gmra.mxu0 %v4382_v62  ;;  %2505 = vmatpush.bf16.msra.mxu3 %v3404_v6 }
 0x241   : > { %2042 = vmatmul.bf16.gmra.mxu1 %v4384_v27 }
 0x242   : > { %2131 = vmatmul.bf16.gmra.mxu2 %v4393_v57  ;;  %2220 = vmatmul.bf16.gmra.mxu3 %v4396_v30 }
 0x245   : > { %v2092_v28 = vpop.f32.mrf.mxu2  ;;  %v2181_v14 = vpop.f32.mrf.mxu3 }
 0x246   : > { %v1916_v59 = vpop.f32.mrf.mxu0  ;;  %v2005_v7 = vpop.f32.mrf.mxu1 }
 0x247   : > { %v1917_v9 = vadd.f32 %v1916_v59, %v4405_v49 }
 0x249   : > { %v2006_v30 = vadd.f32 %v2005_v7, %v1917_v9 }
 0x24d   : > { %v2094_v10 = vpop.f32.mrf.mxu2  ;;  %v2183_v8 = vpop.f32.mrf.mxu3 }
 0x24e   : > { %v1919_v31 = vpop.f32.mrf.mxu0  ;;  %v2008_v20 = vpop.f32.mrf.mxu1  ;;  %v2095_v62 = vadd.f32 %v2094_v10, %v2006_v30 }
 0x24f   : > { %v1920_v41 = vadd.f32 %v1919_v31, %v4405_v49 }
 0x250   : > { %1958 = vmatmul.bf16.gmra.mxu0 %v4407_v36 }
 0x251   : > { %2047 = vmatmul.bf16.gmra.mxu1 %v4409_v17  ;;  %v2009_v29 = vadd.f32 %v2008_v20, %v1920_v41  ;;  %v1915_v17 = vadd.f32 %v1914_v26, %v4405_v49 }
 0x252   : > { %2136 = vmatmul.bf16.gmra.mxu2 %v4418_v54  ;;  %2225 = vmatmul.bf16.gmra.mxu3 %v4420_v61 }
 0x253   : > { %v2004_v20 = vadd.f32 %v2003_v35, %v1915_v17 }
 0x255   : > { %v2097_v42 = vpop.f32.mrf.mxu2  ;;  %v2186_v46 = vpop.f32.mrf.mxu3 }
 0x256   : > { %v1921_v63 = vpop.f32.mrf.mxu0  ;;  %v2010_v40 = vpop.f32.mrf.mxu1  ;;  %v2098_v13 = vadd.f32 %v2097_v42, %v2009_v29 }
 0x257   : > { %v1922_v55 = vadd.f32 %v1921_v63, %v4405_v49  ;;  %v1912_v63 = vadd.f32 %v4479_v53, %v4405_v49 }
 0x258   : > { %v2187_v34 = vadd.f32 %v2186_v46, %v2098_v13 }
 0x259   : > { %v2011_v6 = vadd.f32 %v2010_v40, %v1922_v55 }
 0x25a   : > { %v2679_v30 = vmul.f32 0.2, %v2187_v34  ;;  %vm2615_vm1 = vcmp.gt.f32.partialorder %v2187_v34, 0.0 }
 0x25d   : > { %v2099_v36 = vpop.f32.mrf.mxu2  ;;  %v2188_v57 = vpop.f32.mrf.mxu3 }
 0x25e   : > { %v2100_v54 = vadd.f32 %v2099_v36, %v2011_v6  ;;  %v1924_v61 = vpop.f32.mrf.mxu0  ;;  %v2013_v31 = vpop.f32.mrf.mxu1  ;;  %v2093_v36 = vadd.f32 %v2092_v28, %v2004_v20 }
 0x25f   : > { %v1925_v27 = vadd.f32 %v1924_v61, %v4405_v49  ;;  %v2184_v61 = vadd.f32 %v2183_v8, %v2095_v62 }
 0x260   : > { %v2189_v16 = vadd.f32 %v2188_v57, %v2100_v54  ;;  %2239 = vmatmul.bf16.vlgmr.msra.gmra.mxu0 %v4065_v2  ;;  %v2001_v57 = vadd.f32 %v4481_v5, %v1912_v63  ;;  %v1910_v2 = vadd.f32 %v4465_v15, %v4405_v49  ;;  %v2182_v35 = vadd.f32 %v2181_v14, %v2093_v36 }
 0x261   : > { %v2014_v59 = vadd.f32 %v2013_v31, %v1925_v27  ;;  %2328 = vmatmul.bf16.vlgmr.msra.gmra.mxu1 %v4067_v4  ;;  %v2677_v28 = vmul.f32 0.2, %v2184_v61  ;;  %vm2613_vm2 = vcmp.gt.f32.partialorder %v2184_v61, 0.0 }
 0x262   : > { %v2681_v42 = vmul.f32 0.2, %v2189_v16  ;;  %2417 = vmatmul.bf16.vlgmr.msra.gmra.mxu2 %v4072_v19  ;;  %vm2617_vm0 = vcmp.gt.f32.partialorder %v2189_v16, 0.0  ;;  %2506 = vmatmul.bf16.vlgmr.msra.gmra.mxu3 %v4075_v22  ;;  %v2090_v19 = vadd.f32 %v4483_v44, %v2001_v57  ;;  %v1999_v7 = vadd.f32 %v4467_v50, %v1910_v2 }
 0x263   : > { %v2675_v8 = vmul.f32 0.2, %v2182_v35  ;;  %v2741_v41 = vsel %vm2613_vm2, %v2184_v61, %v2677_v28  ;;  %vm2611_vm3 = vcmp.gt.f32.partialorder %v2182_v35, 0.0  ;;  %v4998_v28 = vld [vmem:[#allocation19_spill] sm:$0xff] }
 0x264   : > { %v2745_v26 = vsel %vm2617_vm0, %v2189_v16, %v2681_v42  ;;  %v2743_v16 = vsel %vm2615_vm1, %v2187_v34, %v2679_v30  ;;  %v2088_v15 = vadd.f32 %v4475_v24, %v1999_v7  ;;  %v2179_v10 = vadd.f32 %v4485_v11, %v2090_v19  ;;  %v4995_v11 = vld [vmem:[#allocation16_spill] sm:$0xff] }
 0x265   : > { %v2102_v54 = vpop.f32.mrf.mxu2  ;;  %2792 = vmatpush.xpose.msrb.mxu0 %v2745_v26  ;;  %v2191_v17 = vpop.f32.mrf.mxu3  ;;  %v2739_v50 = vsel %vm2611_vm3, %v2182_v35, %v2675_v8  ;;  %v2663_v7 = vmul.f32 0.2, %v4453_v18 }
 0x266   : > { %v2103_v27 = vadd.f32 %v2102_v54, %v2014_v59  ;;  %v1926_v4 = vpop.f32.mrf.mxu0  ;;  %v2015_v22 = vpop.f32.mrf.mxu1  ;;  %v2177_v9 = vadd.f32 %v4477_v45, %v2088_v15  ;;  %v2673_v13 = vmul.f32 0.2, %v2179_v10  ;;  %vm2609_vm4 = vcmp.gt.f32.partialorder %v2179_v10, 0.0 }
 0x267   : > { %v1927_v53 = vadd.f32 %v1926_v4, %v4405_v49 }
 0x268   : > { %v4511_v62 = vadd.f32 %v2191_v17, %v2103_v27  ;;  %v2671_v6 = vmul.f32 0.2, %v2177_v9  ;;  %v2737_v31 = vsel %vm2609_vm4, %v2179_v10, %v2673_v13  ;;  %vm2607_vm5 = vcmp.gt.f32.partialorder %v2177_v9, 0.0 }
 0x269   : > { %v2016_v5 = vadd.f32 %v2015_v22, %v1927_v53  ;;  %2793 = vmatpush.xpose.msrb.mxu0 %v2743_v16  ;;  %v2665_v22 = vmul.f32 0.2, %v4456_v48  ;;  %v4997_v16 = vld [vmem:[#allocation18_spill] sm:$0xff] }
 0x26b   : > { %v2729_v15 = vsel %vm2601_vm8, %v4456_v48, %v2665_v22  ;;  %v2659_v48 = vmul.f32 0.2, %v4443_v37 }
 0x26d   : > { %v2104_v44 = vpop.f32.mrf.mxu2  ;;  %2794 = vmatpush.xpose.msrb.mxu0 %v2741_v41  ;;  %v2193_v14 = vpop.f32.mrf.mxu3 }
 0x26e   : > { %v2105_v46 = vadd.f32 %v2104_v44, %v2016_v5  ;;  %v1929_v40 = vpop.f32.mrf.mxu0  ;;  %v2018_v55 = vpop.f32.mrf.mxu1  ;;  %v4999_v5 = vld [vmem:[#allocation20_spill] sm:$0xff] }
 0x26f   : > { %v1930_v34 = vadd.f32 %v1929_v40, %v4405_v49  ;;  %v2727_v40 = vsel %vm2599_vm9, %v4453_v18, %v2663_v7 }
 0x270   : > { %v4518_v29 = vadd.f32 %v2193_v14, %v2105_v46  ;;  %2244 = vmatmul.bf16.gmra.mxu0 %v4082_v38  ;;  %v2735_v38 = vsel %vm2607_vm5, %v2177_v9, %v2671_v6 }
 0x271   : > { %v2019_v24 = vadd.f32 %v2018_v55, %v1930_v34  ;;  %2795 = vmatpush.xpose.msrb.mxu0 %v2739_v50  ;;  %2333 = vmatmul.bf16.gmra.mxu1 %v4085_v43  ;;  %v2669_v43 = vmul.f32 0.2, %v4469_v60  ;;  %v2661_v34 = vmul.f32 0.2, %v4446_v32 }
 0x272   : > { %2422 = vmatmul.bf16.gmra.mxu2 %v4091_v0  ;;  %2511 = vmatmul.bf16.gmra.mxu3 %v4995_v11  ;;  %v2667_v0 = vmul.f32 0.2, %v4463_v12 }
 0x273   : > { %v2733_v26 = vsel %vm2605_vm6, %v4469_v60, %v2669_v43  ;;  %v4996_v60 = vld [vmem:[#allocation17_spill] sm:$0xff]  ;;  %v2725_v9 = vsel %vm2597_vm10, %v4446_v32, %v2661_v34 }
 0x274   : > { %v2731_v53 = vsel %vm2603_vm7, %v4463_v12, %v2667_v0  ;;  %v5000_v32 = vld [vmem:[#allocation21_spill] sm:$0xff] }
 0x275   : > { %v2107_v63 = vpop.f32.mrf.mxu2  ;;  %2796 = vmatpush.xpose.msrb.mxu0 %v2737_v31  ;;  %v2196_v59 = vpop.f32.mrf.mxu3 }
 0x276   : > { %v2108_v45 = vadd.f32 %v2107_v63, %v2019_v24  ;;  %v1931_v20 = vpop.f32.mrf.mxu0  ;;  %v2020_v36 = vpop.f32.mrf.mxu1  ;;  %v2723_v63 = vsel %vm2595_vm11, %v4443_v37, %v2659_v48 }
 0x277   : > { %v1932_v42 = vadd.f32 %v1931_v20, %v4405_v49  ;;  %v5001_v20 = vld [vmem:[#allocation22_spill] sm:$0xff] }
 0x278   : > { %v4525_v61 = vadd.f32 %v2196_v59, %v2108_v45  ;;  %v2657_v45 = vmul.f32 0.2, %v4436_v33 }
 0x279   : > { %v2021_v30 = vadd.f32 %v2020_v36, %v1932_v42  ;;  %2797 = vmatpush.xpose.msrb.mxu0 %v2735_v38  ;;  %v5002_v42 = vld [vmem:[#allocation23_spill] sm:$0xff]  ;;  %v5003_v36 = vld [vmem:[#allocation24_spill] sm:$0xff]  ;;  %v2655_v38 = vmul.f32 0.2, %v4433_v52 }
 0x27a   : > { %v2721_v43 = vsel %vm2593_vm12, %v4436_v33, %v2657_v45  ;;  %v2651_v33 = vmul.f32 0.2, %v4423_v56  ;;  %v5010_v45 = vld [vmem:[#allocation31_spill] sm:$0xff] }
 0x27c   : > { %v2715_v7 = vsel %vm2587_vm15, %v4423_v56, %v2651_v33  ;;  %vm2619_vm15 = vcmp.gt.f32.partialorder %v4511_v62, 0.0 }
 0x27d   : > { %v2109_v57 = vpop.f32.mrf.mxu2  ;;  %2798 = vmatpush.xpose.msrb.mxu0 %v2733_v26  ;;  %v2198_v2 = vpop.f32.mrf.mxu3 }
 0x27e   : > { %v2110_v54 = vadd.f32 %v2109_v57, %v2021_v30  ;;  %v1934_v27 = vpop.f32.mrf.mxu0  ;;  %v2023_v4 = vpop.f32.mrf.mxu1 }
 0x27f   : > { %v1935_v17 = vadd.f32 %v1934_v27, %v4405_v49  ;;  %v2719_v27 = vsel %vm2591_vm13, %v4433_v52, %v2655_v38  ;;  %vm2623_vm13 = vcmp.gt.f32.partialorder %v4525_v61, 0.0 }
 0x280   : > { %v4533_v19 = vadd.f32 %v2198_v2, %v2110_v54  ;;  %2249 = vmatmul.bf16.gmra.mxu0 %v4996_v60 }
 0x281   : > { %v2024_v35 = vadd.f32 %v2023_v4, %v1935_v17  ;;  %2799 = vmatpush.xpose.msrb.mxu0 %v2731_v53  ;;  %2338 = vmatmul.bf16.gmra.mxu1 %v4997_v16  ;;  %v2653_v17 = vmul.f32 0.2, %v4426_v39 }
 0x282   : > { %2427 = vmatmul.bf16.gmra.mxu2 %v4998_v28  ;;  %2516 = vmatmul.bf16.gmra.mxu3 %v4999_v5  ;;  %vm2625_vm12 = vcmp.gt.f32.partialorder %v4533_v19, 0.0 }
 0x283   : > { %v2717_v53 = vsel %vm2589_vm14, %v4426_v39, %v2653_v17  ;;  %v5006_v39 = vld [vmem:[#allocation27_spill] sm:$0xff]  ;;  %vm2621_vm14 = vcmp.gt.f32.partialorder %v4518_v29, 0.0 }
 0x285   : > { %v2112_v10 = vpop.f32.mrf.mxu2  ;;  %2800 = vmatpush.xpose.msrb.mxu0 %v2729_v15  ;;  %v2201_v8 = vpop.f32.mrf.mxu3 }
 0x286   : > { %v2113_v12 = vadd.f32 %v2112_v10, %v2024_v35  ;;  %v1936_v41 = vpop.f32.mrf.mxu0  ;;  %v2025_v46 = vpop.f32.mrf.mxu1  ;;  %v5004_v10 = vld [vmem:[#allocation25_spill] sm:$0xff] }
 0x287   : > { %v1937_v44 = vadd.f32 %v1936_v41, %v4405_v49 }
 0x288   : > { %v4546_v14 = vadd.f32 %v2201_v8, %v2113_v12  ;;  %v5005_v12 = vld [vmem:[#allocation26_spill] sm:$0xff]  ;;  %v5007_v8 = vld [vmem:[#allocation28_spill] sm:$0xff] }
 0x289   : > { %v2026_v55 = vadd.f32 %v2025_v46, %v1937_v44  ;;  %2801 = vmatpush.xpose.msrb.mxu0 %v2727_v40 }
 0x28a   : > { %vm2627_vm11 = vcmp.gt.f32.partialorder %v4546_v14, 0.0 }
 0x28d   : > { %v2114_v50 = vpop.f32.mrf.mxu2  ;;  %2802 = vmatpush.xpose.msrb.mxu0 %v2725_v9  ;;  %v2203_v24 = vpop.f32.mrf.mxu3 }
 0x28e   : > { %v2115_v13 = vadd.f32 %v2114_v50, %v2026_v55  ;;  %v1939_v11 = vpop.f32.mrf.mxu0  ;;  %v2028_v18 = vpop.f32.mrf.mxu1 }
 0x28f   : > { %v1940_v6 = vadd.f32 %v1939_v11, %v4405_v49 }
 0x290   : > { %v4555_v31 = vadd.f32 %v2203_v24, %v2115_v13  ;;  %2254 = vmatmul.bf16.gmra.mxu0 %v5000_v32 }
 0x291   : > { %v2029_v59 = vadd.f32 %v2028_v18, %v1940_v6  ;;  %2803 = vmatpush.xpose.msrb.mxu0 %v2723_v63  ;;  %2343 = vmatmul.bf16.gmra.mxu1 %v5001_v20  ;;  %v5008_v18 = vld [vmem:[#allocation29_spill] sm:$0xff]  ;;  %v5009_v63 = vld [vmem:[#allocation30_spill] sm:$0xff] }
 0x292   : > { %2432 = vmatmul.bf16.gmra.mxu2 %v5002_v42  ;;  %2521 = vmatmul.bf16.gmra.mxu3 %v5003_v36  ;;  %vm2629_vm10 = vcmp.gt.f32.partialorder %v4555_v31, 0.0 }
 0x295   : > { %v2117_v30 = vpop.f32.mrf.mxu2  ;;  %2804 = vmatpush.xpose.msrb.mxu0 %v2721_v43  ;;  %v2206_v0 = vpop.f32.mrf.mxu3 }
 0x296   : > { %v2118_v37 = vadd.f32 %v2117_v30, %v2029_v59  ;;  %v1941_v26 = vpop.f32.mrf.mxu0  ;;  %v2030_v54 = vpop.f32.mrf.mxu1  ;;  %v5011_v59 = vld [vmem:[#allocation32_spill] sm:$0xff] }
 0x297   : > { %v1942_v57 = vadd.f32 %v1941_v26, %v4405_v49  ;;  %v5013_v26 = vld [vmem:[#allocation34_spill] sm:$0xff] }
 0x298   : > { %v4568_v2 = vadd.f32 %v2206_v0, %v2118_v37  ;;  %v5012_v0 = vld [vmem:[#allocation33_spill] sm:$0xff] }
 0x299   : > { %v2031_v4 = vadd.f32 %v2030_v54, %v1942_v57  ;;  %2805 = vmatpush.xpose.msrb.mxu0 %v2719_v27  ;;  %v5014_v57 = vld [vmem:[#allocation35_spill] sm:$0xff]  ;;  %v5015_v54 = vld [vmem:[#allocation36_spill] sm:$0xff] }
 0x29a   : > { %vm2631_vm9 = vcmp.gt.f32.partialorder %v4568_v2, 0.0 }
 0x29d   : > { %v2119_v22 = vpop.f32.mrf.mxu2  ;;  %2806 = vmatpush.xpose.msrb.mxu0 %v2717_v53  ;;  %v2208_v60 = vpop.f32.mrf.mxu3 }
 0x29e   : > { %v2120_v35 = vadd.f32 %v2119_v22, %v2031_v4  ;;  %v1944_v16 = vpop.f32.mrf.mxu0  ;;  %v2033_v52 = vpop.f32.mrf.mxu1 }
 0x29f   : > { %v1945_v28 = vadd.f32 %v1944_v16, %v4405_v49  ;;  %v5016_v16 = vld [vmem:[#allocation37_spill] sm:$0xff] }
 0x2a0   : > { %v4577_v5 = vadd.f32 %v2208_v60, %v2120_v35  ;;  %2259 = vmatmul.bf16.gmra.mxu0 %v5004_v10 }
 0x2a1   : > { %v2034_v15 = vadd.f32 %v2033_v52, %v1945_v28  ;;  %2807 = vmatpush.xpose.msrb.mxu0 %v2715_v7  ;;  %2348 = vmatmul.bf16.gmra.mxu1 %v5005_v12  ;;  %v5017_v28 = vld [vmem:[#allocation38_spill] sm:$0xff] }
 0x2a2   : > { %2437 = vmatmul.bf16.gmra.mxu2 %v5006_v39  ;;  %2526 = vmatmul.bf16.gmra.mxu3 %v5007_v8  ;;  %vm2633_vm8 = vcmp.gt.f32.partialorder %v4577_v5, 0.0 }
 0x2a5   : > { %v2122_v41 = vpop.f32.mrf.mxu2  ;;  %v2211_v46 = vpop.f32.mrf.mxu3 }
 0x2a6   : > { %v2123_v44 = vadd.f32 %v2122_v41, %v2034_v15  ;;  %v1946_v40 = vpop.f32.mrf.mxu0  ;;  %v2035_v55 = vpop.f32.mrf.mxu1 }
 0x2a7   : > { %v1947_v34 = vadd.f32 %v1946_v40, %v4405_v49 }
 0x2a8   : > { %v4585_v48 = vadd.f32 %v2211_v46, %v2123_v44 }
 0x2a9   : > { %v2036_v56 = vadd.f32 %v2035_v55, %v1947_v34 }
 0x2aa   : > { %vm2635_vm7 = vcmp.gt.f32.partialorder %v4585_v48, 0.0 }
 0x2ad   : > { %v2124_v9 = vpop.f32.mrf.mxu2  ;;  %v2213_v13 = vpop.f32.mrf.mxu3 }
 0x2ae   : > { %v2125_v50 = vadd.f32 %v2124_v9, %v2036_v56  ;;  %v4587_v24 = vpop.f32.mrf.mxu0  ;;  %v4589_v11 = vpop.f32.mrf.mxu1 }
 0x2b0   : > { %v4591_v6 = vadd.f32 %v2213_v13, %v2125_v50  ;;  %2264 = vmatmul.bf16.gmra.mxu0 %v5008_v18 }
 0x2b1   : > { %2353 = vmatmul.bf16.gmra.mxu1 %v5009_v63 }
 0x2b2   : > { %2442 = vmatmul.bf16.gmra.mxu2 %v5010_v45  ;;  %2531 = vmatmul.bf16.gmra.mxu3 %v5011_v59  ;;  %vm2637_vm6 = vcmp.gt.f32.partialorder %v4591_v6, 0.0 }
 0x2b5   : > { %v4597_v32 = vpop.f32.mrf.mxu2  ;;  %v4599_v20 = vpop.f32.mrf.mxu3 }
 0x2b6   : > { %v1951_v42 = vpop.f32.mrf.mxu0  ;;  %v2040_v36 = vpop.f32.mrf.mxu1 }
 0x2bd   : > { %v4601_v38 = vpop.f32.mrf.mxu2  ;;  %v4603_v43 = vpop.f32.mrf.mxu3 }
 0x2be   : > { %v1954_v30 = vpop.f32.mrf.mxu0  ;;  %v2043_v37 = vpop.f32.mrf.mxu1 }
 0x2bf   : > { %v1955_v34 = vadd.f32 %v1954_v30, %v4405_v49 }
 0x2c0   : > { %2269 = vmatmul.bf16.gmra.mxu0 %v5012_v0  ;;  %v1952_v0 = vadd.f32 %v1951_v42, %v4405_v49 }
 0x2c1   : > { %2358 = vmatmul.bf16.gmra.mxu1 %v5013_v26 }
 0x2c2   : > { %2447 = vmatmul.bf16.gmra.mxu2 %v5014_v57  ;;  %2536 = vmatmul.bf16.gmra.mxu3 %v5015_v54  ;;  %v2044_v57 = vadd.f32 %v2043_v37, %v1955_v34  ;;  %v2041_v42 = vadd.f32 %v2040_v36, %v1952_v0 }
 0x2c5   : > { %v2132_v27 = vpop.f32.mrf.mxu2  ;;  %v2221_v17 = vpop.f32.mrf.mxu3 }
 0x2c6   : > { %v1956_v4 = vpop.f32.mrf.mxu0  ;;  %v2045_v33 = vpop.f32.mrf.mxu1  ;;  %v2133_v30 = vadd.f32 %v2132_v27, %v2044_v57 }
 0x2c7   : > { %v1957_v8 = vadd.f32 %v1956_v4, %v4405_v49 }
 0x2c9   : > { %v2046_v55 = vadd.f32 %v2045_v33, %v1957_v8 }
 0x2cd   : > { %v2134_v53 = vpop.f32.mrf.mxu2  ;;  %v2223_v22 = vpop.f32.mrf.mxu3 }
 0x2ce   : > { %v1959_v35 = vpop.f32.mrf.mxu0  ;;  %v2048_v60 = vpop.f32.mrf.mxu1  ;;  %v2135_v63 = vadd.f32 %v2134_v53, %v2046_v55 }
 0x2cf   : > { %v1960_v7 = vadd.f32 %v1959_v35, %v4405_v49  ;;  %v1950_v35 = vadd.f32 %v4587_v24, %v4405_v49 }
 0x2d0   : > { %2274 = vmatmul.bf16.gmra.mxu0 %v4242_v1  ;;  %v3663_v1 = vld [vmem:[%s4887_s4] sm:$0x3]  ;;  %v2224_v4 = vadd.f32 %v2223_v22, %v2135_v63 }
 0x2d1   : > { %2363 = vmatmul.bf16.gmra.mxu1 %v4244_v21  ;;  %v2049_v41 = vadd.f32 %v2048_v60, %v1960_v7  ;;  %v4619_v21 = vperm.slane %v3663_v1, 1  ;;  %v2039_v7 = vadd.f32 %v4589_v11, %v1950_v35  ;;  %v2697_v35 = vmul.f32 0.2, %v4577_v5 }
 0x2d2   : > { %2452 = vmatmul.bf16.gmra.mxu2 %v5016_v16  ;;  %2541 = vmatmul.bf16.gmra.mxu3 %v5017_v28  ;;  %vm2645_vm2 = vcmp.gt.f32.partialorder %v2224_v4, 0.0 }
 0x2d3   : > { %v2128_v24 = vadd.f32 %v4597_v32, %v2039_v7 }
 0x2d5   : > { %v2137_v52 = vpop.f32.mrf.mxu2  ;;  %v2226_v15 = vpop.f32.mrf.mxu3 }
 0x2d6   : > { %v1961_v10 = vpop.f32.mrf.mxu0  ;;  %v2050_v12 = vpop.f32.mrf.mxu1  ;;  %v2138_v44 = vadd.f32 %v2137_v52, %v2049_v41  ;;  %v2709_v52 = vmul.f32 0.2, %v2224_v4 }
 0x2d7   : > { %v1962_v39 = vadd.f32 %v1961_v10, %v4405_v49 }
 0x2d8   : > { %v2227_v45 = vadd.f32 %v2226_v15, %v2138_v44  ;;  %v2773_v10 = vsel %vm2645_vm2, %v2224_v4, %v2709_v52 }
 0x2d9   : > { %v2051_v46 = vadd.f32 %v2050_v12, %v1962_v39  ;;  %v2217_v39 = vadd.f32 %v4599_v20, %v2128_v24  ;;  %v2693_v24 = vmul.f32 0.2, %v4555_v31 }
 0x2da   : > { %v2711_v33 = vmul.f32 0.2, %v2227_v45  ;;  %vm2647_vm1 = vcmp.gt.f32.partialorder %v2227_v45, 0.0 }
 0x2db   : > { %v2703_v20 = vmul.f32 0.2, %v2217_v39  ;;  %vm2639_vm5 = vcmp.gt.f32.partialorder %v2217_v39, 0.0 }
 0x2dc   : > { %v2775_v22 = vsel %vm2647_vm1, %v2227_v45, %v2711_v33 }
 0x2dd   : > { %v2139_v40 = vpop.f32.mrf.mxu2  ;;  %v2228_v9 = vpop.f32.mrf.mxu3  ;;  %v2767_v63 = vsel %vm2639_vm5, %v2217_v39, %v2703_v20  ;;  %v2687_v20 = vmul.f32 0.2, %v4525_v61 }
 0x2de   : > { %v2140_v56 = vadd.f32 %v2139_v40, %v2051_v46  ;;  %v2240_v50 = vpop.f32.mrf.mxu0  ;;  %v2329_v18 = vpop.f32.mrf.mxu1  ;;  %v5019_v40 = vld [vmem:[#allocation40_spill] sm:$0xff] }
 0x2df   : > { %v2241_v13 = vadd.f32 %v2240_v50, %v4619_v21 }
 0x2e0   : > { %v2229_v59 = vadd.f32 %v2228_v9, %v2140_v56  ;;  %2279 = vmatmul.bf16.gmra.mxu0 %v4262_v25 }
 0x2e1   : > { %v2330_v26 = vadd.f32 %v2329_v18, %v2241_v13  ;;  %2368 = vmatmul.bf16.gmra.mxu1 %v4264_v23  ;;  %v2130_v23 = vadd.f32 %v4601_v38, %v2041_v42 }
 0x2e2   : > { %v2713_v54 = vmul.f32 0.2, %v2229_v59  ;;  %vm2649_vm0 = vcmp.gt.f32.partialorder %v2229_v59, 0.0  ;;  %2457 = vmatmul.bf16.gmra.mxu2 %v4273_v47  ;;  %2546 = vmatmul.bf16.gmra.mxu3 %v4276_v58  ;;  %v2222_v58 = vadd.f32 %v2221_v17, %v2133_v30 }
 0x2e3   : > { %v2219_v36 = vadd.f32 %v4603_v43, %v2130_v23  ;;  %v5018_v43 = vld [vmem:[#allocation39_spill] sm:$0xff]  ;;  %v2695_v23 = vmul.f32 0.2, %v4568_v2 }
 0x2e4   : > { %v2777_v53 = vsel %vm2649_vm0, %v2229_v59, %v2713_v54  ;;  %v2707_v15 = vmul.f32 0.2, %v2222_v58  ;;  %vm2643_vm3 = vcmp.gt.f32.partialorder %v2222_v58, 0.0  ;;  %v2699_v59 = vmul.f32 0.2, %v4585_v48 }
 0x2e5   : > { %v2418_v60 = vpop.f32.mrf.mxu2  ;;  %2832 = vmatpush.xpose.msrb.mxu2 %v2777_v53  ;;  %v2507_v25 = vpop.f32.mrf.mxu3  ;;  %v2705_v46 = vmul.f32 0.2, %v2219_v36  ;;  %vm2641_vm4 = vcmp.gt.f32.partialorder %v2219_v36, 0.0 }
 0x2e6   : > { %v2419_v37 = vadd.f32 %v2418_v60, %v2330_v26  ;;  %v2242_v16 = vpop.f32.mrf.mxu0  ;;  %v2331_v28 = vpop.f32.mrf.mxu1  ;;  %v2771_v44 = vsel %vm2643_vm3, %v2222_v58, %v2707_v15  ;;  %v2763_v53 = vsel %vm2635_vm7, %v4585_v48, %v2699_v59  ;;  %v5020_v60 = vld [vmem:[#allocation41_spill] sm:$0xff]  ;;  %v2761_v48 = vsel %vm2633_vm8, %v4577_v5, %v2697_v35  ;;  %v5031_v35 = vld [vmem:[#allocation52_spill] sm:$0xff] }
 0x2e7   : > { %v2243_v47 = vadd.f32 %v2242_v16, %v4619_v21  ;;  %v2769_v34 = vsel %vm2641_vm4, %v2219_v36, %v2705_v46  ;;  %v5023_v16 = vld [vmem:[#allocation44_spill] sm:$0xff]  ;;  %v2691_v15 = vmul.f32 0.2, %v4546_v14  ;;  %v5024_v46 = vld [vmem:[#allocation45_spill] sm:$0xff] }
 0x2e8   : > { %v4632_v27 = vadd.f32 %v2507_v25, %v2419_v37  ;;  %v5021_v37 = vld [vmem:[#allocation42_spill] sm:$0xff]  ;;  %v5022_v25 = vld [vmem:[#allocation43_spill] sm:$0xff] }
 0x2e9   : > { %v2332_v49 = vadd.f32 %v2331_v28, %v2243_v47  ;;  %2833 = vmatpush.xpose.msrb.mxu2 %v2775_v22 }
 0x2ed   : > { %v2420_v38 = vpop.f32.mrf.mxu2  ;;  %2834 = vmatpush.xpose.msrb.mxu2 %v2773_v10  ;;  %v2509_v17 = vpop.f32.mrf.mxu3  ;;  %v2757_v10 = vsel %vm2629_vm10, %v4555_v31, %v2693_v24  ;;  %v5035_v24 = vld [vmem:[#allocation56_spill] sm:$0xff] }
 0x2ee   : > { %v2421_v12 = vadd.f32 %v2420_v38, %v2332_v49  ;;  %v2245_v8 = vpop.f32.mrf.mxu0  ;;  %v2334_v41 = vpop.f32.mrf.mxu1  ;;  %v2759_v49 = vsel %vm2631_vm9, %v4568_v2, %v2695_v23 }
 0x2ef   : > { %v2246_v11 = vadd.f32 %v2245_v8, %v4619_v21 }
 0x2f0   : > { %v4638_v1 = vadd.f32 %v2509_v17, %v2421_v12  ;;  %2284 = vmatmul.bf16.gmra.mxu0 %v4282_v51  ;;  %v2701_v51 = vmul.f32 0.2, %v4591_v6 }
 0x2f1   : > { %2835 = vmatpush.xpose.msrb.mxu2 %v2771_v44  ;;  %v2335_v32 = vadd.f32 %v2334_v41, %v2246_v11  ;;  %2373 = vmatmul.bf16.gmra.mxu1 %v4284_v3  ;;  %v2755_v41 = vsel %vm2627_vm11, %v4546_v14, %v2691_v15  ;;  %v2689_v11 = vmul.f32 0.2, %v4533_v19 }
 0x2f2   : > { %2462 = vmatmul.bf16.gmra.mxu2 %v5018_v43  ;;  %2551 = vmatmul.bf16.gmra.mxu3 %v5019_v40  ;;  %v2765_v0 = vsel %vm2637_vm6, %v4591_v6, %v2701_v51  ;;  %v5026_v43 = vld [vmem:[#allocation47_spill] sm:$0xff]  ;;  %v5027_v40 = vld [vmem:[#allocation48_spill] sm:$0xff] }
 0x2f3   : > { %v2753_v14 = vsel %vm2625_vm12, %v4533_v19, %v2689_v11  ;;  %v5038_v11 = vld [vmem:[#allocation59_spill] sm:$0xff] }
 0x2f5   : > { %2836 = vmatpush.xpose.msrb.mxu2 %v2769_v34  ;;  %v2423_v55 = vpop.f32.mrf.mxu2  ;;  %v2512_v56 = vpop.f32.mrf.mxu3 }
 0x2f6   : > { %v2424_v9 = vadd.f32 %v2423_v55, %v2335_v32  ;;  %v2247_v50 = vpop.f32.mrf.mxu0  ;;  %v2336_v13 = vpop.f32.mrf.mxu1  ;;  %v5025_v32 = vld [vmem:[#allocation46_spill] sm:$0xff] }
 0x2f7   : > { %v2248_v18 = vadd.f32 %v2247_v50, %v4619_v21 }
 0x2f8   : > { %v4647_v45 = vadd.f32 %v2512_v56, %v2424_v9 }
 0x2f9   : > { %2837 = vmatpush.xpose.msrb.mxu2 %v2767_v63  ;;  %v2337_v3 = vadd.f32 %v2336_v13, %v2248_v18  ;;  %v2751_v18 = vsel %vm2623_vm13, %v4525_v61, %v2687_v20  ;;  %v2685_v63 = vmul.f32 0.2, %v4518_v29 }
 0x2fa   : > { %vm2592_vm13 = vcmp.gt.f32.partialorder %v4647_v45, 0.0 }
 0x2fb   : > { %v2749_v59 = vsel %vm2621_vm14, %v4518_v29, %v2685_v63  ;;  %v5030_v29 = vld [vmem:[#allocation51_spill] sm:$0xff]  ;;  %vm2590_vm14 = vcmp.gt.f32.partialorder %v4638_v1, 0.0 }
 0x2fd   : > { %2838 = vmatpush.xpose.msrb.mxu2 %v2765_v0  ;;  %v2425_v26 = vpop.f32.mrf.mxu2  ;;  %v2514_v57 = vpop.f32.mrf.mxu3 }
 0x2fe   : > { %v2426_v54 = vadd.f32 %v2425_v26, %v2337_v3  ;;  %v2250_v30 = vpop.f32.mrf.mxu0  ;;  %v2339_v4 = vpop.f32.mrf.mxu1  ;;  %v2683_v3 = vmul.f32 0.2, %v4511_v62 }
 0x2ff   : > { %v2251_v33 = vadd.f32 %v2250_v30, %v4619_v21 }
 0x300   : > { %v4656_v42 = vadd.f32 %v2514_v57, %v2426_v54  ;;  %2289 = vmatmul.bf16.gmra.mxu0 %v5020_v60  ;;  %v2747_v30 = vsel %vm2619_vm15, %v4511_v62, %v2683_v3  ;;  %vm2588_vm15 = vcmp.gt.f32.partialorder %v4632_v27, 0.0 }
 0x301   : > { %2839 = vmatpush.xpose.msrb.mxu2 %v2763_v53  ;;  %v2340_v6 = vadd.f32 %v2339_v4, %v2251_v33  ;;  %2378 = vmatmul.bf16.gmra.mxu1 %v5021_v37  ;;  %v5028_v33 = vld [vmem:[#allocation49_spill] sm:$0xff]  ;;  %v5029_v53 = vld [vmem:[#allocation50_spill] sm:$0xff] }
 0x302   : > { %2467 = vmatmul.bf16.gmra.mxu2 %v5022_v25  ;;  %2556 = vmatmul.bf16.gmra.mxu3 %v5023_v16  ;;  %vm2594_vm12 = vcmp.gt.f32.partialorder %v4656_v42, 0.0 }
 0x305   : > { %2840 = vmatpush.xpose.msrb.mxu2 %v2761_v48  ;;  %v2428_v47 = vpop.f32.mrf.mxu2  ;;  %v2517_v28 = vpop.f32.mrf.mxu3 }
 0x306   : > { %v2429_v58 = vadd.f32 %v2428_v47, %v2340_v6  ;;  %v2252_v22 = vpop.f32.mrf.mxu0  ;;  %v2341_v52 = vpop.f32.mrf.mxu1 }
 0x307   : > { %v2253_v7 = vadd.f32 %v2252_v22, %v4619_v21 }
 0x308   : > { %v4669_v36 = vadd.f32 %v2517_v28, %v2429_v58 }
 0x309   : > { %2841 = vmatpush.xpose.msrb.mxu2 %v2759_v49  ;;  %v2342_v5 = vadd.f32 %v2341_v52, %v2253_v7  ;;  %v5032_v52 = vld [vmem:[#allocation53_spill] sm:$0xff]  ;;  %v5033_v7 = vld [vmem:[#allocation54_spill] sm:$0xff]  ;;  %v5034_v49 = vld [vmem:[#allocation55_spill] sm:$0xff] }
 0x30a   : > { %vm2596_vm11 = vcmp.gt.f32.partialorder %v4669_v36, 0.0 }
 0x30d   : > { %2842 = vmatpush.xpose.msrb.mxu2 %v2757_v10  ;;  %v2430_v38 = vpop.f32.mrf.mxu2  ;;  %v2519_v12 = vpop.f32.mrf.mxu3 }
 0x30e   : > { %v2431_v17 = vadd.f32 %v2430_v38, %v2342_v5  ;;  %v2255_v39 = vpop.f32.mrf.mxu0  ;;  %v2344_v2 = vpop.f32.mrf.mxu1 }
 0x30f   : > { %v2256_v8 = vadd.f32 %v2255_v39, %v4619_v21 }
 0x310   : > { %v4678_v44 = vadd.f32 %v2519_v12, %v2431_v17  ;;  %2294 = vmatmul.bf16.gmra.mxu0 %v5024_v46 }
 0x311   : > { %2843 = vmatpush.xpose.msrb.mxu2 %v2755_v41  ;;  %v2345_v31 = vadd.f32 %v2344_v2, %v2256_v8  ;;  %2383 = vmatmul.bf16.gmra.mxu1 %v5025_v32  ;;  %v5036_v8 = vld [vmem:[#allocation57_spill] sm:$0xff]  ;;  %v5037_v41 = vld [vmem:[#allocation58_spill] sm:$0xff] }
 0x312   : > { %2472 = vmatmul.bf16.gmra.mxu2 %v5026_v43  ;;  %2561 = vmatmul.bf16.gmra.mxu3 %v5027_v40  ;;  %vm2598_vm10 = vcmp.gt.f32.partialorder %v4678_v44, 0.0 }
 0x315   : > { %2844 = vmatpush.xpose.msrb.mxu2 %v2753_v14  ;;  %v2433_v34 = vpop.f32.mrf.mxu2  ;;  %v2522_v55 = vpop.f32.mrf.mxu3 }
 0x316   : > { %v2434_v56 = vadd.f32 %v2433_v34, %v2345_v31  ;;  %v2257_v9 = vpop.f32.mrf.mxu0  ;;  %v2346_v50 = vpop.f32.mrf.mxu1  ;;  %v5039_v31 = vld [vmem:[#allocation60_spill] sm:$0xff] }
 0x317   : > { %v2258_v13 = vadd.f32 %v2257_v9, %v4619_v21  ;;  %v5041_v9 = vld [vmem:[#allocation62_spill] sm:$0xff] }
 0x318   : > { %v4691_v51 = vadd.f32 %v2522_v55, %v2434_v56  ;;  %v5040_v56 = vld [vmem:[#allocation61_spill] sm:$0xff] }
 0x319   : > { %2845 = vmatpush.xpose.msrb.mxu2 %v2751_v18  ;;  %v2347_v19 = vadd.f32 %v2346_v50, %v2258_v13  ;;  %v5042_v50 = vld [vmem:[#allocation63_spill] sm:$0xff]  ;;  %v5043_v13 = vld [vmem:[#allocation64_spill] sm:$0xff] }
 0x31a   : > { %vm2600_vm9 = vcmp.gt.f32.partialorder %v4691_v51, 0.0 }
 0x31d   : > { %2846 = vmatpush.xpose.msrb.mxu2 %v2749_v59  ;;  %v2435_v0 = vpop.f32.mrf.mxu2  ;;  %v2524_v26 = vpop.f32.mrf.mxu3 }
 0x31e   : > { %v2436_v57 = vadd.f32 %v2435_v0, %v2347_v19  ;;  %v4697_v54 = vpop.f32.mrf.mxu0  ;;  %v4699_v61 = vpop.f32.mrf.mxu1 }
 0x320   : > { %v4702_v4 = vadd.f32 %v2524_v26, %v2436_v57  ;;  %2299 = vmatmul.bf16.gmra.mxu0 %v5028_v33 }
 0x321   : > { %2847 = vmatpush.xpose.msrb.mxu2 %v2747_v30  ;;  %2388 = vmatmul.bf16.gmra.mxu1 %v5029_v53 }
 0x322   : > { %2477 = vmatmul.bf16.gmra.mxu2 %v5030_v29  ;;  %2566 = vmatmul.bf16.gmra.mxu3 %v5031_v35  ;;  %vm2602_vm8 = vcmp.gt.f32.partialorder %v4702_v4, 0.0 }
 0x325   : > { %v4708_v6 = vpop.f32.mrf.mxu2  ;;  %v4710_v60 = vpop.f32.mrf.mxu3 }
 0x326   : > { %v2262_v37 = vpop.f32.mrf.mxu0  ;;  %v2351_v25 = vpop.f32.mrf.mxu1 }
 0x327   : > { %v2263_v16 = vadd.f32 %v2262_v37, %v4619_v21 }
 0x329   : > { %v2352_v62 = vadd.f32 %v2351_v25, %v2263_v16 }
 0x32d   : > { %v2440_v23 = vpop.f32.mrf.mxu2  ;;  %v2529_v48 = vpop.f32.mrf.mxu3 }
 0x32e   : > { %v2441_v47 = vadd.f32 %v2440_v23, %v2352_v62  ;;  %v4713_v28 = vpop.f32.mrf.mxu0  ;;  %v4715_v58 = vpop.f32.mrf.mxu1 }
 0x330   : > { %v4717_v22 = vadd.f32 %v2529_v48, %v2441_v47  ;;  %2304 = vmatmul.bf16.gmra.mxu0 %v5032_v52 }
 0x331   : > { %2393 = vmatmul.bf16.gmra.mxu1 %v5033_v7 }
 0x332   : > { %2482 = vmatmul.bf16.gmra.mxu2 %v5034_v49  ;;  %2571 = vmatmul.bf16.gmra.mxu3 %v5035_v24  ;;  %vm2606_vm6 = vcmp.gt.f32.partialorder %v4717_v22, 0.0 }
 0x335   : > { %v4723_v5 = vpop.f32.mrf.mxu2  ;;  %v4725_v15 = vpop.f32.mrf.mxu3 }
 0x336   : > { %v2267_v10 = vpop.f32.mrf.mxu0  ;;  %v2356_v38 = vpop.f32.mrf.mxu1 }
 0x337   : > { %v2268_v7 = vadd.f32 %v2267_v10, %v4619_v21 }
 0x33d   : > { %v2445_v12 = vpop.f32.mrf.mxu2  ;;  %v4727_v17 = vpop.f32.mrf.mxu3 }
 0x33e   : > { %v2270_v39 = vpop.f32.mrf.mxu0  ;;  %v2359_v2 = vpop.f32.mrf.mxu1 }
 0x33f   : > { %v2271_v35 = vadd.f32 %v2270_v39, %v4619_v21  ;;  %v2357_v39 = vadd.f32 %v2356_v38, %v2268_v7 }
 0x340   : > { %2309 = vmatmul.bf16.gmra.mxu0 %v5036_v8 }
 0x341   : > { %2398 = vmatmul.bf16.gmra.mxu1 %v5037_v41  ;;  %v2360_v24 = vadd.f32 %v2359_v2, %v2271_v35  ;;  %v2446_v10 = vadd.f32 %v2445_v12, %v2357_v39 }
 0x342   : > { %2487 = vmatmul.bf16.gmra.mxu2 %v5038_v11  ;;  %2576 = vmatmul.bf16.gmra.mxu3 %v5039_v31 }
 0x345   : > { %v2448_v46 = vpop.f32.mrf.mxu2  ;;  %v2537_v32 = vpop.f32.mrf.mxu3 }
 0x346   : > { %v2272_v43 = vpop.f32.mrf.mxu0  ;;  %v2361_v40 = vpop.f32.mrf.mxu1  ;;  %v2449_v41 = vadd.f32 %v2448_v46, %v2360_v24 }
 0x347   : > { %v2273_v26 = vadd.f32 %v2272_v43, %v4619_v21 }
 0x349   : > { %v2362_v37 = vadd.f32 %v2361_v40, %v2273_v26 }
 0x34d   : > { %v2450_v20 = vpop.f32.mrf.mxu2  ;;  %v2539_v14 = vpop.f32.mrf.mxu3 }
 0x34e   : > { %v2275_v34 = vpop.f32.mrf.mxu0  ;;  %v2364_v55 = vpop.f32.mrf.mxu1  ;;  %v2451_v48 = vadd.f32 %v2450_v20, %v2362_v37  ;;  %v2266_v20 = vadd.f32 %v4713_v28, %v4619_v21  ;;  %v2535_v28 = vadd.f32 %v4727_v17, %v2446_v10 }
 0x34f   : > { %v2276_v19 = vadd.f32 %v2275_v34, %v4619_v21 }
 0x350   : > { %2314 = vmatmul.bf16.gmra.mxu0 %v5040_v56  ;;  %v2540_v11 = vadd.f32 %v2539_v14, %v2451_v48  ;;  %v2355_v38 = vadd.f32 %v4715_v58, %v2266_v20  ;;  %vm2610_vm4 = vcmp.gt.f32.partialorder %v2535_v28, 0.0 }
 0x351   : > { %2403 = vmatmul.bf16.gmra.mxu1 %v5041_v9  ;;  %v2365_v57 = vadd.f32 %v2364_v55, %v2276_v19 }
 0x352   : > { %2492 = vmatmul.bf16.gmra.mxu2 %v5042_v50  ;;  %2581 = vmatmul.bf16.gmra.mxu3 %v5043_v13  ;;  %v2538_v50 = vadd.f32 %v2537_v32, %v2449_v41  ;;  %v2678_v13 = vmul.f32 0.2, %v2540_v11  ;;  %vm2614_vm2 = vcmp.gt.f32.partialorder %v2540_v11, 0.0  ;;  %v2261_v32 = vadd.f32 %v4697_v54, %v4619_v21 }
 0x354   : > { %v2676_v19 = vmul.f32 0.2, %v2538_v50  ;;  %vm2612_vm3 = vcmp.gt.f32.partialorder %v2538_v50, 0.0 }
 0x355   : > { %v2453_v18 = vpop.f32.mrf.mxu2  ;;  %v2542_v63 = vpop.f32.mrf.mxu3 }
 0x356   : > { %v2277_v3 = vpop.f32.mrf.mxu0  ;;  %v2366_v59 = vpop.f32.mrf.mxu1  ;;  %v2454_v30 = vadd.f32 %v2453_v18, %v2365_v57  ;;  %v2740_v17 = vsel %vm2612_vm3, %v2538_v50, %v2676_v19 }
 0x357   : > { %v2278_v0 = vadd.f32 %v2277_v3, %v4619_v21  ;;  %v2742_v3 = vsel %vm2614_vm2, %v2540_v11, %v2678_v13 }
 0x358   : > { %v2543_v47 = vadd.f32 %v2542_v63, %v2454_v30  ;;  %v2444_v63 = vadd.f32 %v4723_v5, %v2355_v38  ;;  %v2662_v38 = vmul.f32 0.2, %v4678_v44 }
 0x359   : > { %v2367_v33 = vadd.f32 %v2366_v59, %v2278_v0 }
 0x35a   : > { %v2680_v31 = vmul.f32 0.2, %v2543_v47  ;;  %vm2616_vm1 = vcmp.gt.f32.partialorder %v2543_v47, 0.0  ;;  %v2533_v58 = vadd.f32 %v4725_v15, %v2444_v63 }
 0x35c   : > { %v2744_v14 = vsel %vm2616_vm1, %v2543_v47, %v2680_v31  ;;  %v2672_v37 = vmul.f32 0.2, %v2533_v58  ;;  %vm2608_vm5 = vcmp.gt.f32.partialorder %v2533_v58, 0.0 }
 0x35d   : > { %v2455_v53 = vpop.f32.mrf.mxu2  ;;  %v2544_v29 = vpop.f32.mrf.mxu3 }
 0x35e   : > { %v2456_v25 = vadd.f32 %v2455_v53, %v2367_v33  ;;  %v2280_v16 = vpop.f32.mrf.mxu0  ;;  %v2369_v62 = vpop.f32.mrf.mxu1  ;;  %v2674_v33 = vmul.f32 0.2, %v2535_v28 }
 0x35f   : > { %v2281_v23 = vadd.f32 %v2280_v16, %v4619_v21 }
 0x360   : > { %v2545_v52 = vadd.f32 %v2544_v29, %v2456_v25  ;;  %v2350_v29 = vadd.f32 %v4699_v61, %v2261_v32  ;;  %v2738_v54 = vsel %vm2610_vm4, %v2535_v28, %v2674_v33  ;;  %v2736_v61 = vsel %vm2608_vm5, %v2533_v58, %v2672_v37 }
 0x361   : > { %v2370_v49 = vadd.f32 %v2369_v62, %v2281_v23  ;;  %v2726_v28 = vsel %vm2598_vm10, %v4678_v44, %v2662_v38  ;;  %v2656_v44 = vmul.f32 0.2, %v4647_v45 }
 0x362   : > { %vm2618_vm0 = vcmp.gt.f32.partialorder %v2545_v52, 0.0  ;;  %v2682_v8 = vmul.f32 0.2, %v2545_v52  ;;  %v2439_v35 = vadd.f32 %v4708_v6, %v2350_v29 }
 0x364   : > { %v2746_v43 = vsel %vm2618_vm0, %v2545_v52, %v2682_v8  ;;  %v2528_v47 = vadd.f32 %v4710_v60, %v2439_v35  ;;  %v2670_v52 = vmul.f32 0.2, %v4717_v22 }
 0x365   : > { %v2458_v40 = vpop.f32.mrf.mxu2  ;;  %v2547_v34 = vpop.f32.mrf.mxu3  ;;  %2812 = vmatpush.xpose.msrb.mxu1 %v2746_v43 }
 0x366   : > { %v2459_v55 = vadd.f32 %v2458_v40, %v2370_v49  ;;  %v2282_v56 = vpop.f32.mrf.mxu0  ;;  %v2371_v9 = vpop.f32.mrf.mxu1  ;;  %v2734_v6 = vsel %vm2606_vm6, %v4717_v22, %v2670_v52  ;;  %v2668_v24 = vmul.f32 0.2, %v2528_v47  ;;  %vm2604_vm7 = vcmp.gt.f32.partialorder %v2528_v47, 0.0 }
 0x367   : > { %v2283_v2 = vadd.f32 %v2282_v56, %v4619_v21  ;;  %v2664_v22 = vmul.f32 0.2, %v4691_v51 }
 0x368   : > { %v4746_v46 = vadd.f32 %v2547_v34, %v2459_v55  ;;  %v2732_v40 = vsel %vm2604_vm7, %v2528_v47, %v2668_v24  ;;  %v2666_v34 = vmul.f32 0.2, %v4702_v4 }
 0x369   : > { %v2372_v18 = vadd.f32 %v2371_v9, %v2283_v2  ;;  %2813 = vmatpush.xpose.msrb.mxu1 %v2744_v14 }
 0x36a   : > { %v2730_v55 = vsel %vm2602_vm8, %v4702_v4, %v2666_v34  ;;  %v2660_v4 = vmul.f32 0.2, %v4669_v36 }
 0x36d   : > { %v2460_v59 = vpop.f32.mrf.mxu2  ;;  %v2549_v12 = vpop.f32.mrf.mxu3  ;;  %2814 = vmatpush.xpose.msrb.mxu1 %v2742_v3 }
 0x36e   : > { %v2461_v0 = vadd.f32 %v2460_v59, %v2372_v18  ;;  %v2285_v26 = vpop.f32.mrf.mxu0  ;;  %v2374_v57 = vpop.f32.mrf.mxu1  ;;  %v2728_v18 = vsel %vm2600_vm9, %v4691_v51, %v2664_v22 }
 0x36f   : > { %v2286_v30 = vadd.f32 %v2285_v26, %v4619_v21  ;;  %v2724_v26 = vsel %vm2596_vm11, %v4669_v36, %v2660_v4 }
 0x370   : > { %v4755_v5 = vadd.f32 %v2549_v12, %v2461_v0 }
 0x371   : > { %v2375_v53 = vadd.f32 %v2374_v57, %v2286_v30  ;;  %2815 = vmatpush.xpose.msrb.mxu1 %v2740_v17  ;;  %v2658_v57 = vmul.f32 0.2, %v4656_v42 }
 0x373   : > { %v2722_v58 = vsel %vm2594_vm12, %v4656_v42, %v2658_v57  ;;  %v2652_v42 = vmul.f32 0.2, %v4632_v27 }
 0x375   : > { %v2463_v25 = vpop.f32.mrf.mxu2  ;;  %v2552_v16 = vpop.f32.mrf.mxu3  ;;  %2816 = vmatpush.xpose.msrb.mxu1 %v2738_v54  ;;  %v2720_v54 = vsel %vm2592_vm13, %v4647_v45, %v2656_v44 }
 0x376   : > { %v2464_v62 = vadd.f32 %v2463_v25, %v2375_v53  ;;  %v2287_v23 = vpop.f32.mrf.mxu0  ;;  %v2376_v15 = vpop.f32.mrf.mxu1  ;;  %v2654_v25 = vmul.f32 0.2, %v4638_v1 }
 0x377   : > { %v2288_v48 = vadd.f32 %v2287_v23, %v4619_v21 }
 0x378   : > { %v4762_v7 = vadd.f32 %v2552_v16, %v2464_v62  ;;  %v2718_v62 = vsel %vm2590_vm14, %v4638_v1, %v2654_v25  ;;  %vm2622_vm14 = vcmp.gt.f32.partialorder %v4755_v5, 0.0 }
 0x379   : > { %v2377_v49 = vadd.f32 %v2376_v15, %v2288_v48  ;;  %2817 = vmatpush.xpose.msrb.mxu1 %v2736_v61 }
 0x37a   : > { %vm2624_vm13 = vcmp.gt.f32.partialorder %v4762_v7, 0.0 }
 0x37d   : > { %v2465_v8 = vpop.f32.mrf.mxu2  ;;  %v2554_v41 = vpop.f32.mrf.mxu3  ;;  %2818 = vmatpush.xpose.msrb.mxu1 %v2734_v6 }
 0x37e   : > { %v2466_v11 = vadd.f32 %v2465_v8, %v2377_v49  ;;  %v2290_v31 = vpop.f32.mrf.mxu0  ;;  %v2379_v43 = vpop.f32.mrf.mxu1  ;;  %v2716_v49 = vsel %vm2588_vm15, %v4632_v27, %v2652_v42  ;;  %vm2620_vm15 = vcmp.gt.f32.partialorder %v4746_v46, 0.0 }
 0x37f   : > { %v2291_v60 = vadd.f32 %v2290_v31, %v4619_v21 }
 0x380   : > { %v4767_v39 = vadd.f32 %v2554_v41, %v2466_v11 }
 0x381   : > { %v2380_v20 = vadd.f32 %v2379_v43, %v2291_v60  ;;  %2819 = vmatpush.xpose.msrb.mxu1 %v2732_v40 }
 0x382   : > { %vm2626_vm12 = vcmp.gt.f32.partialorder %v4767_v39, 0.0 }
 0x385   : > { %v2468_v56 = vpop.f32.mrf.mxu2  ;;  %v2557_v9 = vpop.f32.mrf.mxu3  ;;  %2820 = vmatpush.xpose.msrb.mxu1 %v2730_v55 }
 0x386   : > { %v2469_v10 = vadd.f32 %v2468_v56, %v2380_v20  ;;  %v2292_v2 = vpop.f32.mrf.mxu0  ;;  %v2381_v50 = vpop.f32.mrf.mxu1 }
 0x387   : > { %v2293_v13 = vadd.f32 %v2292_v2, %v4619_v21 }
 0x388   : > { %v4775_v14 = vadd.f32 %v2557_v9, %v2469_v10 }
 0x389   : > { %v2382_v63 = vadd.f32 %v2381_v50, %v2293_v13  ;;  %2821 = vmatpush.xpose.msrb.mxu1 %v2728_v18 }
 0x38a   : > { %vm2628_vm11 = vcmp.gt.f32.partialorder %v4775_v14, 0.0 }
 0x38d   : > { %v2470_v19 = vpop.f32.mrf.mxu2  ;;  %v2559_v3 = vpop.f32.mrf.mxu3  ;;  %2822 = vmatpush.xpose.msrb.mxu1 %v2726_v28 }
 0x38e   : > { %v2471_v59 = vadd.f32 %v2470_v19, %v2382_v63  ;;  %v2295_v12 = vpop.f32.mrf.mxu0  ;;  %v2384_v32 = vpop.f32.mrf.mxu1 }
 0x38f   : > { %v2296_v51 = vadd.f32 %v2295_v12, %v4619_v21 }
 0x390   : > { %v4784_v0 = vadd.f32 %v2559_v3, %v2471_v59 }
 0x391   : > { %v2385_v30 = vadd.f32 %v2384_v32, %v2296_v51  ;;  %2823 = vmatpush.xpose.msrb.mxu1 %v2724_v26 }
 0x392   : > { %vm2630_vm10 = vcmp.gt.f32.partialorder %v4784_v0, 0.0 }
 0x395   : > { %v2473_v33 = vpop.f32.mrf.mxu2  ;;  %v2562_v17 = vpop.f32.mrf.mxu3  ;;  %2824 = vmatpush.xpose.msrb.mxu1 %v2722_v58 }
 0x396   : > { %v2474_v53 = vadd.f32 %v2473_v33, %v2385_v30  ;;  %v2297_v29 = vpop.f32.mrf.mxu0  ;;  %v2386_v35 = vpop.f32.mrf.mxu1 }
 0x397   : > { %v2298_v36 = vadd.f32 %v2297_v29, %v4619_v21 }
 0x398   : > { %v4793_v37 = vadd.f32 %v2562_v17, %v2474_v53 }
 0x399   : > { %v2387_v16 = vadd.f32 %v2386_v35, %v2298_v36  ;;  %2825 = vmatpush.xpose.msrb.mxu1 %v2720_v54 }
 0x39a   : > { %vm2632_vm9 = vcmp.gt.f32.partialorder %v4793_v37, 0.0 }
 0x39d   : > { %v2475_v23 = vpop.f32.mrf.mxu2  ;;  %v2564_v15 = vpop.f32.mrf.mxu3  ;;  %2826 = vmatpush.xpose.msrb.mxu1 %v2718_v62 }
 0x39e   : > { %v2476_v48 = vadd.f32 %v2475_v23, %v2387_v16  ;;  %v2300_v47 = vpop.f32.mrf.mxu0  ;;  %v2389_v52 = vpop.f32.mrf.mxu1 }
 0x39f   : > { %v2301_v45 = vadd.f32 %v2300_v47, %v4619_v21 }
 0x3a0   : > { %v4802_v61 = vadd.f32 %v2564_v15, %v2476_v48 }
 0x3a1   : > { %v2390_v6 = vadd.f32 %v2389_v52, %v2301_v45  ;;  %2827 = vmatpush.xpose.msrb.mxu1 %v2716_v49 }
 0x3a2   : > { %vm2634_vm8 = vcmp.gt.f32.partialorder %v4802_v61, 0.0 }
 0x3a5   : > { %v2478_v24 = vpop.f32.mrf.mxu2  ;;  %v2567_v8 = vpop.f32.mrf.mxu3 }
 0x3a6   : > { %v2479_v41 = vadd.f32 %v2478_v24, %v2390_v6  ;;  %v2302_v1 = vpop.f32.mrf.mxu0  ;;  %v2391_v11 = vpop.f32.mrf.mxu1 }
 0x3a7   : > { %v2303_v31 = vadd.f32 %v2302_v1, %v4619_v21 }
 0x3a8   : > { %v4806_v43 = vadd.f32 %v2567_v8, %v2479_v41 }
 0x3a9   : > { %v2392_v60 = vadd.f32 %v2391_v11, %v2303_v31 }
 0x3aa   : > { %vm2636_vm7 = vcmp.gt.f32.partialorder %v4806_v43, 0.0 }
 0x3ad   : > { %v2480_v40 = vpop.f32.mrf.mxu2  ;;  %v2569_v34 = vpop.f32.mrf.mxu3 }
 0x3ae   : > { %v2481_v20 = vadd.f32 %v2480_v40, %v2392_v60  ;;  %v2305_v22 = vpop.f32.mrf.mxu0  ;;  %v2394_v55 = vpop.f32.mrf.mxu1 }
 0x3af   : > { %v2306_v24 = vadd.f32 %v2305_v22, %v4619_v21 }
 0x3b0   : > { %v4808_v56 = vadd.f32 %v2569_v34, %v2481_v20 }
 0x3b1   : > { %v2395_v60 = vadd.f32 %v2394_v55, %v2306_v24  ;;  %v2700_v55 = vmul.f32 0.2, %v4806_v43 }
 0x3b2   : > { %vm2638_vm6 = vcmp.gt.f32.partialorder %v4808_v56, 0.0 }
 0x3b5   : > { %v2483_v27 = vpop.f32.mrf.mxu2  ;;  %v2572_v9 = vpop.f32.mrf.mxu3 }
 0x3b6   : > { %v2307_v10 = vpop.f32.mrf.mxu0  ;;  %v2396_v2 = vpop.f32.mrf.mxu1  ;;  %v2484_v40 = vadd.f32 %v2483_v27, %v2395_v60 }
 0x3b7   : > { %v2308_v15 = vadd.f32 %v2307_v10, %v4619_v21 }
 0x3b9   : > { %v2397_v8 = vadd.f32 %v2396_v2, %v2308_v15  ;;  %v2702_v2 = vmul.f32 0.2, %v4808_v56 }
 0x3bb   : > { %v2766_v27 = vsel %vm2638_vm6, %v4808_v56, %v2702_v2  ;;  %v2696_v56 = vmul.f32 0.2, %v4793_v37 }
 0x3bd   : > { %v2485_v50 = vpop.f32.mrf.mxu2  ;;  %v2574_v13 = vpop.f32.mrf.mxu3 }
 0x3be   : > { %v2310_v18 = vpop.f32.mrf.mxu0  ;;  %v2399_v38 = vpop.f32.mrf.mxu1  ;;  %v2486_v41 = vadd.f32 %v2485_v50, %v2397_v8 }
 0x3bf   : > { %v2311_v36 = vadd.f32 %v2310_v18, %v4619_v21  ;;  %v2573_v18 = vadd.f32 %v2572_v9, %v2484_v40  ;;  %v2698_v9 = vmul.f32 0.2, %v4802_v61 }
 0x3c0   : > { %v2575_v34 = vadd.f32 %v2574_v13, %v2486_v41  ;;  %v2764_v13 = vsel %vm2636_vm7, %v4806_v43, %v2700_v55  ;;  %v3869_v43 = vmov 0  }
 0x3c1   : > { %v2400_v48 = vadd.f32 %v2399_v38, %v2311_v36  ;;  %vm2640_vm5 = vcmp.gt.f32.partialorder %v2573_v18, 0.0  ;;  %3662 = vset.pattern.permute.xlu0 %v3869_v43 }
 0x3c2   : > { %v2706_v38 = vmul.f32 0.2, %v2575_v34  ;;  %vm2642_vm4 = vcmp.gt.f32.partialorder %v2575_v34, 0.0 }
 0x3c4   : > { %v2770_v22 = vsel %vm2642_vm4, %v2575_v34, %v2706_v38 }
 0x3c5   : > { %v2488_v63 = vpop.f32.mrf.mxu2  ;;  %v2577_v4 = vpop.f32.mrf.mxu3 }
 0x3c6   : > { %v2312_v28 = vpop.f32.mrf.mxu0  ;;  %v2401_v19 = vpop.f32.mrf.mxu1  ;;  %v2489_v52 = vadd.f32 %v2488_v63, %v2400_v48 }
 0x3c7   : > { %v2313_v58 = vadd.f32 %v2312_v28, %v4619_v21 }
 0x3c8   : > { %v2578_v1 = vadd.f32 %v2577_v4, %v2489_v52  ;;  %v2779_v4 = vld [vmem:[%s4888_s5] sm:$0x3] }
 0x3c9   : > { %v2402_v54 = vadd.f32 %v2401_v19, %v2313_v58  ;;  %v2788_v28 = vperm.slane %v2779_v4, 0  ;;  %v2789_v19 = vperm.slane %v2779_v4, 1 }
 0x3ca   : > { %v2708_v20 = vmul.f32 0.2, %v2578_v1  ;;  %vm2644_vm3 = vcmp.gt.f32.partialorder %v2578_v1, 0.0 }
 0x3cb   : > { %2848 = vmatmul.f32.vlgmr.msrb.gmra.mxu2 %v2788_v28  ;;  %2808 = vmatmul.f32.vlgmr.msrb.gmra.mxu0 %v2788_v28 }
 0x3cc   : > { %v2772_v63 = vsel %vm2644_vm3, %v2578_v1, %v2708_v20  ;;  %2828 = vmatmul.f32.vlgmr.msrb.gmra.mxu1 %v2789_v19 }
 0x3cd   : > { %v2490_v3 = vpop.f32.mrf.mxu2  ;;  %v2579_v59 = vpop.f32.mrf.mxu3 }
 0x3ce   : > { %v2315_v12 = vpop.f32.mrf.mxu0  ;;  %v2404_v32 = vpop.f32.mrf.mxu1  ;;  %v2491_v42 = vadd.f32 %v2490_v3, %v2402_v54  ;;  %v2762_v3 = vsel %vm2634_vm8, %v4802_v61, %v2698_v9  ;;  %v2690_v61 = vmul.f32 0.2, %v4767_v39 }
 0x3cf   : > { %v2316_v57 = vadd.f32 %v2315_v12, %v4619_v21  ;;  %v2694_v12 = vmul.f32 0.2, %v4784_v0 }
 0x3d0   : > { %v2580_v45 = vadd.f32 %v2579_v59, %v2491_v42  ;;  %v2780_v59 = vld [vmem:[#allocation2] sm:$0x1] }
 0x3d1   : > { %v2405_v33 = vadd.f32 %v2404_v32, %v2316_v57  ;;  %2783 = vperm.xlu0 %3662, %v2780_v59   ;;  %v2760_v32 = vsel %vm2632_vm9, %v4793_v37, %v2696_v56  ;;  %v2754_v37 = vsel %vm2626_vm12, %v4767_v39, %v2690_v61 }
 0x3d2   : > { %v2710_v11 = vmul.f32 0.2, %v2580_v45  ;;  %vm2646_vm2 = vcmp.gt.f32.partialorder %v2580_v45, 0.0 }
 0x3d4   : > { %v2774_v10 = vsel %vm2646_vm2, %v2580_v45, %v2710_v11 }
 0x3d5   : > { %v2493_v51 = vpop.f32.mrf.mxu2  ;;  %v2582_v26 = vpop.f32.mrf.mxu3 }
 0x3d6   : > { %v2317_v30 = vpop.f32.mrf.mxu0  ;;  %v2406_v17 = vpop.f32.mrf.mxu1  ;;  %v2494_v53 = vadd.f32 %v2493_v51, %v2405_v33  ;;  %v2692_v51 = vmul.f32 0.2, %v4775_v14 }
 0x3d7   : > { %v2318_v44 = vadd.f32 %v2317_v30, %v4619_v21  ;;  %v2704_v21 = vmul.f32 0.2, %v2573_v18  ;;  %v2688_v30 = vmul.f32 0.2, %v4762_v7 }
 0x3d8   : > { %v2583_v62 = vadd.f32 %v2582_v26, %v2494_v53  ;;  %v2758_v26 = vsel %vm2630_vm10, %v4784_v0, %v2694_v12  ;;  %v2756_v57 = vsel %vm2628_vm11, %v4775_v14, %v2692_v51  ;;  %v2686_v0 = vmul.f32 0.2, %v4755_v5 }
 0x3d9   : > { %v2407_v29 = vadd.f32 %v2406_v17, %v2318_v44  ;;  %v2768_v50 = vsel %vm2640_vm5, %v2573_v18, %v2704_v21  ;;  %v2752_v44 = vsel %vm2624_vm13, %v4762_v7, %v2688_v30  ;;  %v2684_v14 = vmul.f32 0.2, %v4746_v46 }
 0x3da   : > { %v2712_v49 = vmul.f32 0.2, %v2583_v62  ;;  %vm2648_vm1 = vcmp.gt.f32.partialorder %v2583_v62, 0.0  ;;  %v2750_v58 = vsel %vm2622_vm14, %v4755_v5, %v2686_v0  ;;  %v2878_v5 = vlaneseq }
 0x3db   : > { %v2748_v39 = vsel %vm2620_vm15, %v4746_v46, %v2684_v14 }
 0x3dc   : > { %v2776_v31 = vsel %vm2648_vm1, %v2583_v62, %v2712_v49  ;;  %vm2880_vm1 = vcmp.lt.s32.totalorder %v2878_v5, 256 }
 0x3dd   : > { %v2495_v35 = vpop.f32.mrf.mxu2  ;;  %v2584_v16 = vpop.f32.mrf.mxu3 }
 0x3de   : > { %v2496_v25 = vadd.f32 %v2495_v35, %v2407_v29 }
 0x3e0   : > { %v2585_v23 = vadd.f32 %v2584_v16, %v2496_v25 }
 0x3e2   : > { %vm2650_vm0 = vcmp.gt.f32.partialorder %v2585_v23, 0.0  ;;  %v2714_v47 = vmul.f32 0.2, %v2585_v23 }
 0x3e4   : > { %v2778_v6 = vsel %vm2650_vm0, %v2585_v23, %v2714_v47  ;;  %vm2875_vm0 = vcmask 1040384  }
 0x3e5   : > { %2852 = vmatpush.xpose.msrb.mxu3 %v2778_v6 }
 0x3e9   : > { %2853 = vmatpush.xpose.msrb.mxu3 %v2776_v31 }
 0x3ed   : > { %2854 = vmatpush.xpose.msrb.mxu3 %v2774_v10 }
 0x3f1   : > { %2855 = vmatpush.xpose.msrb.mxu3 %v2772_v63 }
 0x3f5   : > { %2856 = vmatpush.xpose.msrb.mxu3 %v2770_v22 }
 0x3f9   : > { %2857 = vmatpush.xpose.msrb.mxu3 %v2768_v50 }
 0x3fd   : > { %2858 = vmatpush.xpose.msrb.mxu3 %v2766_v27 }
 0x401   : > { %2859 = vmatpush.xpose.msrb.mxu3 %v2764_v13 }
 0x405   : > { %2860 = vmatpush.xpose.msrb.mxu3 %v2762_v3 }
 0x409   : > { %2861 = vmatpush.xpose.msrb.mxu3 %v2760_v32 }
 0x40d   : > { %2862 = vmatpush.xpose.msrb.mxu3 %v2758_v26 }
 0x411   : > { %2863 = vmatpush.xpose.msrb.mxu3 %v2756_v57 }
 0x415   : > { %2864 = vmatpush.xpose.msrb.mxu3 %v2754_v37 }
 0x419   : > { %2865 = vmatpush.xpose.msrb.mxu3 %v2752_v44 }
 0x41d   : > { %2866 = vmatpush.xpose.msrb.mxu3 %v2750_v58 }
 0x421   : > { %2867 = vmatpush.xpose.msrb.mxu3 %v2748_v39 }
 0x424   : > { %2868 = vmatmul.f32.vlgmr.msrb.gmra.mxu3 %v2789_v19 }
 0x443   : > { %v2784_v33 = vpop.permute.xlu0 %2783 }
 0x444   : > { %v2786_v17 = vperm.slane %v2784_v33, 0 }
 0x448   : > { %v2809_v7 = vpop.f32.mrf.mxu0 }
 0x449   : > { %v2810_v35 = vadd.f32 %v2809_v7, %v2786_v17  ;;  %v2829_v54 = vpop.f32.mrf.mxu1 }
 0x44b   : > { %v2830_v16 = vadd.f32 %v2829_v54, %v2810_v35 }
 0x44e   : > { %v2849_v53 = vpop.f32.mrf.mxu2 }
 0x44f   : > { %v2850_v29 = vadd.f32 %v2849_v53, %v2786_v17 }
 0x4a7   : > { %v2869_v36 = vpop.f32.mrf.mxu3 }
 0x4a8   : > { %v2870_v25 = vadd.f32 %v2869_v36, %v2850_v29 }
 0x4aa   : > { %v2874_v46 = vrot.slane %v2870_v25, 7 }
 0x4ac   : > { %v2876_v42 = vsel %vm2875_vm0, %v2830_v16, %v2874_v46 }
 0x4ad   : > { %2882 = vst.msk [vmem:[%s348_s22] sm:$0x3] %vm2880_vm1, %v2876_v42 }
 0x4ae   : > { %3811 = shalt.err (!%p3808_p10)
}
 0x4af   : > { %3592 = dma.vmem_to_hbm [thread:$0]  (%p3996_p7), %s2897_s17, 32, %s2899_s18, %s2884_s6  }
 0x4b0 PF: > { %s2910_s21 = sand.u32 1, %s3846_s26   ;;  %p5044_p12 = scmp.ge.s32.totalorder %s3858_s29, 2 }
 0x4b1   : > { %s2911_s24 = scalar_lea.sflag [#allocation5], %s2910_s21 }
 0x4b2   : > { %p3609_p13 = pnand %p5044_p12, %p3948_p6 }
 0x4b4   : > { %p3610_p0 = pneg %p3609_p13 }
 0x4b6   : > { %3841 = dma.done.wait (%p3610_p0), %s2911_s24, 32  }
 0x4b7   : > { %3843 = vsyncadd (%p3610_p0), %s2911_s24, 4294967264  ;;  %p24_p3 = scmp.ge.s32.totalorder %s3982_s15, 4   ;;  %s5045_s26 = smov %s3850_s27 }
 0x4b8   : > { %s5046_s27 = smov %s3854_s28  ;;  %s5047_s28 = smov %s3992_s19 }
 0x4b9   : > { %s5048_s29 = smov %s3982_s15  ;;  %26 = sbr.rel (!%p24_p3) target bundleno = 10 (0xa), region = 105 }
 0x4be   :  { %2917 = vsyncpa [#allocation4], 1 }
 0x4bf   :  { %2919 = vsyncpa [#allocation4 + $0x1], 1 }
 0x4c0   :  { %2920 = vsyncpa [#allocation7], 1 }
 0x4c1   :  { %2921 = vsyncpa [#allocation10], 1 }
 0x4c2   :  { %2922 = vsyncpa [#allocation5], 1 }
 0x4c3   :  { %2924 = vsyncpa [#allocation5 + $0x1], 1 }

</bundles_post_ra>
